<compile_context>
chip_gen: v7x
topology: tpu7x:2x2x1
jax: 0.10.0
libtpu: 0.0.40
codegen_flags: <defaults>
</compile_context>

<pallas_src>
import math

import jax
import jax.numpy as jnp
from jax.experimental import pallas as pl
from jax.experimental.pallas import tpu as pltpu

F32 = jnp.float32
BF16 = jnp.bfloat16
BN_EPS = 1e-5
_PADW = 8  # sublane-tile-aligned start of the interior in the W-padded f32 scratch


# --------------------------------------------------------------------------
# Fused DownBlock kernel (maxpool -> conv -> [conv -> BN -> PReLU -> conv -> BN]
#                         -> + residual -> PReLU)
# --------------------------------------------------------------------------

def _make_downblock_kernel(N, H, W, Cin, Cout):
    Hp, Wp = H // 2, W // 2
    M = N * Hp * Wp  # rows of every conv matmul (all spatial x batch positions)

    def zero_border(pad_ref, c):
        """Zero only the border strips that conv taps actually read."""
        blk = jnp.zeros((N, Hp + 2, _PADW, c), F32)
        pad_ref[:, :, 0:_PADW, :] = blk                              # left pad block (aligned)
        pad_ref[:, :, _PADW + Wp:_PADW + Wp + _PADW, :] = blk        # right pad block
        row = jnp.zeros((N, 1, Wp, c), F32)
        pad_ref[:, 0:1, _PADW:_PADW + Wp, :] = row                   # top border row
        pad_ref[:, Hp + 1:Hp + 2, _PADW:_PADW + Wp, :] = row         # bottom border row

    def conv3x3(x4d, pad_ref, w_ref, cin, b_ref=None):
        """'same' 3x3 conv as a single folded-K MXU matmul (K = 9*cin).

        x4d:     (N, Hp, Wp, cin) f32 activation value
        pad_ref: (N, Hp+2, Wp+2*_PADW, cin) f32 VMEM scratch, zero border strips
        w_ref:   (9*cin, Cout) bf16 weights (tap-major, channel-minor)
        b_ref:   optional (1, Cout) f32 bias (omitted for convs feeding BN)
        returns: (M, Cout) f32
        """
        # Interior store is fully aligned (W offset = _PADW, a sublane tile).
        pad_ref[:, 1:Hp + 1, _PADW:_PADW + Wp, :] = x4d
        # Shifted-window taps (static off-by-one sublane reads), cast to bf16 at
        # the read so the im2col operand is built directly in bf16.
        taps = [pad_ref[:, kh:kh + Hp,
                        _PADW - 1 + kw:_PADW - 1 + kw + Wp, :].astype(BF16)
                for kh in range(3) for kw in range(3)]
        a = jnp.concatenate(taps, axis=-1).reshape(M, 9 * cin)        # bf16 im2col
        acc = jnp.dot(a, w_ref[...], preferred_element_type=F32)      # f32 accumulate
        if b_ref is not None:
            acc = acc + b_ref[...]
        return acc

    def kernel(x_ref, w1_ref, b1_ref, w2_ref, w3_ref,
               g1_ref, be1_ref, g2_ref, be2_ref, a1_ref, a2_ref,
               o_ref, pad_in_ref, pad_mid_ref):
        # Border-only zeroing (interiors are fully overwritten before each conv).
        zero_border(pad_in_ref, Cin)
        zero_border(pad_mid_ref, Cout)

        ones_row = jnp.ones((1, M), F32)   # hoisted: reused by both BN reductions
        inv_m = 1.0 / M

        def batchnorm(x2d, g_ref, b_ref):
            # Training-mode batch stats; reductions over M done on the MXU.
            s1 = jnp.dot(ones_row, x2d, preferred_element_type=F32)          # (1, Cout)
            s2 = jnp.dot(ones_row, x2d * x2d, preferred_element_type=F32)    # (1, Cout)
            mean = s1 * inv_m
            var = jnp.maximum(s2 * inv_m - mean * mean, 0.0)
            return (x2d - mean) * jax.lax.rsqrt(var + BN_EPS) * g_ref[...] + b_ref[...]

        def prelu(x2d, a_ref):
            a = a_ref[0, 0]
            return jnp.where(x2d > 0, x2d, a * x2d)

        # ---- MaxPool2d(2) prologue (fully in-VMEM) -------------------------
        # x_ref: (N, H, Wp, 2*Cin); lanes [0:Cin] = even W column, [Cin:2Cin] = odd.
        xe = x_ref[:, :, :, 0:Cin]
        xo = x_ref[:, :, :, Cin:2 * Cin]
        xw = jnp.maximum(xe, xo)                                     # (N, H, Wp, Cin)
        pooled = jnp.max(xw.reshape(N, Hp, 2, Wp, Cin), axis=2)      # (N, Hp, Wp, Cin)

        # ---- _ResConvBlock --------------------------------------------------
        res = conv3x3(pooled, pad_in_ref, w1_ref, Cin, b1_ref)               # (M, Cout)
        t = conv3x3(res.reshape(N, Hp, Wp, Cout), pad_mid_ref, w2_ref, Cout)  # bias cancels in BN
        t = prelu(batchnorm(t, g1_ref, be1_ref), a1_ref)
        t = conv3x3(t.reshape(N, Hp, Wp, Cout), pad_mid_ref, w3_ref, Cout)    # bias cancels in BN
        t = batchnorm(t, g2_ref, be2_ref)
        y = prelu(t + res, a2_ref)

        o_ref[...] = y.reshape(N, Hp, Wp, Cout)

    return kernel


# --------------------------------------------------------------------------
# Wrapper: NCHW in / NCHW out, one pallas_call for the whole DownBlock
# --------------------------------------------------------------------------

def downblock_forward(params, x_nchw):
    N, Cin, H, W = x_nchw.shape
    # MaxPool2d(2) floors; this fused kernel handles the even-size case only.
    assert H % 2 == 0 and W % 2 == 0, "DownBlock kernel requires even H, W"
    Cout = params["conv_w"].shape[-1]
    Hp, Wp = H // 2, W // 2
    Wext = Wp + 2 * _PADW

    # NCHW -> NHWC, then a *contiguous* relabel (W, C) -> (W/2, 2C) so the kernel
    # does the 2x2 window max with plain lane slices (no strided HBM copies).
    x = jnp.transpose(x_nchw, (0, 2, 3, 1)).astype(F32).reshape(N, H, Wp, 2 * Cin)

    def flat_w(w):  # (3, 3, ci, co) HWIO -> (9*ci, co), tap-major/channel-minor, bf16
        kh, kw, ci, co = w.shape
        return w.reshape(kh * kw * ci, co).astype(BF16)

    # Biases of the two convs feeding BatchNorm are intentionally NOT passed:
    # conv-bias followed by training-mode BN cancels exactly.
    args = (
        x,
        flat_w(params["conv_w"]), params["conv_b"].reshape(1, Cout).astype(F32),
        flat_w(params["rconv1_w"]),
        flat_w(params["rconv2_w"]),
        params["bn1_g"].reshape(1, Cout).astype(F32),
        params["bn1_b"].reshape(1, Cout).astype(F32),
        params["bn2_g"].reshape(1, Cout).astype(F32),
        params["bn2_b"].reshape(1, Cout).astype(F32),
        params["prelu1"].reshape(1, 1).astype(F32),
        params["prelu_out"].reshape(1, 1).astype(F32),
    )

    # Generation-aware scoped-VMEM limit: resident operands + scratch + the
    # largest transients (bf16 im2col, a few (M, Cout) f32 values), 2x headroom,
    # clamped to 3/4 of the chip's physical VMEM (64 MiB on v7x, 128 on v5e/v6e).
    M = N * Hp * Wp
    resident = sum(int(a.size) * a.dtype.itemsize for a in args)
    resident += N * Hp * Wp * Cout * 4                               # output block
    resident += N * (Hp + 2) * Wext * (Cin + Cout) * 4               # f32 pad scratches
    resident += 2 * M * 9 * Cout * 2 + 6 * M * Cout * 4              # transients
    try:
        cap = int(pltpu.get_tpu_info().vmem_capacity_bytes)
    except Exception:
        cap = 64 << 20
    vmem_limit = min(max(2 * resident, 32 << 20), (cap * 3) // 4)

    vmem = pl.BlockSpec(memory_space=pltpu.MemorySpace.VMEM)
    smem = pl.BlockSpec(memory_space=pltpu.MemorySpace.SMEM)

    out_nhwc = pl.pallas_call(
        _make_downblock_kernel(N, H, W, Cin, Cout),
        out_shape=jax.ShapeDtypeStruct((N, Hp, Wp, Cout), F32),
        in_specs=[vmem] * 9 + [smem, smem],
        out_specs=vmem,
        scratch_shapes=[
            pltpu.VMEM((N, Hp + 2, Wext, Cin), F32),    # zero-bordered conv1 input
            pltpu.VMEM((N, Hp + 2, Wext, Cout), F32),   # reused for rconv1 / rconv2
        ],
        compiler_params=pltpu.CompilerParams(vmem_limit_bytes=int(vmem_limit)),
    )(*args)
    return jnp.transpose(out_nhwc, (0, 3, 1, 2))  # NHWC -> NCHW


# --------------------------------------------------------------------------
# Deterministic synthetic parameters (PyTorch-default-style init)
# --------------------------------------------------------------------------

def _conv_init(key, cin, cout, kh, kw):
    k1, k2 = jax.random.split(key)
    bound = 1.0 / (cin * kh * kw) ** 0.5
    w = jax.random.uniform(k1, (kh, kw, cin, cout), F32, -bound, bound)
    b = jax.random.uniform(k2, (cout,), F32, -bound, bound)
    return w, b


def init_downblock_params(key, inplane, outplane):
    k1, k2, k3 = jax.random.split(key, 3)
    conv_w, conv_b = _conv_init(k1, inplane, outplane, 3, 3)
    r1_w, r1_b = _conv_init(k2, outplane, outplane, 3, 3)
    r2_w, r2_b = _conv_init(k3, outplane, outplane, 3, 3)
    return {
        "conv_w": conv_w, "conv_b": conv_b,
        # rconv biases exist in the PyTorch module but are mathematically
        # cancelled by the training-mode BatchNorms that follow them.
        "rconv1_w": r1_w, "rconv1_b": r1_b,
        "rconv2_w": r2_w, "rconv2_b": r2_b,
        "bn1_g": jnp.ones((outplane,), F32), "bn1_b": jnp.zeros((outplane,), F32),
        "bn2_g": jnp.ones((outplane,), F32), "bn2_b": jnp.zeros((outplane,), F32),
        "prelu1": jnp.full((1, 1), 0.25, F32),      # PReLU inside resconv
        "prelu_out": jnp.full((1, 1), 0.25, F32),   # block-level PReLU
    }


# --------------------------------------------------------------------------

if __name__ == "__main__":
    inplane, outplane = 4, 8
    N, H, W = 2, 16, 16

    kx, kp = jax.random.split(jax.random.PRNGKey(0))
    x = jax.random.normal(kx, (N, inplane, H, W), F32)          # NCHW input
    params = init_downblock_params(kp, inplane, outplane)

    fwd = jax.jit(downblock_forward)
    out = fwd(params, x)
    jax.block_until_ready(out)

    assert out.shape == (N, outplane, H // 2, W // 2), out.shape
    assert out.dtype == jnp.float32
    assert bool(jnp.all(jnp.isfinite(out)))
    print("KERNEL_OK")
</pallas_src>

<mosaic_0001>
module attributes {stable_mosaic.version = 11 : i64} {
  func.func @kernel(%arg0: memref<2x16x8x8xf32, #tpu.memory_space<vmem>>, %arg1: memref<36x8xbf16, #tpu.memory_space<vmem>>, %arg2: memref<1x8xf32, #tpu.memory_space<vmem>>, %arg3: memref<72x8xbf16, #tpu.memory_space<vmem>>, %arg4: memref<72x8xbf16, #tpu.memory_space<vmem>>, %arg5: memref<1x8xf32, #tpu.memory_space<vmem>>, %arg6: memref<1x8xf32, #tpu.memory_space<vmem>>, %arg7: memref<1x8xf32, #tpu.memory_space<vmem>>, %arg8: memref<1x8xf32, #tpu.memory_space<vmem>>, %arg9: memref<1x1xf32, #tpu.memory_space<smem>>, %arg10: memref<1x1xf32, #tpu.memory_space<smem>>, %arg11: memref<2x8x8x8xf32, #tpu.memory_space<vmem>>, %arg12: memref<2x10x24x4xf32, #tpu.memory_space<vmem>>, %arg13: memref<2x10x24x8xf32, #tpu.memory_space<vmem>>) attributes {dimension_semantics = [], scalar_prefetch = 0 : i64, scratch_operands = 2 : i64, tpu.core_type = #tpu.core_type<tc>} {
    %cst = arith.constant 0.000000e+00 : f32
    %0 = vector.broadcast %cst : f32 to vector<2x10x8x4xf32>
    %c0 = arith.constant 0 : index
    %c0_0 = arith.constant 0 : index
    %c0_1 = arith.constant 0 : index
    %c0_2 = arith.constant 0 : index
    %1 = vector.load %arg12[%c0, %c0_0, %c0_1, %c0_2] : memref<2x10x24x4xf32, #tpu.memory_space<vmem>>, vector<2x10x8x4xf32>
    tpu.vector_store %arg12[%c0, %c0_0, %c0_1, %c0_2], %0 {strides = array<i32>} : memref<2x10x24x4xf32, #tpu.memory_space<vmem>>, vector<2x10x8x4xf32>,
    %c0_3 = arith.constant 0 : index
    %c0_4 = arith.constant 0 : index
    %c16 = arith.constant 16 : index
    %c0_5 = arith.constant 0 : index
    %2 = vector.load %arg12[%c0_3, %c0_4, %c16, %c0_5] : memref<2x10x24x4xf32, #tpu.memory_space<vmem>>, vector<2x10x8x4xf32>
    tpu.vector_store %arg12[%c0_3, %c0_4, %c16, %c0_5], %0 {strides = array<i32>} : memref<2x10x24x4xf32, #tpu.memory_space<vmem>>, vector<2x10x8x4xf32>,
    %cst_6 = arith.constant 0.000000e+00 : f32
    %3 = vector.broadcast %cst_6 : f32 to vector<2x1x8x4xf32>
    %c0_7 = arith.constant 0 : index
    %c0_8 = arith.constant 0 : index
    %c8 = arith.constant 8 : index
    %c0_9 = arith.constant 0 : index
    %4 = vector.load %arg12[%c0_7, %c0_8, %c8, %c0_9] : memref<2x10x24x4xf32, #tpu.memory_space<vmem>>, vector<2x1x8x4xf32>
    tpu.vector_store %arg12[%c0_7, %c0_8, %c8, %c0_9], %3 {strides = array<i32>} : memref<2x10x24x4xf32, #tpu.memory_space<vmem>>, vector<2x1x8x4xf32>,
    %c0_10 = arith.constant 0 : index
    %c9 = arith.constant 9 : index
    %c8_11 = arith.constant 8 : index
    %c0_12 = arith.constant 0 : index
    %5 = vector.load %arg12[%c0_10, %c9, %c8_11, %c0_12] : memref<2x10x24x4xf32, #tpu.memory_space<vmem>>, vector<2x1x8x4xf32>
    tpu.vector_store %arg12[%c0_10, %c9, %c8_11, %c0_12], %3 {strides = array<i32>} : memref<2x10x24x4xf32, #tpu.memory_space<vmem>>, vector<2x1x8x4xf32>,
    %cst_13 = arith.constant 0.000000e+00 : f32
    %6 = vector.broadcast %cst_13 : f32 to vector<2x10x8x8xf32>
    %c0_14 = arith.constant 0 : index
    %c0_15 = arith.constant 0 : index
    %c0_16 = arith.constant 0 : index
    %c0_17 = arith.constant 0 : index
    %7 = vector.load %arg13[%c0_14, %c0_15, %c0_16, %c0_17] : memref<2x10x24x8xf32, #tpu.memory_space<vmem>>, vector<2x10x8x8xf32>
    tpu.vector_store %arg13[%c0_14, %c0_15, %c0_16, %c0_17], %6 {strides = array<i32>} : memref<2x10x24x8xf32, #tpu.memory_space<vmem>>, vector<2x10x8x8xf32>,
    %c0_18 = arith.constant 0 : index
    %c0_19 = arith.constant 0 : index
    %c16_20 = arith.constant 16 : index
    %c0_21 = arith.constant 0 : index
    %8 = vector.load %arg13[%c0_18, %c0_19, %c16_20, %c0_21] : memref<2x10x24x8xf32, #tpu.memory_space<vmem>>, vector<2x10x8x8xf32>
    tpu.vector_store %arg13[%c0_18, %c0_19, %c16_20, %c0_21], %6 {strides = array<i32>} : memref<2x10x24x8xf32, #tpu.memory_space<vmem>>, vector<2x10x8x8xf32>,
    %cst_22 = arith.constant 0.000000e+00 : f32
    %9 = vector.broadcast %cst_22 : f32 to vector<2x1x8x8xf32>
    %c0_23 = arith.constant 0 : index
    %c0_24 = arith.constant 0 : index
    %c8_25 = arith.constant 8 : index
    %c0_26 = arith.constant 0 : index
    %10 = vector.load %arg13[%c0_23, %c0_24, %c8_25, %c0_26] : memref<2x10x24x8xf32, #tpu.memory_space<vmem>>, vector<2x1x8x8xf32>
    tpu.vector_store %arg13[%c0_23, %c0_24, %c8_25, %c0_26], %9 {strides = array<i32>} : memref<2x10x24x8xf32, #tpu.memory_space<vmem>>, vector<2x1x8x8xf32>,
    %c0_27 = arith.constant 0 : index
    %c9_28 = arith.constant 9 : index
    %c8_29 = arith.constant 8 : index
    %c0_30 = arith.constant 0 : index
    %11 = vector.load %arg13[%c0_27, %c9_28, %c8_29, %c0_30] : memref<2x10x24x8xf32, #tpu.memory_space<vmem>>, vector<2x1x8x8xf32>
    tpu.vector_store %arg13[%c0_27, %c9_28, %c8_29, %c0_30], %9 {strides = array<i32>} : memref<2x10x24x8xf32, #tpu.memory_space<vmem>>, vector<2x1x8x8xf32>,
    %cst_31 = arith.constant 1.000000e+00 : f32
    %12 = vector.broadcast %cst_31 : f32 to vector<1x128xf32>
    %c0_32 = arith.constant 0 : index
    %c0_33 = arith.constant 0 : index
    %c0_34 = arith.constant 0 : index
    %c0_35 = arith.constant 0 : index
    %13 = vector.load %arg0[%c0_32, %c0_33, %c0_34, %c0_35] : memref<2x16x8x8xf32, #tpu.memory_space<vmem>>, vector<2x16x8x4xf32>
    %c0_36 = arith.constant 0 : index
    %c0_37 = arith.constant 0 : index
    %c0_38 = arith.constant 0 : index
    %c4 = arith.constant 4 : index
    %14 = vector.load %arg0[%c0_36, %c0_37, %c0_38, %c4] : memref<2x16x8x8xf32, #tpu.memory_space<vmem>>, vector<2x16x8x4xf32>
    %15 = arith.maximumf %13, %14 : vector<2x16x8x4xf32>
    %16 = vector.shape_cast %15 : vector<2x16x8x4xf32> to vector<2x8x2x8x4xf32>
    %cst_39 = arith.constant dense<0xFF800000> : vector<2x8x8x4xf32>
    %17 = vector.multi_reduction <maximumf>, %16, %cst_39 [2] : vector<2x8x2x8x4xf32> to vector<2x8x8x4xf32>
    %c0_40 = arith.constant 0 : index
    %c1 = arith.constant 1 : index
    %c8_41 = arith.constant 8 : index
    %c0_42 = arith.constant 0 : index
    %18 = vector.load %arg12[%c0_40, %c1, %c8_41, %c0_42] : memref<2x10x24x4xf32, #tpu.memory_space<vmem>>, vector<2x8x8x4xf32>
    tpu.vector_store %arg12[%c0_40, %c1, %c8_41, %c0_42], %17 {strides = array<i32>} : memref<2x10x24x4xf32, #tpu.memory_space<vmem>>, vector<2x8x8x4xf32>,
    %c0_43 = arith.constant 0 : index
    %c0_44 = arith.constant 0 : index
    %c7 = arith.constant 7 : index
    %c0_45 = arith.constant 0 : index
    %19 = vector.load %arg12[%c0_43, %c0_44, %c7, %c0_45] : memref<2x10x24x4xf32, #tpu.memory_space<vmem>>, vector<2x8x8x4xf32>
    %20 = arith.truncf %19 : vector<2x8x8x4xf32> to vector<2x8x8x4xbf16>
    %c0_46 = arith.constant 0 : index
    %c0_47 = arith.constant 0 : index
    %c8_48 = arith.constant 8 : index
    %c0_49 = arith.constant 0 : index
    %21 = vector.load %arg12[%c0_46, %c0_47, %c8_48, %c0_49] : memref<2x10x24x4xf32, #tpu.memory_space<vmem>>, vector<2x8x8x4xf32>
    %22 = arith.truncf %21 : vector<2x8x8x4xf32> to vector<2x8x8x4xbf16>
    %c0_50 = arith.constant 0 : index
    %c0_51 = arith.constant 0 : index
    %c9_52 = arith.constant 9 : index
    %c0_53 = arith.constant 0 : index
    %23 = vector.load %arg12[%c0_50, %c0_51, %c9_52, %c0_53] : memref<2x10x24x4xf32, #tpu.memory_space<vmem>>, vector<2x8x8x4xf32>
    %24 = arith.truncf %23 : vector<2x8x8x4xf32> to vector<2x8x8x4xbf16>
    %c0_54 = arith.constant 0 : index
    %c1_55 = arith.constant 1 : index
    %c7_56 = arith.constant 7 : index
    %c0_57 = arith.constant 0 : index
    %25 = vector.load %arg12[%c0_54, %c1_55, %c7_56, %c0_57] : memref<2x10x24x4xf32, #tpu.memory_space<vmem>>, vector<2x8x8x4xf32>
    %26 = arith.truncf %25 : vector<2x8x8x4xf32> to vector<2x8x8x4xbf16>
    %c0_58 = arith.constant 0 : index
    %c1_59 = arith.constant 1 : index
    %c8_60 = arith.constant 8 : index
    %c0_61 = arith.constant 0 : index
    %27 = vector.load %arg12[%c0_58, %c1_59, %c8_60, %c0_61] : memref<2x10x24x4xf32, #tpu.memory_space<vmem>>, vector<2x8x8x4xf32>
    %28 = arith.truncf %27 : vector<2x8x8x4xf32> to vector<2x8x8x4xbf16>
    %c0_62 = arith.constant 0 : index
    %c1_63 = arith.constant 1 : index
    %c9_64 = arith.constant 9 : index
    %c0_65 = arith.constant 0 : index
    %29 = vector.load %arg12[%c0_62, %c1_63, %c9_64, %c0_65] : memref<2x10x24x4xf32, #tpu.memory_space<vmem>>, vector<2x8x8x4xf32>
    %30 = arith.truncf %29 : vector<2x8x8x4xf32> to vector<2x8x8x4xbf16>
    %c0_66 = arith.constant 0 : index
    %c2 = arith.constant 2 : index
    %c7_67 = arith.constant 7 : index
    %c0_68 = arith.constant 0 : index
    %31 = vector.load %arg12[%c0_66, %c2, %c7_67, %c0_68] : memref<2x10x24x4xf32, #tpu.memory_space<vmem>>, vector<2x8x8x4xf32>
    %32 = arith.truncf %31 : vector<2x8x8x4xf32> to vector<2x8x8x4xbf16>
    %c0_69 = arith.constant 0 : index
    %c2_70 = arith.constant 2 : index
    %c8_71 = arith.constant 8 : index
    %c0_72 = arith.constant 0 : index
    %33 = vector.load %arg12[%c0_69, %c2_70, %c8_71, %c0_72] : memref<2x10x24x4xf32, #tpu.memory_space<vmem>>, vector<2x8x8x4xf32>
    %34 = arith.truncf %33 : vector<2x8x8x4xf32> to vector<2x8x8x4xbf16>
    %c0_73 = arith.constant 0 : index
    %c2_74 = arith.constant 2 : index
    %c9_75 = arith.constant 9 : index
    %c0_76 = arith.constant 0 : index
    %35 = vector.load %arg12[%c0_73, %c2_74, %c9_75, %c0_76] : memref<2x10x24x4xf32, #tpu.memory_space<vmem>>, vector<2x8x8x4xf32>
    %36 = arith.truncf %35 : vector<2x8x8x4xf32> to vector<2x8x8x4xbf16>
    %37 = tpu.concatenate %20, %22, %24, %26, %28, %30, %32, %34, %36 in 3 : vector<2x8x8x4xbf16>, vector<2x8x8x4xbf16>, vector<2x8x8x4xbf16>, vector<2x8x8x4xbf16>, vector<2x8x8x4xbf16>, vector<2x8x8x4xbf16>, vector<2x8x8x4xbf16>, vector<2x8x8x4xbf16>, vector<2x8x8x4xbf16> -> vector<2x8x8x36xbf16>
    %38 = vector.shape_cast %37 : vector<2x8x8x36xbf16> to vector<128x36xbf16>
    %c0_77 = arith.constant 0 : index
    %c0_78 = arith.constant 0 : index
    %39 = vector.load %arg1[%c0_77, %c0_78] : memref<36x8xbf16, #tpu.memory_space<vmem>>, vector<36x8xbf16>
    %cst_79 = arith.constant dense<0.000000e+00> : vector<128x8xf32>
    %40 = tpu.matmul %38, %39, %cst_79 {dimension_numbers = #tpu.dot_dimension_numbers<[1], [0], [0], [1], [0, 0, 1, 1], [], []>} : vector<128x36xbf16>, vector<36x8xbf16>, vector<128x8xf32> -> vector<128x8xf32>
    %c0_80 = arith.constant 0 : index
    %c0_81 = arith.constant 0 : index
    %41 = vector.load %arg2[%c0_80, %c0_81] : memref<1x8xf32, #tpu.memory_space<vmem>>, vector<1x8xf32>
    %42 = vector.broadcast %41 : vector<1x8xf32> to vector<128x8xf32>
    %43 = arith.addf %40, %42 : vector<128x8xf32>
    %44 = vector.shape_cast %43 : vector<128x8xf32> to vector<2x8x8x8xf32>
    %c0_82 = arith.constant 0 : index
    %c1_83 = arith.constant 1 : index
    %c8_84 = arith.constant 8 : index
    %c0_85 = arith.constant 0 : index
    %45 = vector.load %arg13[%c0_82, %c1_83, %c8_84, %c0_85] : memref<2x10x24x8xf32, #tpu.memory_space<vmem>>, vector<2x8x8x8xf32>
    tpu.vector_store %arg13[%c0_82, %c1_83, %c8_84, %c0_85], %44 {strides = array<i32>} : memref<2x10x24x8xf32, #tpu.memory_space<vmem>>, vector<2x8x8x8xf32>,
    %c0_86 = arith.constant 0 : index
    %c0_87 = arith.constant 0 : index
    %c7_88 = arith.constant 7 : index
    %c0_89 = arith.constant 0 : index
    %46 = vector.load %arg13[%c0_86, %c0_87, %c7_88, %c0_89] : memref<2x10x24x8xf32, #tpu.memory_space<vmem>>, vector<2x8x8x8xf32>
    %47 = arith.truncf %46 : vector<2x8x8x8xf32> to vector<2x8x8x8xbf16>
    %c0_90 = arith.constant 0 : index
    %c0_91 = arith.constant 0 : index
    %c8_92 = arith.constant 8 : index
    %c0_93 = arith.constant 0 : index
    %48 = vector.load %arg13[%c0_90, %c0_91, %c8_92, %c0_93] : memref<2x10x24x8xf32, #tpu.memory_space<vmem>>, vector<2x8x8x8xf32>
    %49 = arith.truncf %48 : vector<2x8x8x8xf32> to vector<2x8x8x8xbf16>
    %c0_94 = arith.constant 0 : index
    %c0_95 = arith.constant 0 : index
    %c9_96 = arith.constant 9 : index
    %c0_97 = arith.constant 0 : index
    %50 = vector.load %arg13[%c0_94, %c0_95, %c9_96, %c0_97] : memref<2x10x24x8xf32, #tpu.memory_space<vmem>>, vector<2x8x8x8xf32>
    %51 = arith.truncf %50 : vector<2x8x8x8xf32> to vector<2x8x8x8xbf16>
    %c0_98 = arith.constant 0 : index
    %c1_99 = arith.constant 1 : index
    %c7_100 = arith.constant 7 : index
    %c0_101 = arith.constant 0 : index
    %52 = vector.load %arg13[%c0_98, %c1_99, %c7_100, %c0_101] : memref<2x10x24x8xf32, #tpu.memory_space<vmem>>, vector<2x8x8x8xf32>
    %53 = arith.truncf %52 : vector<2x8x8x8xf32> to vector<2x8x8x8xbf16>
    %c0_102 = arith.constant 0 : index
    %c1_103 = arith.constant 1 : index
    %c8_104 = arith.constant 8 : index
    %c0_105 = arith.constant 0 : index
    %54 = vector.load %arg13[%c0_102, %c1_103, %c8_104, %c0_105] : memref<2x10x24x8xf32, #tpu.memory_space<vmem>>, vector<2x8x8x8xf32>
    %55 = arith.truncf %54 : vector<2x8x8x8xf32> to vector<2x8x8x8xbf16>
    %c0_106 = arith.constant 0 : index
    %c1_107 = arith.constant 1 : index
    %c9_108 = arith.constant 9 : index
    %c0_109 = arith.constant 0 : index
    %56 = vector.load %arg13[%c0_106, %c1_107, %c9_108, %c0_109] : memref<2x10x24x8xf32, #tpu.memory_space<vmem>>, vector<2x8x8x8xf32>
    %57 = arith.truncf %56 : vector<2x8x8x8xf32> to vector<2x8x8x8xbf16>
    %c0_110 = arith.constant 0 : index
    %c2_111 = arith.constant 2 : index
    %c7_112 = arith.constant 7 : index
    %c0_113 = arith.constant 0 : index
    %58 = vector.load %arg13[%c0_110, %c2_111, %c7_112, %c0_113] : memref<2x10x24x8xf32, #tpu.memory_space<vmem>>, vector<2x8x8x8xf32>
    %59 = arith.truncf %58 : vector<2x8x8x8xf32> to vector<2x8x8x8xbf16>
    %c0_114 = arith.constant 0 : index
    %c2_115 = arith.constant 2 : index
    %c8_116 = arith.constant 8 : index
    %c0_117 = arith.constant 0 : index
    %60 = vector.load %arg13[%c0_114, %c2_115, %c8_116, %c0_117] : memref<2x10x24x8xf32, #tpu.memory_space<vmem>>, vector<2x8x8x8xf32>
    %61 = arith.truncf %60 : vector<2x8x8x8xf32> to vector<2x8x8x8xbf16>
    %c0_118 = arith.constant 0 : index
    %c2_119 = arith.constant 2 : index
    %c9_120 = arith.constant 9 : index
    %c0_121 = arith.constant 0 : index
    %62 = vector.load %arg13[%c0_118, %c2_119, %c9_120, %c0_121] : memref<2x10x24x8xf32, #tpu.memory_space<vmem>>, vector<2x8x8x8xf32>
    %63 = arith.truncf %62 : vector<2x8x8x8xf32> to vector<2x8x8x8xbf16>
    %64 = tpu.concatenate %47, %49, %51, %53, %55, %57, %59, %61, %63 in 3 : vector<2x8x8x8xbf16>, vector<2x8x8x8xbf16>, vector<2x8x8x8xbf16>, vector<2x8x8x8xbf16>, vector<2x8x8x8xbf16>, vector<2x8x8x8xbf16>, vector<2x8x8x8xbf16>, vector<2x8x8x8xbf16>, vector<2x8x8x8xbf16> -> vector<2x8x8x72xbf16>
    %65 = vector.shape_cast %64 : vector<2x8x8x72xbf16> to vector<128x72xbf16>
    %c0_122 = arith.constant 0 : index
    %c0_123 = arith.constant 0 : index
    %66 = vector.load %arg3[%c0_122, %c0_123] : memref<72x8xbf16, #tpu.memory_space<vmem>>, vector<72x8xbf16>
    %cst_124 = arith.constant dense<0.000000e+00> : vector<128x8xf32>
    %67 = tpu.matmul %65, %66, %cst_124 {dimension_numbers = #tpu.dot_dimension_numbers<[1], [0], [0], [1], [0, 0, 1, 1], [], []>} : vector<128x72xbf16>, vector<72x8xbf16>, vector<128x8xf32> -> vector<128x8xf32>
    %cst_125 = arith.constant dense<0.000000e+00> : vector<1x8xf32>
    %68 = tpu.matmul %12, %67, %cst_125 {dimension_numbers = #tpu.dot_dimension_numbers<[1], [0], [0], [1], [0, 0, 1, 1], [], []>} : vector<1x128xf32>, vector<128x8xf32>, vector<1x8xf32> -> vector<1x8xf32>
    %69 = arith.mulf %67, %67 : vector<128x8xf32>
    %cst_126 = arith.constant dense<0.000000e+00> : vector<1x8xf32>
    %70 = tpu.matmul %12, %69, %cst_126 {dimension_numbers = #tpu.dot_dimension_numbers<[1], [0], [0], [1], [0, 0, 1, 1], [], []>} : vector<1x128xf32>, vector<128x8xf32>, vector<1x8xf32> -> vector<1x8xf32>
    %cst_127 = arith.constant 7.812500e-03 : f32
    %71 = vector.broadcast %cst_127 : f32 to vector<1x8xf32>
    %72 = arith.mulf %68, %71 : vector<1x8xf32>
    %cst_128 = arith.constant 7.812500e-03 : f32
    %73 = vector.broadcast %cst_128 : f32 to vector<1x8xf32>
    %74 = arith.mulf %70, %73 : vector<1x8xf32>
    %75 = arith.mulf %72, %72 : vector<1x8xf32>
    %76 = arith.subf %74, %75 : vector<1x8xf32>
    %cst_129 = arith.constant 0.000000e+00 : f32
    %77 = vector.broadcast %cst_129 : f32 to vector<1x8xf32>
    %78 = arith.maximumf %76, %77 : vector<1x8xf32>
    %79 = vector.broadcast %72 : vector<1x8xf32> to vector<128x8xf32>
    %80 = arith.subf %67, %79 : vector<128x8xf32>
    %cst_130 = arith.constant 9.99999974E-6 : f32
    %81 = vector.broadcast %cst_130 : f32 to vector<1x8xf32>
    %82 = arith.addf %78, %81 : vector<1x8xf32>
    %83 = math.rsqrt %82 : vector<1x8xf32>
    %84 = vector.broadcast %83 : vector<1x8xf32> to vector<128x8xf32>
    %85 = arith.mulf %80, %84 : vector<128x8xf32>
    %c0_131 = arith.constant 0 : index
    %c0_132 = arith.constant 0 : index
    %86 = vector.load %arg5[%c0_131, %c0_132] : memref<1x8xf32, #tpu.memory_space<vmem>>, vector<1x8xf32>
    %87 = vector.broadcast %86 : vector<1x8xf32> to vector<128x8xf32>
    %88 = arith.mulf %85, %87 : vector<128x8xf32>
    %c0_133 = arith.constant 0 : index
    %c0_134 = arith.constant 0 : index
    %89 = vector.load %arg6[%c0_133, %c0_134] : memref<1x8xf32, #tpu.memory_space<vmem>>, vector<1x8xf32>
    %90 = vector.broadcast %89 : vector<1x8xf32> to vector<128x8xf32>
    %91 = arith.addf %88, %90 : vector<128x8xf32>
    %c0_135 = arith.constant 0 : index
    %c0_136 = arith.constant 0 : index
    %92 = memref.load %arg9[%c0_135, %c0_136] : memref<1x1xf32, #tpu.memory_space<smem>>
    %cst_137 = arith.constant 0.000000e+00 : f32
    %93 = vector.broadcast %cst_137 : f32 to vector<128x8xf32>
    %94 = arith.cmpf ogt, %91, %93 : vector<128x8xf32>
    %95 = vector.broadcast %92 : f32 to vector<128x8xf32>
    %96 = arith.mulf %95, %91 : vector<128x8xf32>
    %97 = arith.select %94, %91, %96 : vector<128x8xi1>, vector<128x8xf32>
    %98 = vector.shape_cast %97 : vector<128x8xf32> to vector<2x8x8x8xf32>
    %c0_138 = arith.constant 0 : index
    %c1_139 = arith.constant 1 : index
    %c8_140 = arith.constant 8 : index
    %c0_141 = arith.constant 0 : index
    %99 = vector.load %arg13[%c0_138, %c1_139, %c8_140, %c0_141] : memref<2x10x24x8xf32, #tpu.memory_space<vmem>>, vector<2x8x8x8xf32>
    tpu.vector_store %arg13[%c0_138, %c1_139, %c8_140, %c0_141], %98 {strides = array<i32>} : memref<2x10x24x8xf32, #tpu.memory_space<vmem>>, vector<2x8x8x8xf32>,
    %c0_142 = arith.constant 0 : index
    %c0_143 = arith.constant 0 : index
    %c7_144 = arith.constant 7 : index
    %c0_145 = arith.constant 0 : index
    %100 = vector.load %arg13[%c0_142, %c0_143, %c7_144, %c0_145] : memref<2x10x24x8xf32, #tpu.memory_space<vmem>>, vector<2x8x8x8xf32>
    %101 = arith.truncf %100 : vector<2x8x8x8xf32> to vector<2x8x8x8xbf16>
    %c0_146 = arith.constant 0 : index
    %c0_147 = arith.constant 0 : index
    %c8_148 = arith.constant 8 : index
    %c0_149 = arith.constant 0 : index
    %102 = vector.load %arg13[%c0_146, %c0_147, %c8_148, %c0_149] : memref<2x10x24x8xf32, #tpu.memory_space<vmem>>, vector<2x8x8x8xf32>
    %103 = arith.truncf %102 : vector<2x8x8x8xf32> to vector<2x8x8x8xbf16>
    %c0_150 = arith.constant 0 : index
    %c0_151 = arith.constant 0 : index
    %c9_152 = arith.constant 9 : index
    %c0_153 = arith.constant 0 : index
    %104 = vector.load %arg13[%c0_150, %c0_151, %c9_152, %c0_153] : memref<2x10x24x8xf32, #tpu.memory_space<vmem>>, vector<2x8x8x8xf32>
    %105 = arith.truncf %104 : vector<2x8x8x8xf32> to vector<2x8x8x8xbf16>
    %c0_154 = arith.constant 0 : index
    %c1_155 = arith.constant 1 : index
    %c7_156 = arith.constant 7 : index
    %c0_157 = arith.constant 0 : index
    %106 = vector.load %arg13[%c0_154, %c1_155, %c7_156, %c0_157] : memref<2x10x24x8xf32, #tpu.memory_space<vmem>>, vector<2x8x8x8xf32>
    %107 = arith.truncf %106 : vector<2x8x8x8xf32> to vector<2x8x8x8xbf16>
    %c0_158 = arith.constant 0 : index
    %c1_159 = arith.constant 1 : index
    %c8_160 = arith.constant 8 : index
    %c0_161 = arith.constant 0 : index
    %108 = vector.load %arg13[%c0_158, %c1_159, %c8_160, %c0_161] : memref<2x10x24x8xf32, #tpu.memory_space<vmem>>, vector<2x8x8x8xf32>
    %109 = arith.truncf %108 : vector<2x8x8x8xf32> to vector<2x8x8x8xbf16>
    %c0_162 = arith.constant 0 : index
    %c1_163 = arith.constant 1 : index
    %c9_164 = arith.constant 9 : index
    %c0_165 = arith.constant 0 : index
    %110 = vector.load %arg13[%c0_162, %c1_163, %c9_164, %c0_165] : memref<2x10x24x8xf32, #tpu.memory_space<vmem>>, vector<2x8x8x8xf32>
    %111 = arith.truncf %110 : vector<2x8x8x8xf32> to vector<2x8x8x8xbf16>
    %c0_166 = arith.constant 0 : index
    %c2_167 = arith.constant 2 : index
    %c7_168 = arith.constant 7 : index
    %c0_169 = arith.constant 0 : index
    %112 = vector.load %arg13[%c0_166, %c2_167, %c7_168, %c0_169] : memref<2x10x24x8xf32, #tpu.memory_space<vmem>>, vector<2x8x8x8xf32>
    %113 = arith.truncf %112 : vector<2x8x8x8xf32> to vector<2x8x8x8xbf16>
    %c0_170 = arith.constant 0 : index
    %c2_171 = arith.constant 2 : index
    %c8_172 = arith.constant 8 : index
    %c0_173 = arith.constant 0 : index
    %114 = vector.load %arg13[%c0_170, %c2_171, %c8_172, %c0_173] : memref<2x10x24x8xf32, #tpu.memory_space<vmem>>, vector<2x8x8x8xf32>
    %115 = arith.truncf %114 : vector<2x8x8x8xf32> to vector<2x8x8x8xbf16>
    %c0_174 = arith.constant 0 : index
    %c2_175 = arith.constant 2 : index
    %c9_176 = arith.constant 9 : index
    %c0_177 = arith.constant 0 : index
    %116 = vector.load %arg13[%c0_174, %c2_175, %c9_176, %c0_177] : memref<2x10x24x8xf32, #tpu.memory_space<vmem>>, vector<2x8x8x8xf32>
    %117 = arith.truncf %116 : vector<2x8x8x8xf32> to vector<2x8x8x8xbf16>
    %118 = tpu.concatenate %101, %103, %105, %107, %109, %111, %113, %115, %117 in 3 : vector<2x8x8x8xbf16>, vector<2x8x8x8xbf16>, vector<2x8x8x8xbf16>, vector<2x8x8x8xbf16>, vector<2x8x8x8xbf16>, vector<2x8x8x8xbf16>, vector<2x8x8x8xbf16>, vector<2x8x8x8xbf16>, vector<2x8x8x8xbf16> -> vector<2x8x8x72xbf16>
    %119 = vector.shape_cast %118 : vector<2x8x8x72xbf16> to vector<128x72xbf16>
    %c0_178 = arith.constant 0 : index
    %c0_179 = arith.constant 0 : index
    %120 = vector.load %arg4[%c0_178, %c0_179] : memref<72x8xbf16, #tpu.memory_space<vmem>>, vector<72x8xbf16>
    %cst_180 = arith.constant dense<0.000000e+00> : vector<128x8xf32>
    %121 = tpu.matmul %119, %120, %cst_180 {dimension_numbers = #tpu.dot_dimension_numbers<[1], [0], [0], [1], [0, 0, 1, 1], [], []>} : vector<128x72xbf16>, vector<72x8xbf16>, vector<128x8xf32> -> vector<128x8xf32>
    %cst_181 = arith.constant dense<0.000000e+00> : vector<1x8xf32>
    %122 = tpu.matmul %12, %121, %cst_181 {dimension_numbers = #tpu.dot_dimension_numbers<[1], [0], [0], [1], [0, 0, 1, 1], [], []>} : vector<1x128xf32>, vector<128x8xf32>, vector<1x8xf32> -> vector<1x8xf32>
    %123 = arith.mulf %121, %121 : vector<128x8xf32>
    %cst_182 = arith.constant dense<0.000000e+00> : vector<1x8xf32>
    %124 = tpu.matmul %12, %123, %cst_182 {dimension_numbers = #tpu.dot_dimension_numbers<[1], [0], [0], [1], [0, 0, 1, 1], [], []>} : vector<1x128xf32>, vector<128x8xf32>, vector<1x8xf32> -> vector<1x8xf32>
    %cst_183 = arith.constant 7.812500e-03 : f32
    %125 = vector.broadcast %cst_183 : f32 to vector<1x8xf32>
    %126 = arith.mulf %122, %125 : vector<1x8xf32>
    %cst_184 = arith.constant 7.812500e-03 : f32
    %127 = vector.broadcast %cst_184 : f32 to vector<1x8xf32>
    %128 = arith.mulf %124, %127 : vector<1x8xf32>
    %129 = arith.mulf %126, %126 : vector<1x8xf32>
    %130 = arith.subf %128, %129 : vector<1x8xf32>
    %cst_185 = arith.constant 0.000000e+00 : f32
    %131 = vector.broadcast %cst_185 : f32 to vector<1x8xf32>
    %132 = arith.maximumf %130, %131 : vector<1x8xf32>
    %133 = vector.broadcast %126 : vector<1x8xf32> to vector<128x8xf32>
    %134 = arith.subf %121, %133 : vector<128x8xf32>
    %cst_186 = arith.constant 9.99999974E-6 : f32
    %135 = vector.broadcast %cst_186 : f32 to vector<1x8xf32>
    %136 = arith.addf %132, %135 : vector<1x8xf32>
    %137 = math.rsqrt %136 : vector<1x8xf32>
    %138 = vector.broadcast %137 : vector<1x8xf32> to vector<128x8xf32>
    %139 = arith.mulf %134, %138 : vector<128x8xf32>
    %c0_187 = arith.constant 0 : index
    %c0_188 = arith.constant 0 : index
    %140 = vector.load %arg7[%c0_187, %c0_188] : memref<1x8xf32, #tpu.memory_space<vmem>>, vector<1x8xf32>
    %141 = vector.broadcast %140 : vector<1x8xf32> to vector<128x8xf32>
    %142 = arith.mulf %139, %141 : vector<128x8xf32>
    %c0_189 = arith.constant 0 : index
    %c0_190 = arith.constant 0 : index
    %143 = vector.load %arg8[%c0_189, %c0_190] : memref<1x8xf32, #tpu.memory_space<vmem>>, vector<1x8xf32>
    %144 = vector.broadcast %143 : vector<1x8xf32> to vector<128x8xf32>
    %145 = arith.addf %142, %144 : vector<128x8xf32>
    %146 = arith.addf %145, %43 : vector<128x8xf32>
    %c0_191 = arith.constant 0 : index
    %c0_192 = arith.constant 0 : index
    %147 = memref.load %arg10[%c0_191, %c0_192] : memref<1x1xf32, #tpu.memory_space<smem>>
    %cst_193 = arith.constant 0.000000e+00 : f32
    %148 = vector.broadcast %cst_193 : f32 to vector<128x8xf32>
    %149 = arith.cmpf ogt, %146, %148 : vector<128x8xf32>
    %150 = vector.broadcast %147 : f32 to vector<128x8xf32>
    %151 = arith.mulf %150, %146 : vector<128x8xf32>
    %152 = arith.select %149, %146, %151 : vector<128x8xi1>, vector<128x8xf32>
    %153 = vector.shape_cast %152 : vector<128x8xf32> to vector<2x8x8x8xf32>
    %c0_194 = arith.constant 0 : index
    %c0_195 = arith.constant 0 : index
    %c0_196 = arith.constant 0 : index
    %c0_197 = arith.constant 0 : index
    %154 = vector.load %arg11[%c0_194, %c0_195, %c0_196, %c0_197] : memref<2x8x8x8xf32, #tpu.memory_space<vmem>>, vector<2x8x8x8xf32>
    tpu.vector_store %arg11[%c0_194, %c0_195, %c0_196, %c0_197], %153 {strides = array<i32>} : memref<2x8x8x8xf32, #tpu.memory_space<vmem>>, vector<2x8x8x8xf32>,
    return
  }
}

</mosaic_0001>

<bundles_post_ra>
// kernel: downblock_forward.1
= control target key start
LH: loop header
LB: loop body
LE: loop exit
PB: predicated region body
PF: predicated region fallthrough
CT: control target
= control target key end

     0   :  { %vm41_vm0 = vcmask 31744   ;;  %v7757_v2 = vmov 0.0   ;;  %s5015_s21 = smov 124   ;;  %s5016_s28 = smov 4   ;;  %vm7780_vm1 = vcmask 64512   ;;  %vm1433_vm2 = vcmask 1041408   ;;  %s7745_s0 = inlined_call_operand.vmem [shape: f32[2,16,8,8], index: 0, kind: input, shape index: {}]   ;;  %s7746_s1 = inlined_call_operand.vmem [shape: bf16[36,8], index: 1, kind: input, shape index: {}]   ;;  %s7747_s2 = inlined_call_operand.vmem [shape: f32[1,8], index: 2, kind: input, shape index: {}]   ;;  %s7748_s3 = inlined_call_operand.vmem [shape: bf16[72,8], index: 3, kind: input, shape index: {}]   ;;  %s7749_s5 = inlined_call_operand.vmem [shape: f32[1,8], index: 5, kind: input, shape index: {}]   ;;  %s7750_s9 = inlined_call_operand.<no memory space> [shape: f32[1,1], index: 9, kind: input, shape index: {}]   ;;  %s7751_s6 = inlined_call_operand.vmem [shape: f32[1,8], index: 6, kind: input, shape index: {}]   ;;  %s7752_s4 = inlined_call_operand.vmem [shape: bf16[72,8], index: 4, kind: input, shape index: {}]   ;;  %s7753_s10 = inlined_call_operand.<no memory space> [shape: f32[1,1], index: 10, kind: input, shape index: {}]   ;;  %s7754_s7 = inlined_call_operand.vmem [shape: f32[1,8], index: 7, kind: input, shape index: {}]   ;;  %s7755_s8 = inlined_call_operand.vmem [shape: f32[1,8], index: 8, kind: input, shape index: {}]   ;;  %s7756_s11 = inlined_call_operand.vmem [shape: f32[2,8,8,8], index: 11, kind: output, shape index: {}]  }
   0x1   :  { %v5094_v0 = vld [vmem:[%s7745_s0 + $0x10] sm:$0xff]  ;;  %v5099_v1 = vld [vmem:[%s7745_s0] sm:$0xff]  ;;  %82 = vst.msk [vmem:[#allocation2 + $0x8] sm:$0xff] %vm41_vm0, %v7757_v2  ;;  %42 = vst.msk [vmem:[#allocation2] sm:$0xff] %vm41_vm0, %v7757_v2  ;;  %s5017_s29 = smov 8   ;;  %s5020_s30 = smov 20  }
   0x2   :  { %43 = vst.msk [vmem:[#allocation2 + $0x18] sm:$0xff] %vm41_vm0, %v7757_v2  ;;  %44 = vst.msk [vmem:[#allocation2 + $0x30] sm:$0xff] %vm41_vm0, %v7757_v2  ;;  %201 = vrot.lane.b32.xlu1 %v5094_v0, %s5015_s21  ;;  %197 = vrot.lane.b32.xlu0 %v5099_v1, %s5015_s21  ;;  %v5196_v3 = vld [vmem:[%s7745_s0 + $0x18] sm:$0xff]  ;;  %v5201_v4 = vld [vmem:[%s7745_s0 + $0x8] sm:$0xff]  ;;  %s5021_s12 = smov 24   ;;  %s5022_s13 = smov 28  }
   0x3   :  { %45 = vst.msk [vmem:[#allocation2 + $0x48] sm:$0xff] %vm41_vm0, %v7757_v2  ;;  %46 = vst.msk [vmem:[#allocation2 + $0x60] sm:$0xff] %vm41_vm0, %v7757_v2  ;;  %v5210_v5 = vld [vmem:[%s7745_s0 + $0x28] sm:$0xff]  ;;  %v5215_v6 = vld [vmem:[%s7745_s0 + $0x20] sm:$0xff]  ;;  %s5023_s18 = smov 32   ;;  %vm1143_vm3 = vcmask 97280  }
   0x4   :  { %47 = vst.msk [vmem:[#allocation2 + $0x78] sm:$0xff] %vm41_vm0, %v7757_v2  ;;  %48 = vst.msk [vmem:[#allocation2 + $0x90] sm:$0xff] %vm41_vm0, %v7757_v2  ;;  %v5224_v7 = vld [vmem:[%s7745_s0 + $0x38] sm:$0xff]  ;;  %v5229_v8 = vld [vmem:[%s7745_s0 + $0x30] sm:$0xff]  ;;  %vm1176_vm4 = vcmask 130048   ;;  %vm1209_vm5 = vcmask 162816  }
   0x5   :  { %49 = vst.msk [vmem:[#allocation2 + $0xa8] sm:$0xff] %vm41_vm0, %v7757_v2  ;;  %50 = vst.msk [vmem:[#allocation2 + $0xc0] sm:$0xff] %vm41_vm0, %v7757_v2  ;;  %v5238_v9 = vld [vmem:[%s7745_s0 + $0x48] sm:$0xff]  ;;  %v5243_v10 = vld [vmem:[%s7745_s0 + $0x40] sm:$0xff]  ;;  %vm1242_vm6 = vcmask 195584   ;;  %vm1275_vm7 = vcmask 228352  }
   0x6   :  { %51 = vst.msk [vmem:[#allocation2 + $0xd8] sm:$0xff] %vm41_vm0, %v7757_v2  ;;  %52 = vst.msk [vmem:[#allocation2 + $0xf0] sm:$0xff] %vm41_vm0, %v7757_v2  ;;  %203 = vrot.lane.b32.xlu1 %v5196_v3, %s5015_s21  ;;  %199 = vrot.lane.b32.xlu0 %v5201_v4, %s5015_s21  ;;  %v5252_v11 = vld [vmem:[%s7745_s0 + $0x58] sm:$0xff]  ;;  %v5257_v12 = vld [vmem:[%s7745_s0 + $0x50] sm:$0xff]  ;;  %vm1308_vm8 = vcmask 261120   ;;  %vm1408_vm9 = vcmask 293888  }
   0x7   :  { %53 = vst.msk [vmem:[#allocation2 + $0x108] sm:$0xff] %vm41_vm0, %v7757_v2  ;;  %54 = vst.msk [vmem:[#allocation2 + $0x120] sm:$0xff] %vm41_vm0, %v7757_v2  ;;  %v5266_v13 = vld [vmem:[%s7745_s0 + $0x68] sm:$0xff]  ;;  %v5271_v14 = vld [vmem:[%s7745_s0 + $0x60] sm:$0xff]  ;;  %s5025_s22 = smov 56   ;;  %s5026_s23 = smov 64  }
   0x8   :  { %55 = vst.msk [vmem:[#allocation2 + $0x138] sm:$0xff] %vm41_vm0, %v7757_v2  ;;  %56 = vst.msk [vmem:[#allocation2 + $0x150] sm:$0xff] %vm41_vm0, %v7757_v2  ;;  %v5280_v15 = vld [vmem:[%s7745_s0 + $0x78] sm:$0xff]  ;;  %v5285_v16 = vld [vmem:[%s7745_s0 + $0x70] sm:$0xff]  ;;  %vm2601_vm10 = vcmask 1043456   ;;  %vm2368_vm11 = vcmask 326656  }
   0x9   :  { %57 = vst.msk [vmem:[#allocation2 + $0x168] sm:$0xff] %vm41_vm0, %v7757_v2  ;;  %58 = vst.msk [vmem:[#allocation2 + $0x180] sm:$0xff] %vm41_vm0, %v7757_v2  ;;  %v5294_v17 = vld [vmem:[%s7745_s0 + $0x80] sm:$0xff]  ;;  %v5299_v18 = vld [vmem:[%s7745_s0 + $0x88] sm:$0xff]  ;;  %vm2401_vm12 = vcmask 392192   ;;  %vm2434_vm13 = vcmask 457728  }
   0xa   :  { %59 = vst.msk [vmem:[#allocation2 + $0x198] sm:$0xff] %vm41_vm0, %v7757_v2  ;;  %60 = vst.msk [vmem:[#allocation2 + $0x1b0] sm:$0xff] %vm41_vm0, %v7757_v2  ;;  %207 = vrot.lane.b32.xlu1 %v5210_v5, %s5015_s21  ;;  %205 = vrot.lane.b32.xlu0 %v5215_v6, %s5015_s21  ;;  %v5308_v19 = vld [vmem:[%s7745_s0 + $0x90] sm:$0xff]  ;;  %v5313_v20 = vld [vmem:[%s7745_s0 + $0x98] sm:$0xff]  ;;  %vm2467_vm14 = vcmask 523264   ;;  %vm7766_vm15 = vcmask 588800  }
   0xb   :  { %61 = vst.msk [vmem:[#allocation2 + $0x1c8] sm:$0xff] %vm41_vm0, %v7757_v2  ;;  %62 = vst.msk [vmem:[#allocation2 + $0x10] sm:$0xff] %vm41_vm0, %v7757_v2  ;;  %v5322_v21 = vld [vmem:[%s7745_s0 + $0xa0] sm:$0xff]  ;;  %v5327_v22 = vld [vmem:[%s7745_s0 + $0xa8] sm:$0xff] }
   0xc   :  { %63 = vst.msk [vmem:[#allocation2 + $0x28] sm:$0xff] %vm41_vm0, %v7757_v2  ;;  %64 = vst.msk [vmem:[#allocation2 + $0x40] sm:$0xff] %vm41_vm0, %v7757_v2  ;;  %v5336_v23 = vld [vmem:[%s7745_s0 + $0xb0] sm:$0xff]  ;;  %v5341_v24 = vld [vmem:[%s7745_s0 + $0xb8] sm:$0xff] }
   0xd   :  { %65 = vst.msk [vmem:[#allocation2 + $0x58] sm:$0xff] %vm41_vm0, %v7757_v2  ;;  %66 = vst.msk [vmem:[#allocation2 + $0x70] sm:$0xff] %vm41_vm0, %v7757_v2  ;;  %v5350_v25 = vld [vmem:[%s7745_s0 + $0xc0] sm:$0xff]  ;;  %v5355_v26 = vld [vmem:[%s7745_s0 + $0xc8] sm:$0xff] }
   0xe   :  { %67 = vst.msk [vmem:[#allocation2 + $0x88] sm:$0xff] %vm41_vm0, %v7757_v2  ;;  %68 = vst.msk [vmem:[#allocation2 + $0xa0] sm:$0xff] %vm41_vm0, %v7757_v2  ;;  %211 = vrot.lane.b32.xlu1 %v5224_v7, %s5015_s21  ;;  %209 = vrot.lane.b32.xlu0 %v5229_v8, %s5015_s21  ;;  %v5364_v27 = vld [vmem:[%s7745_s0 + $0xd0] sm:$0xff]  ;;  %v5369_v28 = vld [vmem:[%s7745_s0 + $0xd8] sm:$0xff] }
   0xf   :  { %69 = vst.msk [vmem:[#allocation2 + $0xb8] sm:$0xff] %vm41_vm0, %v7757_v2  ;;  %70 = vst.msk [vmem:[#allocation2 + $0xd0] sm:$0xff] %vm41_vm0, %v7757_v2  ;;  %v5378_v29 = vld [vmem:[%s7745_s0 + $0xe0] sm:$0xff]  ;;  %v5383_v30 = vld [vmem:[%s7745_s0 + $0xe8] sm:$0xff] }
  0x10   :  { %71 = vst.msk [vmem:[#allocation2 + $0xe8] sm:$0xff] %vm41_vm0, %v7757_v2  ;;  %72 = vst.msk [vmem:[#allocation2 + $0x100] sm:$0xff] %vm41_vm0, %v7757_v2  ;;  %v5392_v31 = vld [vmem:[%s7745_s0 + $0xf0] sm:$0xff]  ;;  %v422_v32 = vld [vmem:[#allocation2 + $0x8] sm:$0xff] }
  0x11   :  { %73 = vst.msk [vmem:[#allocation2 + $0x118] sm:$0xff] %vm41_vm0, %v7757_v2  ;;  %74 = vst.msk [vmem:[#allocation2 + $0x130] sm:$0xff] %vm41_vm0, %v7757_v2  ;;  %v5397_v33 = vld [vmem:[%s7745_s0 + $0xf8] sm:$0xff]  ;;  %v438_v34 = vpack.c.bf16 %v422_v32, %v422_v32  ;;  %s5018_s0 = smov 12  }
  0x12   :  { %75 = vst.msk [vmem:[#allocation2 + $0x148] sm:$0xff] %vm41_vm0, %v7757_v2  ;;  %76 = vst.msk [vmem:[#allocation2 + $0x160] sm:$0xff] %vm41_vm0, %v7757_v2  ;;  %215 = vrot.lane.b32.xlu1 %v5238_v9, %s5015_s21  ;;  %213 = vrot.lane.b32.xlu0 %v5243_v10, %s5015_s21  ;;  %v454_v35 = vld [vmem:[#allocation2 + $0x9] sm:$0xff] }
  0x13   :  { %77 = vst.msk [vmem:[#allocation2 + $0x178] sm:$0xff] %vm41_vm0, %v7757_v2  ;;  %78 = vst.msk [vmem:[#allocation2 + $0x190] sm:$0xff] %vm41_vm0, %v7757_v2  ;;  %v470_v36 = vpack.c.bf16 %v454_v35, %v454_v35 }
  0x14   :  { %79 = vst.msk [vmem:[#allocation2 + $0x1a8] sm:$0xff] %vm41_vm0, %v7757_v2  ;;  %80 = vst.msk [vmem:[#allocation2 + $0x1c0] sm:$0xff] %vm41_vm0, %v7757_v2 }
  0x15   :  { %81 = vst.msk [vmem:[#allocation2 + $0x1d8] sm:$0xff] %vm41_vm0, %v7757_v2  ;;  %83 = vst.msk [vmem:[#allocation2 + $0xf8] sm:$0xff] %vm41_vm0, %v7757_v2 }
  0x16   :  { %85 = vst.msk [vmem:[#allocation2 + $0xe0] sm:$0xff] %vm41_vm0, %v7757_v2  ;;  %86 = vst.msk [vmem:[#allocation2 + $0x1d0] sm:$0xff] %vm41_vm0, %v7757_v2  ;;  %219 = vrot.lane.b32.xlu1 %v5252_v11, %s5015_s21  ;;  %217 = vrot.lane.b32.xlu0 %v5257_v12, %s5015_s21 }
  0x17   :  { %88 = vst.msk [vmem:[#allocation3] sm:$0xff] %vm7780_vm1, %v7757_v2  ;;  %89 = vst.msk [vmem:[#allocation3 + $0x18] sm:$0xff] %vm7780_vm1, %v7757_v2 }
  0x18   :  { %90 = vst.msk [vmem:[#allocation3 + $0x30] sm:$0xff] %vm7780_vm1, %v7757_v2  ;;  %91 = vst.msk [vmem:[#allocation3 + $0x48] sm:$0xff] %vm7780_vm1, %v7757_v2 }
  0x19   :  { %92 = vst.msk [vmem:[#allocation3 + $0x60] sm:$0xff] %vm7780_vm1, %v7757_v2  ;;  %93 = vst.msk [vmem:[#allocation3 + $0x78] sm:$0xff] %vm7780_vm1, %v7757_v2 }
  0x1a   :  { %223 = vrot.lane.b32.xlu1 %v5266_v13, %s5015_s21  ;;  %221 = vrot.lane.b32.xlu0 %v5271_v14, %s5015_s21  ;;  %94 = vst.msk [vmem:[#allocation3 + $0x90] sm:$0xff] %vm7780_vm1, %v7757_v2  ;;  %95 = vst.msk [vmem:[#allocation3 + $0xa8] sm:$0xff] %vm7780_vm1, %v7757_v2 }
  0x1b   :  { %96 = vst.msk [vmem:[#allocation3 + $0xc0] sm:$0xff] %vm7780_vm1, %v7757_v2  ;;  %97 = vst.msk [vmem:[#allocation3 + $0xd8] sm:$0xff] %vm7780_vm1, %v7757_v2 }
  0x1c   :  { %98 = vst.msk [vmem:[#allocation3 + $0xf0] sm:$0xff] %vm7780_vm1, %v7757_v2  ;;  %99 = vst.msk [vmem:[#allocation3 + $0x108] sm:$0xff] %vm7780_vm1, %v7757_v2 }
  0x1d   :  { %100 = vst.msk [vmem:[#allocation3 + $0x120] sm:$0xff] %vm7780_vm1, %v7757_v2  ;;  %101 = vst.msk [vmem:[#allocation3 + $0x138] sm:$0xff] %vm7780_vm1, %v7757_v2 }
  0x1e   :  { %227 = vrot.lane.b32.xlu1 %v5280_v15, %s5015_s21  ;;  %225 = vrot.lane.b32.xlu0 %v5285_v16, %s5015_s21  ;;  %102 = vst.msk [vmem:[#allocation3 + $0x150] sm:$0xff] %vm7780_vm1, %v7757_v2  ;;  %103 = vst.msk [vmem:[#allocation3 + $0x168] sm:$0xff] %vm7780_vm1, %v7757_v2 }
  0x1f   :  { %104 = vst.msk [vmem:[#allocation3 + $0x180] sm:$0xff] %vm7780_vm1, %v7757_v2  ;;  %105 = vst.msk [vmem:[#allocation3 + $0x198] sm:$0xff] %vm7780_vm1, %v7757_v2 }
  0x20   :  { %106 = vst.msk [vmem:[#allocation3 + $0x1b0] sm:$0xff] %vm7780_vm1, %v7757_v2  ;;  %107 = vst.msk [vmem:[#allocation3 + $0x1c8] sm:$0xff] %vm7780_vm1, %v7757_v2 }
  0x21   :  { %108 = vst.msk [vmem:[#allocation3 + $0x10] sm:$0xff] %vm7780_vm1, %v7757_v2  ;;  %109 = vst.msk [vmem:[#allocation3 + $0x28] sm:$0xff] %vm7780_vm1, %v7757_v2 }
  0x22   :  { %229 = vrot.lane.b32.xlu0 %v5294_v17, %s5015_s21  ;;  %231 = vrot.lane.b32.xlu1 %v5299_v18, %s5015_s21  ;;  %110 = vst.msk [vmem:[#allocation3 + $0x40] sm:$0xff] %vm7780_vm1, %v7757_v2  ;;  %111 = vst.msk [vmem:[#allocation3 + $0x58] sm:$0xff] %vm7780_vm1, %v7757_v2 }
  0x23   :  { %112 = vst.msk [vmem:[#allocation3 + $0x70] sm:$0xff] %vm7780_vm1, %v7757_v2  ;;  %113 = vst.msk [vmem:[#allocation3 + $0x88] sm:$0xff] %vm7780_vm1, %v7757_v2 }
  0x24   :  { %114 = vst.msk [vmem:[#allocation3 + $0xa0] sm:$0xff] %vm7780_vm1, %v7757_v2  ;;  %115 = vst.msk [vmem:[#allocation3 + $0xb8] sm:$0xff] %vm7780_vm1, %v7757_v2 }
  0x25   :  { %116 = vst.msk [vmem:[#allocation3 + $0xd0] sm:$0xff] %vm7780_vm1, %v7757_v2  ;;  %117 = vst.msk [vmem:[#allocation3 + $0xe8] sm:$0xff] %vm7780_vm1, %v7757_v2 }
  0x26   :  { %233 = vrot.lane.b32.xlu0 %v5308_v19, %s5015_s21  ;;  %235 = vrot.lane.b32.xlu1 %v5313_v20, %s5015_s21  ;;  %118 = vst.msk [vmem:[#allocation3 + $0x100] sm:$0xff] %vm7780_vm1, %v7757_v2  ;;  %119 = vst.msk [vmem:[#allocation3 + $0x118] sm:$0xff] %vm7780_vm1, %v7757_v2 }
  0x27   :  { %120 = vst.msk [vmem:[#allocation3 + $0x130] sm:$0xff] %vm7780_vm1, %v7757_v2  ;;  %121 = vst.msk [vmem:[#allocation3 + $0x148] sm:$0xff] %vm7780_vm1, %v7757_v2 }
  0x28   :  { %122 = vst.msk [vmem:[#allocation3 + $0x160] sm:$0xff] %vm7780_vm1, %v7757_v2  ;;  %123 = vst.msk [vmem:[#allocation3 + $0x178] sm:$0xff] %vm7780_vm1, %v7757_v2 }
  0x29   :  { %124 = vst.msk [vmem:[#allocation3 + $0x190] sm:$0xff] %vm7780_vm1, %v7757_v2  ;;  %125 = vst.msk [vmem:[#allocation3 + $0x1a8] sm:$0xff] %vm7780_vm1, %v7757_v2 }
  0x2a   :  { %237 = vrot.lane.b32.xlu0 %v5322_v21, %s5015_s21  ;;  %239 = vrot.lane.b32.xlu1 %v5327_v22, %s5015_s21  ;;  %126 = vst.msk [vmem:[#allocation3 + $0x1c0] sm:$0xff] %vm7780_vm1, %v7757_v2  ;;  %127 = vst.msk [vmem:[#allocation3 + $0x1d8] sm:$0xff] %vm7780_vm1, %v7757_v2 }
  0x2b   :  { %128 = vst.msk [vmem:[#allocation3 + $0x8] sm:$0xff] %vm7780_vm1, %v7757_v2  ;;  %129 = vst.msk [vmem:[#allocation3 + $0xf8] sm:$0xff] %vm7780_vm1, %v7757_v2 }
  0x2c   :  { %131 = vst.msk [vmem:[#allocation3 + $0xe0] sm:$0xff] %vm7780_vm1, %v7757_v2  ;;  %132 = vst.msk [vmem:[#allocation3 + $0x1d0] sm:$0xff] %vm7780_vm1, %v7757_v2 }
  0x2e   :  { %241 = vrot.lane.b32.xlu0 %v5336_v23, %s5015_s21  ;;  %243 = vrot.lane.b32.xlu1 %v5341_v24, %s5015_s21 }
  0x32   :  { %245 = vrot.lane.b32.xlu0 %v5350_v25, %s5015_s21  ;;  %247 = vrot.lane.b32.xlu1 %v5355_v26, %s5015_s21 }
  0x36   :  { %249 = vrot.lane.b32.xlu0 %v5364_v27, %s5015_s21  ;;  %251 = vrot.lane.b32.xlu1 %v5369_v28, %s5015_s21 }
  0x3a   :  { %253 = vrot.lane.b32.xlu0 %v5378_v29, %s5015_s21  ;;  %255 = vrot.lane.b32.xlu1 %v5383_v30, %s5015_s21 }
  0x3e   :  { %257 = vrot.lane.b32.xlu0 %v5392_v31, %s5015_s21  ;;  %259 = vrot.lane.b32.xlu1 %v5397_v33, %s5015_s21  ;;  %s5019_s21 = smov 16  }
  0x42   :  { %695 = vrot.lane.b32.xlu0 %v438_v34, %s5016_s28 }
  0x46   :  { %743 = vrot.lane.b32.xlu0 %v470_v36, %s5017_s29 }
  0x74   :  { %v202_v37 = vpop.permute.xlu1 %201  ;;  %v198_v38 = vpop.permute.xlu0 %197 }
  0x75   :  { %v295_v39 = vmax.f32 %v5094_v0, %v202_v37  ;;  %v293_v40 = vmax.f32 %v5099_v1, %v198_v38 }
  0x77   :  { %v328_v45 = vsel %vm41_vm0, %v295_v39, -inf  ;;  %v325_v46 = vsel %vm41_vm0, %v293_v40, -inf }
  0x78   :  { %v204_v41 = vpop.permute.xlu1 %203  ;;  %v200_v42 = vpop.permute.xlu0 %199 }
  0x79   :  { %v296_v43 = vmax.f32 %v5196_v3, %v204_v41  ;;  %v294_v44 = vmax.f32 %v5201_v4, %v200_v42 }
  0x7b   :  { %v329_v47 = vsel %vm41_vm0, %v296_v43, -inf  ;;  %v326_v48 = vsel %vm41_vm0, %v294_v44, -inf }
  0x7c   :  { %v330_v49 = vmax.f32 %v328_v45, %v329_v47  ;;  %v327_v50 = vmax.f32 %v325_v46, %v326_v48  ;;  %v208_v51 = vpop.permute.xlu1 %207  ;;  %v206_v52 = vpop.permute.xlu0 %205 }
  0x7d   :  { %v298_v53 = vmax.f32 %v5210_v5, %v208_v51  ;;  %v297_v54 = vmax.f32 %v5215_v6, %v206_v52 }
  0x7e   :  { %375 = vst.msk [vmem:[#allocation2 + $0x38] sm:$0xff] %vm41_vm0, %v330_v49  ;;  %374 = vst.msk [vmem:[#allocation2 + $0x20] sm:$0xff] %vm41_vm0, %v327_v50 }
  0x7f   :  { %v332_v55 = vsel %vm41_vm0, %v298_v53, -inf  ;;  %v331_v56 = vsel %vm41_vm0, %v297_v54, -inf }
  0x80   :  { %v333_v57 = vmax.f32 %v331_v56, %v332_v55  ;;  %v212_v58 = vpop.permute.xlu1 %211  ;;  %v210_v59 = vpop.permute.xlu0 %209 }
  0x81   :  { %v300_v60 = vmax.f32 %v5224_v7, %v212_v58  ;;  %v299_v61 = vmax.f32 %v5229_v8, %v210_v59 }
  0x82   :  { %376 = vst.msk [vmem:[#allocation2 + $0x50] sm:$0xff] %vm41_vm0, %v333_v57 }
  0x83   :  { %v335_v62 = vsel %vm41_vm0, %v300_v60, -inf  ;;  %v334_v63 = vsel %vm41_vm0, %v299_v61, -inf }
  0x84   :  { %v336_v0 = vmax.f32 %v334_v63, %v335_v62  ;;  %v216_v1 = vpop.permute.xlu1 %215  ;;  %v214_v3 = vpop.permute.xlu0 %213 }
  0x85   :  { %v424_v4 = vld [vmem:[#allocation2 + $0x38] sm:$0xff]  ;;  %v423_v5 = vld [vmem:[#allocation2 + $0x20] sm:$0xff]  ;;  %v302_v6 = vmax.f32 %v5238_v9, %v216_v1  ;;  %v301_v32 = vmax.f32 %v5243_v10, %v214_v3 }
  0x86   :  { %v5514_v34 = vpack.c.bf16 %v424_v4, %v424_v4  ;;  %v439_v7 = vpack.c.bf16 %v423_v5, %v423_v5  ;;  %377 = vst.msk [vmem:[#allocation2 + $0x68] sm:$0xff] %vm41_vm0, %v336_v0  ;;  %v456_v8 = vld [vmem:[#allocation2 + $0x39] sm:$0xff]  ;;  %v455_v44 = vld [vmem:[#allocation2 + $0x21] sm:$0xff] }
  0x87   :  { %v338_v35 = vsel %vm41_vm0, %v302_v6, -inf  ;;  %v337_v36 = vsel %vm41_vm0, %v301_v32, -inf  ;;  %v5524_v41 = vpack.c.bf16 %v456_v8, %v456_v8  ;;  %v486_v43 = vld [vmem:[#allocation2 + $0x1f] sm:$0xff]  ;;  %v471_v51 = vpack.c.bf16 %v455_v44, %v455_v44  ;;  %v487_v61 = vld [vmem:[#allocation2 + $0x37] sm:$0xff] }
  0x88   :  { %699 = vrot.lane.b32.xlu0 %v5514_v34, %s5016_s28  ;;  %697 = vrot.lane.b32.xlu1 %v439_v7, %s5016_s28  ;;  %v220_v37 = vpop.permute.xlu1 %219  ;;  %v218_v38 = vpop.permute.xlu0 %217  ;;  %v339_v39 = vmax.f32 %v337_v36, %v338_v35  ;;  %v5537_v50 = vpack.c.bf16 %v486_v43, %v486_v43  ;;  %v5560_v5 = vpack.c.bf16 %v487_v61, %v487_v61 }
  0x89   :  { %v425_v9 = vld [vmem:[#allocation2 + $0x50] sm:$0xff]  ;;  %v304_v10 = vmax.f32 %v5252_v11, %v220_v37  ;;  %v303_v40 = vmax.f32 %v5257_v12, %v218_v38 }
  0x8a   :  { %v5526_v42 = vpack.c.bf16 %v425_v9, %v425_v9  ;;  %378 = vst.msk [vmem:[#allocation2 + $0x80] sm:$0xff] %vm41_vm0, %v339_v39  ;;  %v488_v52 = vld [vmem:[#allocation2 + $0x4f] sm:$0xff] }
  0x8b   :  { %v341_v45 = vsel %vm41_vm0, %v304_v10, -inf  ;;  %v340_v46 = vsel %vm41_vm0, %v303_v40, -inf  ;;  %v457_v53 = vld [vmem:[#allocation2 + $0x51] sm:$0xff]  ;;  %v5547_v59 = vpack.c.bf16 %v488_v52, %v488_v52 }
  0x8c   :  { %747 = vrot.lane.b32.xlu0 %v5524_v41, %s5017_s29  ;;  %701 = vrot.lane.b32.xlu1 %v5526_v42, %s5016_s28  ;;  %v342_v11 = vmax.f32 %v340_v46, %v341_v45  ;;  %v224_v12 = vpop.permute.xlu1 %223  ;;  %v222_v47 = vpop.permute.xlu0 %221  ;;  %v5549_v60 = vpack.c.bf16 %v457_v53, %v457_v53 }
  0x8d   :  { %v306_v48 = vmax.f32 %v5266_v13, %v224_v12  ;;  %v305_v49 = vmax.f32 %v5271_v14, %v222_v47  ;;  %v553_v53 = vld [vmem:[#allocation2 + $0x69] sm:$0xff] }
  0x8e   :  { %379 = vst.msk [vmem:[#allocation2 + $0x98] sm:$0xff] %vm41_vm0, %v342_v11 }
  0x8f   :  { %v344_v54 = vsel %vm41_vm0, %v306_v48, -inf  ;;  %v343_v55 = vsel %vm41_vm0, %v305_v49, -inf }
  0x90   :  { %791 = vrot.lane.b32.xlu0 %v5537_v50, %s5018_s0  ;;  %745 = vrot.lane.b32.xlu1 %v471_v51, %s5017_s29  ;;  %v345_v13 = vmax.f32 %v343_v55, %v344_v54  ;;  %v228_v56 = vpop.permute.xlu1 %227  ;;  %v226_v14 = vpop.permute.xlu0 %225 }
  0x91   :  { %v308_v57 = vmax.f32 %v5280_v15, %v228_v56  ;;  %v307_v58 = vmax.f32 %v5285_v16, %v226_v14  ;;  %v489_v16 = vld [vmem:[#allocation2 + $0x67] sm:$0xff] }
  0x92   :  { %380 = vst.msk [vmem:[#allocation2 + $0xb0] sm:$0xff] %vm41_vm0, %v345_v13  ;;  %v5568_v8 = vpack.c.bf16 %v489_v16, %v489_v16 }
  0x93   :  { %v347_v62 = vsel %vm41_vm0, %v308_v57, -inf  ;;  %v346_v63 = vsel %vm41_vm0, %v307_v58, -inf  ;;  %v569_v57 = vpack.c.bf16 %v553_v53, %v553_v53  ;;  %v622_v53 = vld [vmem:[#allocation2 + $0xe0] sm:$0xff] }
  0x94   :  { %795 = vrot.lane.b32.xlu0 %v5547_v59, %s5018_s0  ;;  %749 = vrot.lane.b32.xlu1 %v5549_v60, %s5017_s29  ;;  %v230_v15 = vpop.permute.xlu0 %229  ;;  %v232_v0 = vpop.permute.xlu1 %231  ;;  %v348_v1 = vmax.f32 %v346_v63, %v347_v62 }
  0x95   :  { %v309_v3 = vmax.f32 %v5294_v17, %v230_v15  ;;  %v310_v4 = vmax.f32 %v5299_v18, %v232_v0  ;;  %v586_v0 = vld [vmem:[#allocation2 + $0x7f] sm:$0xff] }
  0x96   :  { %381 = vst.msk [vmem:[#allocation2 + $0xc8] sm:$0xff] %vm41_vm0, %v348_v1 }
  0x97   :  { %v349_v6 = vsel %vm41_vm0, %v309_v3, -inf  ;;  %v350_v32 = vsel %vm41_vm0, %v310_v4, -inf  ;;  %v5624_v3 = vpack.c.bf16 %v586_v0, %v586_v0 }
  0x98   :  { %839 = vrot.lane.b32.xlu0 %v439_v7, %s5019_s21  ;;  %793 = vrot.lane.b32.xlu1 %v5560_v5, %s5018_s0  ;;  %v234_v35 = vpop.permute.xlu0 %233  ;;  %v351_v17 = vmax.f32 %v349_v6, %v350_v32  ;;  %v236_v36 = vpop.permute.xlu1 %235 }
  0x99   :  { %v311_v18 = vmax.f32 %v5308_v19, %v234_v35  ;;  %v312_v37 = vmax.f32 %v5313_v20, %v236_v36  ;;  %v521_v20 = vld [vmem:[#allocation2 + $0x68] sm:$0xff]  ;;  %v4997_v35 = vld [vmem:[%s7746_s1] sm:$0xff]  }
  0x9a   :  { %382 = vst.msk [vmem:[#allocation2 + $0x110] sm:$0xff] %vm41_vm0, %v351_v17  ;;  %v5589_v12 = vpack.c.bf16 %v521_v20, %v521_v20  ;;  %4667 = vmatprep.subr.bf16.mxu0 %v4997_v35  ;;  %v618_v36 = vld [vmem:[#allocation2 + $0x80] sm:$0xff]  ;;  %v461_v20 = vld [vmem:[#allocation2 + $0xb1] sm:$0xff] }
  0x9b   :  { %v352_v38 = vsel %vm41_vm0, %v311_v18, -inf  ;;  %v353_v9 = vsel %vm41_vm0, %v312_v37, -inf  ;;  %4668 = vmatpush3.bf16.msra.mxu0 %v4997_v35  ;;  %v4999_v18 = vld [vmem:[%s7746_s1 + $0x10] ss:$0 sps:$4 sm:$0x33]   ;;  %v634_v37 = vpack.c.bf16 %v618_v36, %v618_v36 }
  0x9c   :  { %843 = vrot.lane.b32.xlu0 %v5526_v42, %s5019_s21  ;;  %797 = vrot.lane.b32.xlu1 %v5568_v8, %s5018_s0  ;;  %v238_v7 = vpop.permute.xlu0 %237  ;;  %v354_v39 = vmax.f32 %v352_v38, %v353_v9  ;;  %v240_v10 = vpop.permute.xlu1 %239  ;;  %v1435_v38 = vsel %vm1433_vm2, %v4999_v18, 0  ;;  %v428_v9 = vld [vmem:[#allocation2 + $0x98] sm:$0xff] }
  0x9d   :  { %v313_v40 = vmax.f32 %v5322_v21, %v238_v7  ;;  %v314_v19 = vmax.f32 %v5327_v22, %v240_v10  ;;  %v429_v7 = vld [vmem:[#allocation2 + $0xb0] sm:$0xff]  ;;  %v460_v10 = vld [vmem:[#allocation2 + $0x99] sm:$0xff] }
  0x9e   :  { %383 = vst.msk [vmem:[#allocation2 + $0x128] sm:$0xff] %vm41_vm0, %v354_v39 }
  0x9f   :  { %v355_v43 = vsel %vm41_vm0, %v313_v40, -inf  ;;  %v356_v44 = vsel %vm41_vm0, %v314_v19, -inf  ;;  %v445_v40 = vpack.c.bf16 %v429_v7, %v429_v7  ;;  %v476_v19 = vpack.c.bf16 %v460_v10, %v460_v10 }
  0xa0   :  { %887 = vrot.lane.b32.xlu0 %v471_v51, %s5020_s30  ;;  %841 = vrot.lane.b32.xlu1 %v5514_v34, %s5019_s21  ;;  %v242_v45 = vpop.permute.xlu0 %241  ;;  %v357_v46 = vmax.f32 %v355_v43, %v356_v44  ;;  %v244_v11 = vpop.permute.xlu1 %243  ;;  %v477_v44 = vpack.c.bf16 %v461_v20, %v461_v20 }
  0xa1   :  { %v315_v21 = vmax.f32 %v5336_v23, %v242_v45  ;;  %v316_v22 = vmax.f32 %v5341_v24, %v244_v11  ;;  %v491_v45 = vld [vmem:[#allocation2 + $0x97] sm:$0xff] }
  0xa2   :  { %384 = vst.msk [vmem:[#allocation2 + $0x140] sm:$0xff] %vm41_vm0, %v357_v46  ;;  %v493_v46 = vld [vmem:[#allocation2 + $0xc7] sm:$0xff]  ;;  %v5669_v11 = vpack.c.bf16 %v491_v45, %v491_v45 }
  0xa3   :  { %v358_v47 = vsel %vm41_vm0, %v315_v21, -inf  ;;  %v359_v48 = vsel %vm41_vm0, %v316_v22, -inf  ;;  %v509_v21 = vpack.c.bf16 %v493_v46, %v493_v46  ;;  %v525_v22 = vld [vmem:[#allocation2 + $0xc8] sm:$0xff] }
  0xa4   :  { %891 = vrot.lane.b32.xlu0 %v5549_v60, %s5020_s30  ;;  %845 = vrot.lane.b32.xlu1 %v5589_v12, %s5019_s21  ;;  %v246_v49 = vpop.permute.xlu0 %245  ;;  %v360_v51 = vmax.f32 %v358_v47, %v359_v48  ;;  %v248_v52 = vpop.permute.xlu1 %247  ;;  %v557_v47 = vld [vmem:[#allocation2 + $0xc9] sm:$0xff] }
  0xa5   :  { %v317_v23 = vmax.f32 %v5350_v25, %v246_v49  ;;  %v318_v24 = vmax.f32 %v5355_v26, %v248_v52  ;;  %v573_v48 = vpack.c.bf16 %v557_v47, %v557_v47  ;;  %v590_v49 = vld [vmem:[#allocation2 + $0xdf] sm:$0xff] }
  0xa6   :  { %385 = vst.msk [vmem:[#allocation2 + $0x158] sm:$0xff] %vm41_vm0, %v360_v51  ;;  %v606_v52 = vpack.c.bf16 %v590_v49, %v590_v49  ;;  %v390_v49 = vld [vmem:[#allocation2 + $0x7] sm:$0xff] }
  0xa7   :  { %v361_v54 = vsel %vm41_vm0, %v317_v23, -inf  ;;  %v362_v55 = vsel %vm41_vm0, %v318_v24, -inf  ;;  %v430_v24 = vld [vmem:[#allocation2 + $0xf8] sm:$0xff] }
  0xa8   :  { %935 = vrot.lane.b32.xlu0 %v5560_v5, %s5021_s12  ;;  %889 = vrot.lane.b32.xlu1 %v5524_v41, %s5020_s30  ;;  %v250_v13 = vpop.permute.xlu0 %249  ;;  %v363_v56 = vmax.f32 %v361_v54, %v362_v55  ;;  %v252_v14 = vpop.permute.xlu1 %251  ;;  %v446_v54 = vpack.c.bf16 %v430_v24, %v430_v24  ;;  %v638_v55 = vpack.c.bf16 %v622_v53, %v622_v53 }
  0xa9   :  { %v319_v25 = vmax.f32 %v5364_v27, %v250_v13  ;;  %v320_v26 = vmax.f32 %v5369_v28, %v252_v14 }
  0xaa   :  { %386 = vst.msk [vmem:[#allocation2 + $0x170] sm:$0xff] %vm41_vm0, %v363_v56 }
  0xab   :  { %v364_v58 = vsel %vm41_vm0, %v319_v25, -inf  ;;  %v365_v61 = vsel %vm41_vm0, %v320_v26, -inf  ;;  %v431_v26 = vld [vmem:[#allocation2 + $0x110] sm:$0xff] }
  0xac   :  { %939 = vrot.lane.b32.xlu0 %v5568_v8, %s5021_s12  ;;  %893 = vrot.lane.b32.xlu1 %v569_v57, %s5020_s30  ;;  %v254_v62 = vpop.permute.xlu0 %253  ;;  %v366_v63 = vmax.f32 %v364_v58, %v365_v61  ;;  %v256_v15 = vpop.permute.xlu1 %255  ;;  %v654_v58 = vld [vmem:[#allocation2 + $0xe1] sm:$0xff]  ;;  %v462_v61 = vld [vmem:[#allocation2 + $0xf9] sm:$0xff] }
  0xad   :  { %v321_v27 = vmax.f32 %v5378_v29, %v254_v62  ;;  %v322_v28 = vmax.f32 %v5383_v30, %v256_v15  ;;  %v447_v15 = vpack.c.bf16 %v431_v26, %v431_v26 }
  0xae   :  { %387 = vst.msk [vmem:[#allocation2 + $0x188] sm:$0xff] %vm41_vm0, %v366_v63 }
  0xaf   :  { %v367_v16 = vsel %vm41_vm0, %v321_v27, -inf  ;;  %v368_v1 = vsel %vm41_vm0, %v322_v28, -inf  ;;  %v670_v27 = vpack.c.bf16 %v654_v58, %v654_v58  ;;  %v478_v28 = vpack.c.bf16 %v462_v61, %v462_v61 }
  0xb0   :  { %983 = vrot.lane.b32.xlu0 %v5514_v34, %s5022_s13  ;;  %937 = vrot.lane.b32.xlu1 %v5547_v59, %s5021_s12  ;;  %v258_v4 = vpop.permute.xlu0 %257  ;;  %v369_v6 = vmax.f32 %v367_v16, %v368_v1  ;;  %v260_v29 = vpop.permute.xlu1 %259 }
  0xb1   :  { %v323_v30 = vmax.f32 %v5392_v31, %v258_v4  ;;  %v324_v32 = vmax.f32 %v5397_v33, %v260_v29  ;;  %v4998_v33 = vld [vmem:[%s7746_s1 + $0x8] sm:$0xff]   ;;  %s5024_s1 = smov 48  }
  0xb2   :  { %388 = vst.msk [vmem:[#allocation2 + $0x1a0] sm:$0xff] %vm41_vm0, %v369_v6  ;;  %4669 = vmatprep.subr.bf16.mxu0 %v4998_v33  ;;  %v464_v4 = vld [vmem:[#allocation2 + $0x129] sm:$0xff]  ;;  %v433_v6 = vld [vmem:[#allocation2 + $0x140] sm:$0xff] }
  0xb3   :  { %v370_v34 = vsel %vm41_vm0, %v323_v30, -inf  ;;  %v371_v17 = vsel %vm41_vm0, %v324_v32, -inf  ;;  %4670 = vmatpush3.bf16.msra.mxu0 %v4998_v33  ;;  %v5727_v32 = vpack.c.bf16 %v464_v4, %v464_v4  ;;  %v5729_v35 = vpack.c.bf16 %v433_v6, %v433_v6 }
  0xb4   :  { %987 = vrot.lane.b32.xlu0 %v5589_v12, %s5022_s13  ;;  %941 = vrot.lane.b32.xlu1 %v5624_v3, %s5021_s12  ;;  %v372_v31 = vmax.f32 %v370_v34, %v371_v17  ;;  %v5685_v51 = vpop.permute.xlu0 %695  ;;  %v494_v34 = vld [vmem:[#allocation2 + $0x10f] sm:$0xff] }
  0xb5   :  { %4977 = vmatprep.subr.msk.bf16.mxu0 %vm1433_vm2, %v4999_v18  ;;  %v463_v17 = vld [vmem:[#allocation2 + $0x111] sm:$0xff]  ;;  %v5739_v36 = vpack.c.bf16 %v494_v34, %v494_v34 }
  0xb6   :  { %389 = vst.msk [vmem:[#allocation2 + $0x1b8] sm:$0xff] %vm41_vm0, %v372_v31  ;;  %v479_v18 = vpack.c.bf16 %v463_v17, %v463_v17 }
  0xb7   :  { %4672 = vmatpush3.bf16.msra.mxu0 %v1435_v38  ;;  %v465_v38 = vld [vmem:[#allocation2 + $0x141] sm:$0xff] }
  0xb8   :  { %1031 = vrot.lane.b32.xlu0 %v5524_v41, %s5023_s18  ;;  %985 = vrot.lane.b32.xlu1 %v5526_v42, %s5022_s13  ;;  %v444_v41 = vpack.c.bf16 %v428_v9, %v428_v9  ;;  %v650_v42 = vld [vmem:[#allocation2 + $0x81] sm:$0xff]  ;;  %v5692_v23 = vpop.permute.xlu0 %743  ;;  %v5746_v7 = vpack.c.bf16 %v465_v38, %v465_v38 }
  0xb9   :  { %v666_v39 = vpack.c.bf16 %v650_v42, %v650_v42 }
  0xbc   :  { %703 = vrot.lane.b32.xlu0 %v5589_v12, %s5016_s28  ;;  %989 = vrot.lane.b32.xlu1 %v634_v37, %s5022_s13  ;;  %v541_v12 = vpack.c.bf16 %v525_v22, %v525_v22  ;;  %v529_v22 = vld [vmem:[#allocation2 + $0x158] sm:$0xff] }
  0xc0   :  { %1035 = vrot.lane.b32.xlu0 %v569_v57, %s5023_s18  ;;  %1033 = vrot.lane.b32.xlu1 %v5549_v60, %s5023_s18  ;;  %v492_v60 = vld [vmem:[#allocation2 + $0xaf] sm:$0xff] }
  0xc1   :  { %v5664_v43 = vpack.c.bf16 %v492_v60, %v492_v60  ;;  %v497_v60 = vld [vmem:[#allocation2 + $0x157] sm:$0xff] }
  0xc2   :  { %v5761_v45 = vpack.c.bf16 %v497_v60, %v497_v60 }
  0xc4   :  { %705 = vrot.lane.b32.xlu1 %v634_v37, %s5016_s28  ;;  %707 = vrot.lane.b32.xlu0 %v444_v41, %s5016_s28 }
  0xc8   :  { %1037 = vrot.lane.b32.xlu1 %v666_v39, %s5023_s18  ;;  %751 = vrot.lane.b32.xlu0 %v569_v57, %s5017_s29  ;;  %v432_v57 = vld [vmem:[#allocation2 + $0x128] sm:$0xff] }
  0xc9   :  { %v5712_v0 = vpack.c.bf16 %v432_v57, %v432_v57 }
  0xcc   :  { %755 = vrot.lane.b32.xlu0 %v476_v19, %s5017_s29  ;;  %709 = vrot.lane.b32.xlu1 %v445_v40, %s5016_s28 }
  0xd0   :  { %799 = vrot.lane.b32.xlu0 %v5624_v3, %s5018_s0  ;;  %753 = vrot.lane.b32.xlu1 %v666_v39, %s5017_s29 }
  0xd4   :  { %803 = vrot.lane.b32.xlu0 %v5664_v43, %s5018_s0  ;;  %757 = vrot.lane.b32.xlu1 %v477_v44, %s5017_s29 }
  0xd8   :  { %847 = vrot.lane.b32.xlu0 %v634_v37, %s5019_s21  ;;  %801 = vrot.lane.b32.xlu1 %v5669_v11, %s5018_s0  ;;  %v496_v37 = vld [vmem:[#allocation2 + $0x13f] sm:$0xff] }
  0xd9   :  { %v5744_v42 = vpack.c.bf16 %v496_v37, %v496_v37 }
  0xdc   :  { %851 = vrot.lane.b32.xlu0 %v445_v40, %s5019_s21  ;;  %805 = vrot.lane.b32.xlu1 %v509_v21, %s5018_s0 }
  0xe0   :  { %895 = vrot.lane.b32.xlu0 %v666_v39, %s5020_s30  ;;  %849 = vrot.lane.b32.xlu1 %v444_v41, %s5019_s21  ;;  %v495_v39 = vld [vmem:[#allocation2 + $0x127] sm:$0xff] }
  0xe4   :  { %899 = vrot.lane.b32.xlu0 %v477_v44, %s5020_s30  ;;  %853 = vrot.lane.b32.xlu1 %v541_v12, %s5019_s21 }
  0xe8   :  { %943 = vrot.lane.b32.xlu0 %v5669_v11, %s5021_s12  ;;  %897 = vrot.lane.b32.xlu1 %v476_v19, %s5020_s30 }
  0xec   :  { %947 = vrot.lane.b32.xlu0 %v509_v21, %s5021_s12  ;;  %901 = vrot.lane.b32.xlu1 %v573_v48, %s5020_s30 }
  0xf0   :  { %991 = vrot.lane.b32.xlu0 %v444_v41, %s5022_s13  ;;  %945 = vrot.lane.b32.xlu1 %v5664_v43, %s5021_s12 }
  0xf4   :  { %995 = vrot.lane.b32.xlu0 %v541_v12, %s5022_s13  ;;  %949 = vrot.lane.b32.xlu1 %v606_v52, %s5021_s12  ;;  %v406_v52 = vpack.c.bf16 %v390_v49, %v390_v49 }
  0xf8   :  { %1039 = vrot.lane.b32.xlu0 %v476_v19, %s5023_s18  ;;  %993 = vrot.lane.b32.xlu1 %v445_v40, %s5022_s13  ;;  %v5756_v19 = vpack.c.bf16 %v495_v39, %v495_v39 }
  0xfa   :  { %v5696_v13 = vpop.permute.xlu1 %697  ;;  %v5698_v56 = vpop.permute.xlu0 %699 }
  0xfb   :  { %v1068_v61 = vsel %vm41_vm0, %v5537_v50, %v5696_v13 }
  0xfc   :  { %711 = vrot.lane.b32.xlu0 %v446_v54, %s5016_s28  ;;  %997 = vrot.lane.b32.xlu1 %v638_v55, %s5022_s13  ;;  %v561_v54 = vld [vmem:[#allocation2 + $0x159] sm:$0xff]  ;;  %v1065_v55 = vsel %vm41_vm0, %v406_v52, %v5685_v51 }
  0xfd   :  { %v5786_v58 = vpack.c.bf16 %v561_v54, %v561_v54 }
  0xfe   :  { %v5702_v14 = vpop.permute.xlu1 %701  ;;  %v5704_v25 = vpop.permute.xlu0 %747 }
  0xff   :  { %v1074_v39 = vsel %vm41_vm0, %v5547_v59, %v5702_v14 }
 0x100   :  { %1043 = vrot.lane.b32.xlu0 %v573_v48, %s5023_s18  ;;  %1041 = vrot.lane.b32.xlu1 %v477_v44, %s5023_s18  ;;  %v5774_v48 = vpack.c.bf16 %v529_v22, %v529_v22 }
 0x102   :  { %v5708_v62 = vpop.permute.xlu1 %745  ;;  %v5710_v63 = vpop.permute.xlu0 %791 }
 0x103   :  { %v1114_v51 = vsel %vm7780_vm1, %v1068_v61, %v5708_v62 }
 0x104   :  { %713 = vrot.lane.b32.xlu1 %v447_v15, %s5016_s28  ;;  %715 = vrot.lane.b32.xlu0 %v5712_v0, %s5016_s28 }
 0x106   :  { %v5717_v16 = vpop.permute.xlu1 %749  ;;  %v5719_v1 = vpop.permute.xlu0 %795 }
 0x108   :  { %1045 = vrot.lane.b32.xlu1 %v670_v27, %s5023_s18  ;;  %759 = vrot.lane.b32.xlu0 %v478_v28, %s5017_s29 }
 0x10a   :  { %v5723_v29 = vpop.permute.xlu1 %793  ;;  %v5725_v30 = vpop.permute.xlu0 %839 }
 0x10b   :  { %v1147_v50 = vsel %vm1143_vm3, %v1114_v51, %v5723_v29  ;;  %v468_v51 = vld [vmem:[#allocation2 + $0x189] sm:$0xff] }
 0x10c   :  { %763 = vrot.lane.b32.xlu0 %v5727_v32, %s5017_s29  ;;  %717 = vrot.lane.b32.xlu1 %v5729_v35, %s5016_s28 }
 0x10e   :  { %v5735_v31 = vpop.permute.xlu1 %797  ;;  %v5737_v33 = vpop.permute.xlu0 %843 }
 0x110   :  { %807 = vrot.lane.b32.xlu0 %v5739_v36, %s5018_s0  ;;  %761 = vrot.lane.b32.xlu1 %v479_v18, %s5017_s29 }
 0x112   :  { %v842_v9 = vpop.permute.xlu1 %841  ;;  %v888_v41 = vpop.permute.xlu0 %887 }
 0x113   :  { %v1180_v6 = vsel %vm1176_vm4, %v1147_v50, %v842_v9 }
 0x114   :  { %811 = vrot.lane.b32.xlu0 %v5744_v42, %s5018_s0  ;;  %765 = vrot.lane.b32.xlu1 %v5746_v7, %s5017_s29 }
 0x116   :  { %v5752_v10 = vpop.permute.xlu1 %845  ;;  %v5754_v40 = vpop.permute.xlu0 %891 }
 0x118   :  { %855 = vrot.lane.b32.xlu0 %v447_v15, %s5019_s21  ;;  %809 = vrot.lane.b32.xlu1 %v5756_v19, %s5018_s0  ;;  %v1112_v15 = vsel %vm7780_vm1, %v1065_v55, %v5692_v23  ;;  %v594_v23 = vld [vmem:[#allocation2 + $0x16f] sm:$0xff] }
 0x119   :  { %v1145_v27 = vsel %vm1143_vm3, %v1112_v15, %v5710_v63  ;;  %v5818_v38 = vpack.c.bf16 %v594_v23, %v594_v23  ;;  %v437_v15 = vld [vmem:[#allocation2 + $0x1a0] sm:$0xff] }
 0x11a   :  { %v890_v20 = vpop.permute.xlu1 %889  ;;  %v936_v44 = vpop.permute.xlu0 %935  ;;  %v1178_v4 = vsel %vm1176_vm4, %v1145_v27, %v5725_v30 }
 0x11b   :  { %v1211_v62 = vsel %vm1209_vm5, %v1178_v4, %v888_v41  ;;  %v1213_v34 = vsel %vm1209_vm5, %v1180_v6, %v890_v20  ;;  %v5896_v4 = vpack.c.bf16 %v468_v51, %v468_v51 }
 0x11c   :  { %859 = vrot.lane.b32.xlu0 %v5729_v35, %s5019_s21  ;;  %813 = vrot.lane.b32.xlu1 %v5761_v45, %s5018_s0  ;;  %v1244_v63 = vsel %vm1242_vm6, %v1211_v62, %v936_v44  ;;  %v1118_v44 = vsel %vm7780_vm1, %v1074_v39, %v5717_v16  ;;  %v469_v62 = vld [vmem:[#allocation2 + $0x1a1] sm:$0xff] }
 0x11e   :  { %v5767_v46 = vpop.permute.xlu1 %893  ;;  %v5769_v21 = vpop.permute.xlu0 %939 }
 0x120   :  { %903 = vrot.lane.b32.xlu0 %v479_v18, %s5020_s30  ;;  %857 = vrot.lane.b32.xlu1 %v5712_v0, %s5019_s21 }
 0x122   :  { %v938_v12 = vpop.permute.xlu1 %937  ;;  %v984_v47 = vpop.permute.xlu0 %983 }
 0x123   :  { %v1246_v29 = vsel %vm1242_vm6, %v1213_v34, %v938_v12  ;;  %v1277_v30 = vsel %vm1275_vm7, %v1244_v63, %v984_v47  ;;  %v626_v12 = vld [vmem:[#allocation2 + $0x170] sm:$0xff]  ;;  %v500_v34 = vld [vmem:[#allocation2 + $0x19f] sm:$0xff] }
 0x124   :  { %907 = vrot.lane.b32.xlu0 %v5746_v7, %s5020_s30  ;;  %861 = vrot.lane.b32.xlu1 %v5774_v48, %s5019_s21  ;;  %v642_v52 = vpack.c.bf16 %v626_v12, %v626_v12 }
 0x126   :  { %v942_v24 = vpop.permute.xlu1 %941  ;;  %v988_v53 = vpop.permute.xlu0 %987 }
 0x128   :  { %951 = vrot.lane.b32.xlu0 %v5756_v19, %s5021_s12  ;;  %905 = vrot.lane.b32.xlu1 %v5727_v32, %s5020_s30 }
 0x12a   :  { %v986_v26 = vpop.permute.xlu1 %985  ;;  %v1032_v57 = vpop.permute.xlu0 %1031 }
 0x12b   :  { %v1279_v17 = vsel %vm1275_vm7, %v1246_v29, %v986_v26  ;;  %v1310_v9 = vsel %vm1308_vm8, %v1277_v30, %v1032_v57  ;;  %v5909_v29 = vpack.c.bf16 %v469_v62, %v469_v62  ;;  %v5911_v30 = vpack.c.bf16 %v500_v34, %v500_v34 }
 0x12c   :  { %955 = vrot.lane.b32.xlu0 %v5761_v45, %s5021_s12  ;;  %909 = vrot.lane.b32.xlu1 %v5786_v58, %s5020_s30 }
 0x12e   :  { %v990_v13 = vpop.permute.xlu1 %989  ;;  %v5803_v28 = vpop.permute.xlu0 %703 }
 0x130   :  { %999 = vrot.lane.b32.xlu0 %v5712_v0, %s5022_s13  ;;  %953 = vrot.lane.b32.xlu1 %v5744_v42, %s5021_s12  ;;  %v1071_v0 = vsel %vm41_vm0, %v5560_v5, %v5698_v56  ;;  %v1151_v56 = vsel %vm1143_vm3, %v1118_v44, %v5735_v31 }
 0x131   :  { %v1116_v20 = vsel %vm7780_vm1, %v1071_v0, %v5704_v25  ;;  %v1184_v25 = vsel %vm1176_vm4, %v1151_v56, %v5752_v10 }
 0x132   :  { %v1034_v18 = vpop.permute.xlu1 %1033  ;;  %v1036_v37 = vpop.permute.xlu0 %1035  ;;  %v1149_v5 = vsel %vm1143_vm3, %v1116_v20, %v5719_v1  ;;  %v1217_v1 = vsel %vm1209_vm5, %v1184_v25, %v5767_v46 }
 0x133   :  { %v1312_v41 = vsel %vm1308_vm8, %v1279_v17, %v1034_v18  ;;  %v1182_v22 = vsel %vm1176_vm4, %v1149_v5, %v5737_v33  ;;  %v1250_v33 = vsel %vm1242_vm6, %v1217_v1, %v942_v24  ;;  %v436_v24 = vld [vmem:[#allocation2 + $0x188] sm:$0xff]  ;;  %v533_v5 = vld [vmem:[#allocation2 + $0x1b8] sm:$0xff] }
 0x134   :  { %957 = vrot.lane.b32.xlu1 %v5818_v38, %s5021_s12  ;;  %1003 = vrot.lane.b32.xlu0 %v5774_v48, %s5022_s13  ;;  %v4497_v60 = vcombine.low %v1310_v9, %v1312_v41  ;;  %v1215_v16 = vsel %vm1209_vm5, %v1182_v22, %v5754_v40  ;;  %v1283_v47 = vsel %vm1275_vm7, %v1250_v33, %v990_v13  ;;  %v499_v17 = vld [vmem:[#allocation2 + $0x187] sm:$0xff]  ;;  %v501_v41 = vld [vmem:[#allocation2 + $0x1b7] sm:$0xff] }
 0x135   :  { %v1248_v31 = vsel %vm1242_vm6, %v1215_v16, %v5769_v21  ;;  %v5882_v26 = vpack.c.bf16 %v436_v24, %v436_v24  ;;  %v5894_v13 = vpack.c.bf16 %v437_v15, %v437_v15  ;;  %v5921_v9 = vpack.c.bf16 %v499_v17, %v499_v17  ;;  %v565_v1 = vld [vmem:[#allocation2 + $0x1b9] sm:$0xff] }
 0x136   :  { %v5840_v59 = vpop.permute.xlu1 %705  ;;  %4673 = vmatprep.mubr.msk.bf16.mxu0 %vm1408_vm9, %v4497_v60  ;;  %v5843_v14 = vpop.permute.xlu0 %707  ;;  %v1281_v10 = vsel %vm1275_vm7, %v1248_v31, %v988_v53  ;;  %v517_v60 = vpack.c.bf16 %v501_v41, %v501_v41  ;;  %v549_v25 = vpack.c.bf16 %v533_v5, %v533_v5 }
 0x137   :  { %v1314_v46 = vsel %vm1308_vm8, %v1281_v10, %v1036_v37  ;;  %v581_v10 = vpack.c.bf16 %v565_v1, %v565_v1 }
 0x138   :  { %1001 = vrot.lane.b32.xlu1 %v5729_v35, %s5022_s13  ;;  %1047 = vrot.lane.b32.xlu0 %v5727_v32, %s5023_s18 }
 0x13a   :  { %v1038_v49 = vpop.permute.xlu1 %1037  ;;  %v5862_v40 = vpop.permute.xlu0 %751 }
 0x13b   :  { %v1316_v35 = vsel %vm1308_vm8, %v1283_v47, %v1038_v49  ;;  %v1077_v47 = vsel %vm41_vm0, %v5568_v8, %v5803_v28  ;;  %v1080_v49 = vsel %vm41_vm0, %v5624_v3, %v5840_v59 }
 0x13c   :  { %v4498_v54 = vcombine.low %v1314_v46, %v1316_v35  ;;  %1005 = vrot.lane.b32.xlu1 %v642_v52, %s5022_s13  ;;  %719 = vrot.lane.b32.xlu0 %v5774_v48, %s5016_s28  ;;  %v658_v48 = vld [vmem:[#allocation2 + $0x171] sm:$0xff] }
 0x13d   :  { %v598_v35 = vld [vmem:[#allocation2 + $0x1cf] sm:$0xff] }
 0x13e   :  { %v5869_v32 = vpop.permute.xlu1 %709  ;;  %4674 = vmatmul.mubr.msk.bf16.vlgmr.msra.gmra.mrb[0].mxu0 %vm1408_vm9, %v4498_v54  ;;  %v5872_v21 = vpop.permute.xlu0 %755 }
 0x140   :  { %1049 = vrot.lane.b32.xlu1 %v5746_v7, %s5023_s18  ;;  %1051 = vrot.lane.b32.xlu0 %v5786_v58, %s5023_s18  ;;  %v674_v7 = vpack.c.bf16 %v658_v48, %v658_v48 }
 0x142   :  { %v5878_v53 = vpop.permute.xlu1 %753  ;;  %v5880_v55 = vpop.permute.xlu0 %799 }
 0x143   :  { %v1122_v46 = vsel %vm7780_vm1, %v1080_v49, %v5878_v53  ;;  %v614_v53 = vpack.c.bf16 %v598_v35, %v598_v35 }
 0x144   :  { %721 = vrot.lane.b32.xlu1 %v642_v52, %s5016_s28  ;;  %723 = vrot.lane.b32.xlu0 %v5882_v26, %s5016_s28 }
 0x146   :  { %v5887_v57 = vpop.permute.xlu1 %757  ;;  %v5889_v61 = vpop.permute.xlu0 %803 }
 0x148   :  { %1053 = vrot.lane.b32.xlu1 %v674_v7, %s5023_s18  ;;  %767 = vrot.lane.b32.xlu0 %v5786_v58, %s5017_s29 }
 0x14a   :  { %v802_v27 = vpop.permute.xlu1 %801  ;;  %v848_v50 = vpop.permute.xlu0 %847 }
 0x14b   :  { %v1155_v8 = vsel %vm1143_vm3, %v1122_v46, %v802_v27 }
 0x14c   :  { %725 = vrot.lane.b32.xlu1 %v5894_v13, %s5016_s28  ;;  %771 = vrot.lane.b32.xlu0 %v5896_v4, %s5017_s29 }
 0x14e   :  { %v5902_v6 = vpop.permute.xlu1 %805  ;;  %v5904_v23 = vpop.permute.xlu0 %851 }
 0x150   :  { %769 = vrot.lane.b32.xlu1 %v674_v7, %s5017_s29  ;;  %815 = vrot.lane.b32.xlu0 %v5818_v38, %s5018_s0 }
 0x152   :  { %v850_v58 = vpop.permute.xlu1 %849  ;;  %v896_v63 = vpop.permute.xlu0 %895 }
 0x153   :  { %v1188_v59 = vsel %vm1176_vm4, %v1155_v8, %v850_v58  ;;  %v1083_v58 = vsel %vm41_vm0, %v5669_v11, %v5843_v14  ;;  %v1615_v8 = vld [vmem:[#allocation3 + $0x9] sm:$0xff] }
 0x154   :  { %773 = vrot.lane.b32.xlu1 %v5909_v29, %s5017_s29  ;;  %819 = vrot.lane.b32.xlu0 %v5911_v30, %s5018_s0  ;;  %v1124_v17 = vsel %vm7780_vm1, %v1083_v58, %v5872_v21 }
 0x156   :  { %v5917_v18 = vpop.permute.xlu1 %853  ;;  %v5919_v37 = vpop.permute.xlu0 %899 }
 0x158   :  { %817 = vrot.lane.b32.xlu1 %v5921_v9, %s5018_s0  ;;  %863 = vrot.lane.b32.xlu0 %v642_v52, %s5019_s21  ;;  %v1120_v52 = vsel %vm7780_vm1, %v1077_v47, %v5862_v40 }
 0x159   :  { %v1153_v54 = vsel %vm1143_vm3, %v1120_v52, %v5880_v55 }
 0x15a   :  { %v898_v0 = vpop.permute.xlu1 %897  ;;  %v944_v39 = vpop.permute.xlu0 %943  ;;  %v1186_v3 = vsel %vm1176_vm4, %v1153_v54, %v848_v50  ;;  %v1751_v54 = vld [vmem:[#allocation3 + $0xdf] sm:$0xff] }
 0x15b   :  { %v1219_v48 = vsel %vm1209_vm5, %v1186_v3, %v896_v63  ;;  %v1221_v40 = vsel %vm1209_vm5, %v1188_v59, %v898_v0  ;;  %v630_v0 = vld [vmem:[#allocation2 + $0x1d0] sm:$0xff] }
 0x15c   :  { %821 = vrot.lane.b32.xlu1 %v517_v60, %s5018_s0  ;;  %867 = vrot.lane.b32.xlu0 %v5894_v13, %s5019_s21  ;;  %v1252_v55 = vsel %vm1242_vm6, %v1219_v48, %v944_v39  ;;  %v1157_v39 = vsel %vm1143_vm3, %v1124_v17, %v5889_v61  ;;  %v1783_v48 = vld [vmem:[#allocation3 + $0xe0] sm:$0xff] }
 0x15e   :  { %v902_v20 = vpop.permute.xlu1 %901  ;;  %v5929_v44 = vpop.permute.xlu0 %947 }
 0x160   :  { %865 = vrot.lane.b32.xlu1 %v5882_v26, %s5019_s21  ;;  %911 = vrot.lane.b32.xlu0 %v674_v7, %s5020_s30 }
 0x162   :  { %v946_v56 = vpop.permute.xlu1 %945  ;;  %v992_v22 = vpop.permute.xlu0 %991 }
 0x163   :  { %v1254_v7 = vsel %vm1242_vm6, %v1221_v40, %v946_v56  ;;  %v1285_v15 = vsel %vm1275_vm7, %v1252_v55, %v992_v22  ;;  %v1591_v40 = vld [vmem:[#allocation3 + $0xf8] sm:$0xff] }
 0x164   :  { %869 = vrot.lane.b32.xlu1 %v549_v25, %s5019_s21  ;;  %915 = vrot.lane.b32.xlu0 %v5909_v29, %s5020_s30  ;;  %v1607_v55 = vpack.c.bf16 %v1591_v40, %v1591_v40 }
 0x166   :  { %v950_v12 = vpop.permute.xlu1 %949  ;;  %v996_v16 = vpop.permute.xlu0 %995 }
 0x168   :  { %913 = vrot.lane.b32.xlu1 %v5896_v4, %s5020_s30  ;;  %959 = vrot.lane.b32.xlu0 %v5921_v9, %s5021_s12 }
 0x16a   :  { %v994_v31 = vpop.permute.xlu1 %993  ;;  %v1040_v33 = vpop.permute.xlu0 %1039 }
 0x16b   :  { %v1287_v51 = vsel %vm1275_vm7, %v1254_v7, %v994_v31  ;;  %v1318_v62 = vsel %vm1308_vm8, %v1285_v15, %v1040_v33 }
 0x16c   :  { %917 = vrot.lane.b32.xlu1 %v581_v10, %s5020_s30  ;;  %963 = vrot.lane.b32.xlu0 %v517_v60, %s5021_s12 }
 0x16e   :  { %v998_v28 = vpop.permute.xlu1 %997  ;;  %v5956_v24 = vpop.permute.xlu0 %711 }
 0x170   :  { %961 = vrot.lane.b32.xlu1 %v5911_v30, %s5021_s12  ;;  %1007 = vrot.lane.b32.xlu0 %v5882_v26, %s5022_s13  ;;  %v1086_v26 = vsel %vm41_vm0, %v5664_v43, %v5869_v32  ;;  %v1190_v32 = vsel %vm1176_vm4, %v1157_v39, %v5904_v23 }
 0x171   :  { %v1126_v41 = vsel %vm7780_vm1, %v1086_v26, %v5887_v57  ;;  %v1223_v57 = vsel %vm1209_vm5, %v1190_v32, %v5919_v37 }
 0x172   :  { %v1042_v27 = vpop.permute.xlu1 %1041  ;;  %v1044_v50 = vpop.permute.xlu0 %1043  ;;  %v1159_v11 = vsel %vm1143_vm3, %v1126_v41, %v5902_v6  ;;  %v646_v6 = vpack.c.bf16 %v630_v0, %v630_v0  ;;  %v1256_v60 = vsel %vm1242_vm6, %v1223_v57, %v5929_v44  ;;  %v662_v44 = vld [vmem:[#allocation2 + $0x1d1] sm:$0xff] }
 0x173   :  { %v1320_v34 = vsel %vm1308_vm8, %v1287_v51, %v1042_v27  ;;  %v1192_v21 = vsel %vm1176_vm4, %v1159_v11, %v5917_v18  ;;  %v1289_v5 = vsel %vm1275_vm7, %v1256_v60, %v996_v16  ;;  %v678_v1 = vpack.c.bf16 %v662_v44, %v662_v44  ;;  %v1815_v51 = vld [vmem:[#allocation3 + $0xe1] sm:$0xff]  ;;  %v1623_v27 = vld [vmem:[#allocation3 + $0xf9] sm:$0xff] }
 0x174   :  { %v4499_v63 = vcombine.low %v1318_v62, %v1320_v34  ;;  %965 = vrot.lane.b32.xlu1 %v614_v53, %s5021_s12  ;;  %1011 = vrot.lane.b32.xlu0 %v549_v25, %s5022_s13  ;;  %v1225_v61 = vsel %vm1209_vm5, %v1192_v21, %v902_v20  ;;  %v1583_v20 = vld [vmem:[#allocation3 + $0x8] sm:$0xff]  ;;  %v1322_v22 = vsel %vm1308_vm8, %v1289_v5, %v1044_v50  ;;  %v398_v0 = vld [vmem:[#allocation2 + $0xf7] sm:$0xff] }
 0x175   :  { %v1258_v23 = vsel %vm1242_vm6, %v1225_v61, %v950_v12  ;;  %v1799_v53 = vpack.c.bf16 %v1783_v48, %v1783_v48  ;;  %v1831_v50 = vpack.c.bf16 %v1815_v51, %v1815_v51  ;;  %v1639_v62 = vpack.c.bf16 %v1623_v27, %v1623_v27 }
 0x176   :  { %v5988_v14 = vpop.permute.xlu1 %713  ;;  %4677 = vmatprep.mubr.msk.bf16.mxu0 %vm1408_vm9, %v4499_v63  ;;  %v5991_v43 = vpop.permute.xlu0 %715  ;;  %v1291_v18 = vsel %vm1275_vm7, %v1258_v23, %v998_v28  ;;  %v1631_v28 = vpack.c.bf16 %v1615_v8, %v1615_v8  ;;  %v414_v32 = vpack.c.bf16 %v398_v0, %v398_v0 }
 0x178   :  { %1009 = vrot.lane.b32.xlu1 %v5894_v13, %s5022_s13  ;;  %1055 = vrot.lane.b32.xlu0 %v5896_v4, %s5023_s18  ;;  %v1599_v4 = vpack.c.bf16 %v1583_v20, %v1583_v20  ;;  %v1089_v61 = vsel %vm41_vm0, %v414_v32, %v5956_v24 }
 0x17a   :  { %v1046_v56 = vpop.permute.xlu1 %1045  ;;  %v6009_v37 = vpop.permute.xlu0 %759 }
 0x17b   :  { %v1324_v13 = vsel %vm1308_vm8, %v1291_v18, %v1046_v56  ;;  %v1128_v60 = vsel %vm7780_vm1, %v1089_v61, %v6009_v37 }
 0x17c   :  { %v4500_v25 = vcombine.low %v1322_v22, %v1324_v13  ;;  %1013 = vrot.lane.b32.xlu1 %v646_v6, %s5022_s13  ;;  %1059 = vrot.lane.b32.xlu0 %v581_v10, %s5023_s18  ;;  %v1092_v6 = vsel %vm41_vm0, %v5739_v36, %v5988_v14 }
 0x17e   :  { %v6015_v12 = vpop.permute.xlu1 %717  ;;  %4678 = vmatmul.mubr.msk.bf16.gmra.mrb[4].mxu0 %vm1408_vm9, %v4500_v25  ;;  %v6018_v16 = vpop.permute.xlu0 %763 }
 0x180   :  { %1057 = vrot.lane.b32.xlu1 %v5909_v29, %s5023_s18  ;;  %1856 = vrot.lane.b32.xlu0 %v1599_v4, %s5017_s29  ;;  %v1767_v29 = vpack.c.bf16 %v1751_v54, %v1751_v54 }
 0x182   :  { %v762_v31 = vpop.permute.xlu1 %761  ;;  %v808_v33 = vpop.permute.xlu0 %807 }
 0x183   :  { %v1130_v23 = vsel %vm7780_vm1, %v1092_v6, %v762_v31  ;;  %v1161_v5 = vsel %vm1143_vm3, %v1128_v60, %v808_v33 }
 0x184   :  { %1061 = vrot.lane.b32.xlu1 %v678_v1, %s5023_s18  ;;  %1904 = vrot.lane.b32.xlu0 %v1631_v28, %s5019_s21 }
 0x186   :  { %v6024_v47 = vpop.permute.xlu1 %765  ;;  %v6026_v10 = vpop.permute.xlu0 %811 }
 0x188   :  { %2110 = vrot.lane.b32.xlu1 %v1767_v29, %s5024_s1  ;;  %1872 = vrot.lane.b32.xlu0 %v1607_v55, %s5017_s29 }
 0x18a   :  { %v810_v49 = vpop.permute.xlu1 %809  ;;  %v856_v52 = vpop.permute.xlu0 %855 }
 0x18b   :  { %v1163_v18 = vsel %vm1143_vm3, %v1130_v23, %v810_v49  ;;  %v1194_v22 = vsel %vm1176_vm4, %v1161_v5, %v856_v52  ;;  %v1095_v49 = vsel %vm41_vm0, %v5756_v19, %v5991_v43  ;;  %v1098_v52 = vsel %vm41_vm0, %v5744_v42, %v6015_v12 }
 0x18c   :  { %2158 = vrot.lane.b32.xlu1 %v1799_v53, %s5025_s22  ;;  %1920 = vrot.lane.b32.xlu0 %v1639_v62, %s5019_s21  ;;  %v1132_v8 = vsel %vm7780_vm1, %v1095_v49, %v6018_v16  ;;  %v1134_v29 = vsel %vm7780_vm1, %v1098_v52, %v6024_v47 }
 0x18d   :  { %v1165_v28 = vsel %vm1143_vm3, %v1132_v8, %v6026_v10 }
 0x18e   :  { %v6028_v46 = vpop.permute.xlu1 %813  ;;  %v6030_v35 = vpop.permute.xlu0 %859 }
 0x18f   :  { %v1198_v42 = vsel %vm1176_vm4, %v1165_v28, %v6030_v35 }
 0x190   :  { %2206 = vrot.lane.b32.xlu1 %v1831_v50, %s5026_s23 }
 0x192   :  { %v858_v3 = vpop.permute.xlu1 %857  ;;  %v904_v59 = vpop.permute.xlu0 %903 }
 0x193   :  { %v1196_v13 = vsel %vm1176_vm4, %v1163_v18, %v858_v3  ;;  %v1227_v24 = vsel %vm1209_vm5, %v1194_v22, %v904_v59  ;;  %v1167_v3 = vsel %vm1143_vm3, %v1134_v29, %v6028_v46 }
 0x196   :  { %v862_v7 = vpop.permute.xlu1 %861  ;;  %v908_v15 = vpop.permute.xlu0 %907 }
 0x197   :  { %v1200_v43 = vsel %vm1176_vm4, %v1167_v3, %v862_v7  ;;  %v1231_v12 = vsel %vm1209_vm5, %v1198_v42, %v908_v15 }
 0x19a   :  { %v906_v34 = vpop.permute.xlu1 %905  ;;  %v952_v58 = vpop.permute.xlu0 %951 }
 0x19b   :  { %v1229_v25 = vsel %vm1209_vm5, %v1196_v13, %v906_v34  ;;  %v1260_v36 = vsel %vm1242_vm6, %v1227_v24, %v952_v58 }
 0x19e   :  { %v910_v26 = vpop.permute.xlu1 %909  ;;  %v956_v63 = vpop.permute.xlu0 %955 }
 0x19f   :  { %v1233_v16 = vsel %vm1209_vm5, %v1200_v43, %v910_v26  ;;  %v1264_v47 = vsel %vm1242_vm6, %v1231_v12, %v956_v63 }
 0x1a2   :  { %v954_v17 = vpop.permute.xlu1 %953  ;;  %v1000_v41 = vpop.permute.xlu0 %999 }
 0x1a3   :  { %v1262_v14 = vsel %vm1242_vm6, %v1229_v25, %v954_v17  ;;  %v1293_v37 = vsel %vm1275_vm7, %v1260_v36, %v1000_v41 }
 0x1a6   :  { %v958_v39 = vpop.permute.xlu1 %957  ;;  %v1004_v11 = vpop.permute.xlu0 %1003 }
 0x1a7   :  { %v1266_v10 = vsel %vm1242_vm6, %v1233_v16, %v958_v39  ;;  %v1297_v48 = vsel %vm1275_vm7, %v1264_v47, %v1004_v11 }
 0x1aa   :  { %v1002_v21 = vpop.permute.xlu1 %1001  ;;  %v1048_v57 = vpop.permute.xlu0 %1047 }
 0x1ab   :  { %v1295_v4 = vsel %vm1275_vm7, %v1262_v14, %v1002_v21  ;;  %v1326_v31 = vsel %vm1308_vm8, %v1293_v37, %v1048_v57 }
 0x1ae   :  { %v1006_v56 = vpop.permute.xlu1 %1005  ;;  %v720_v20 = vpop.permute.xlu0 %719 }
 0x1af   :  { %v1299_v46 = vsel %vm1275_vm7, %v1266_v10, %v1006_v56  ;;  %v1101_v56 = vsel %vm41_vm0, %v5761_v45, %v720_v20 }
 0x1b2   :  { %v1050_v44 = vpop.permute.xlu1 %1049  ;;  %v1052_v1 = vpop.permute.xlu0 %1051 }
 0x1b3   :  { %v1328_v33 = vsel %vm1308_vm8, %v1295_v4, %v1050_v44  ;;  %v1330_v55 = vsel %vm1308_vm8, %v1297_v48, %v1052_v1 }
 0x1b4   :  { %v4501_v54 = vcombine.low %v1326_v31, %v1328_v33 }
 0x1b6   :  { %v722_v59 = vpop.permute.xlu1 %721  ;;  %4681 = vmatprep.mubr.msk.bf16.mxu0 %vm1408_vm9, %v4501_v54  ;;  %v724_v19 = vpop.permute.xlu0 %723 }
 0x1b7   :  { %v1104_v22 = vsel %vm41_vm0, %v5818_v38, %v722_v59  ;;  %v1107_v45 = vsel %vm41_vm0, %v5921_v9, %v724_v19 }
 0x1ba   :  { %v1054_v40 = vpop.permute.xlu1 %1053  ;;  %v768_v53 = vpop.permute.xlu0 %767 }
 0x1bb   :  { %v1332_v35 = vsel %vm1308_vm8, %v1299_v46, %v1054_v40  ;;  %v1136_v13 = vsel %vm7780_vm1, %v1101_v56, %v768_v53 }
 0x1bc   :  { %v4502_v51 = vcombine.low %v1330_v55, %v1332_v35 }
 0x1be   :  { %v726_v7 = vpop.permute.xlu1 %725  ;;  %4682 = vmatmul.mubr.msk.bf16.gmra.mrb[8].mxu0 %vm1408_vm9, %v4502_v51  ;;  %v772_v15 = vpop.permute.xlu0 %771  ;;  %v6126_v51 = vld [vmem:[%s7747_s2] ss:$0 sm:$0xff]  ;;  %s5027_s2 = smov 40  }
 0x1bf   :  { %v1110_v38 = vsel %vm41_vm0, %v5911_v30, %v726_v7  ;;  %v1140_v31 = vsel %vm7780_vm1, %v1107_v45, %v772_v15  ;;  %vm7765_vm0 = vmmov 0  }
 0x1c2   :  { %v770_v27 = vpop.permute.xlu1 %769  ;;  %v816_v50 = vpop.permute.xlu0 %815 }
 0x1c3   :  { %v1138_v24 = vsel %vm7780_vm1, %v1104_v22, %v770_v27  ;;  %v1169_v25 = vsel %vm1143_vm3, %v1136_v13, %v816_v50 }
 0x1c6   :  { %v774_v62 = vpop.permute.xlu1 %773  ;;  %v820_v34 = vpop.permute.xlu0 %819 }
 0x1c7   :  { %v1142_v33 = vsel %vm7780_vm1, %v1110_v38, %v774_v62  ;;  %v1173_v54 = vsel %vm1143_vm3, %v1140_v31, %v820_v34 }
 0x1ca   :  { %v818_v58 = vpop.permute.xlu1 %817  ;;  %v864_v26 = vpop.permute.xlu0 %863 }
 0x1cb   :  { %v1171_v36 = vsel %vm1143_vm3, %v1138_v24, %v818_v58  ;;  %v1202_v4 = vsel %vm1176_vm4, %v1169_v25, %v864_v26 }
 0x1ce   :  { %v822_v63 = vpop.permute.xlu1 %821  ;;  %v868_v17 = vpop.permute.xlu0 %867 }
 0x1cf   :  { %v1175_v8 = vsel %vm1143_vm3, %v1142_v33, %v822_v63  ;;  %v1206_v28 = vsel %vm1176_vm4, %v1173_v54, %v868_v17 }
 0x1d2   :  { %v866_v41 = vpop.permute.xlu1 %865  ;;  %v912_v0 = vpop.permute.xlu0 %911 }
 0x1d3   :  { %v1204_v44 = vsel %vm1176_vm4, %v1171_v36, %v866_v41  ;;  %v1235_v20 = vsel %vm1209_vm5, %v1202_v4, %v912_v0 }
 0x1d6   :  { %v870_v39 = vpop.permute.xlu1 %869  ;;  %v916_v11 = vpop.permute.xlu0 %915 }
 0x1d7   :  { %v1208_v3 = vsel %vm1176_vm4, %v1175_v8, %v870_v39  ;;  %v1239_v42 = vsel %vm1209_vm5, %v1206_v28, %v916_v11 }
 0x1da   :  { %v914_v32 = vpop.permute.xlu1 %913  ;;  %v960_v21 = vpop.permute.xlu0 %959 }
 0x1db   :  { %v1237_v1 = vsel %vm1209_vm5, %v1204_v44, %v914_v32  ;;  %v1268_v49 = vsel %vm1242_vm6, %v1235_v20, %v960_v21 }
 0x1de   :  { %v918_v57 = vpop.permute.xlu1 %917  ;;  %v964_v61 = vpop.permute.xlu0 %963 }
 0x1df   :  { %v1241_v43 = vsel %vm1209_vm5, %v1208_v3, %v918_v57  ;;  %v1272_v47 = vsel %vm1242_vm6, %v1239_v42, %v964_v61  ;;  %v5001_v3 = vld [vmem:[%s7748_s3 + $0x8] sm:$0xff]  }
 0x1e2   :  { %v962_v6 = vpop.permute.xlu1 %961  ;;  %v1008_v60 = vpop.permute.xlu0 %1007 }
 0x1e3   :  { %v1270_v52 = vsel %vm1242_vm6, %v1237_v1, %v962_v6  ;;  %v1301_v9 = vsel %vm1275_vm7, %v1268_v49, %v1008_v60 }
 0x1e6   :  { %v966_v23 = vpop.permute.xlu1 %965  ;;  %v1012_v5 = vpop.permute.xlu0 %1011 }
 0x1e7   :  { %v1274_v10 = vsel %vm1242_vm6, %v1241_v43, %v966_v23  ;;  %v1305_v48 = vsel %vm1275_vm7, %v1272_v47, %v1012_v5 }
 0x1ea   :  { %v1010_v18 = vpop.permute.xlu1 %1009  ;;  %v1056_v14 = vpop.permute.xlu0 %1055 }
 0x1eb   :  { %v1303_v30 = vsel %vm1275_vm7, %v1270_v52, %v1010_v18  ;;  %v1334_v59 = vsel %vm1308_vm8, %v1301_v9, %v1056_v14 }
 0x1ee   :  { %v1014_v37 = vpop.permute.xlu1 %1013  ;;  %v1060_v12 = vpop.permute.xlu0 %1059 }
 0x1ef   :  { %v1307_v46 = vsel %vm1275_vm7, %v1274_v10, %v1014_v37  ;;  %v1338_v53 = vsel %vm1308_vm8, %v1305_v48, %v1060_v12  ;;  %v5003_v12 = vld [vmem:[%s7748_s3 + $0x18] sm:$0xff]   ;;  %v5004_v10 = vld [vmem:[%s7748_s3 + $0x20] ss:$0 sps:$4 sm:$0xff]  }
 0x1f2   :  { %v1058_v29 = vpop.permute.xlu1 %1057 }
 0x1f3   :  { %v1336_v19 = vsel %vm1308_vm8, %v1303_v30, %v1058_v29  ;;  %v5000_v29 = vld [vmem:[%s7748_s3] sm:$0xff]  }
 0x1f4   :  { %v4503_v16 = vcombine.low %v1334_v59, %v1336_v19  ;;  %4689 = vmatprep.subr.bf16.mxu1 %v5000_v29  ;;  %v5002_v19 = vld [vmem:[%s7748_s3 + $0x10] sm:$0xff]  }
 0x1f5   :  { %4690 = vmatpush3.bf16.msra.mxu1 %v5000_v29 }
 0x1f6   :  { %v1062_v40 = vpop.permute.xlu1 %1061  ;;  %4685 = vmatprep.mubr.msk.bf16.mxu0 %vm1408_vm9, %v4503_v16  ;;  %4691 = vmatprep.subr.bf16.mxu1 %v5001_v3 }
 0x1f7   :  { %v1340_v55 = vsel %vm1308_vm8, %v1307_v46, %v1062_v40  ;;  %v2603_v40 = vsel %vm2601_vm10, %v5004_v10, 0 }
 0x1f8   :  { %v4504_v35 = vcombine.low %v1338_v53, %v1340_v55 }
 0x1f9   :  { %4692 = vmatpush3.bf16.msra.mxu1 %v5001_v3 }
 0x1fa   :  { %4686 = vmatmul.mubr.msk.bf16.gmra.mrb[12].mxu0 %vm1408_vm9, %v4504_v35  ;;  %4693 = vmatprep.subr.bf16.mxu1 %v5002_v19 }
 0x1fd   :  { %4694 = vmatpush3.bf16.msra.mxu1 %v5002_v19 }
 0x1fe   :  { %4695 = vmatprep.subr.bf16.mxu1 %v5003_v12 }
 0x201   :  { %4696 = vmatpush3.bf16.msra.mxu1 %v5003_v12 }
 0x202   :  { %4978 = vmatprep.subr.msk.bf16.mxu1 %vm2601_vm10, %v5004_v10 }
 0x205   :  { %4698 = vmatpush3.bf16.msra.mxu1 %v2603_v40 }
 0x211   :  { %v4675_v7 = vpop.f32.mrb[0].mxu0 }
 0x212   :  { %v6129_v15 = vadd.f32 %v4675_v7, %v6126_v51  ;;  %v1471_v27 = vpop.f32.mrb[1].mxu0  ;;  %v6251_v7 = vpop.permute.xlu0 %1856 }
 0x213   :  { %v6132_v50 = vadd.f32 %v6126_v51, %v1471_v27  ;;  %v4676_v62 = vpop.f32.mrb[2].mxu0 }
 0x214   :  { %7781 = vst [vmem:[#allocation6_spill] sm:$0xff] %v6129_v15  ;;  %1537 = vst.msk [vmem:[#allocation3 + $0x50] sm:$0xff] %vm7780_vm1, %v6129_v15  ;;  %v6137_v34 = vadd.f32 %v4676_v62, %v6126_v51  ;;  %v1474_v58 = vpop.f32.mrb[3].mxu0 }
 0x215   :  { %1535 = vst.msk [vmem:[#allocation3 + $0x20] sm:$0xff] %vm7780_vm1, %v6132_v50  ;;  %v6142_v26 = vadd.f32 %v6126_v51, %v1474_v58 }
 0x216   :  { %7782 = vst [vmem:[#allocation7_spill] sm:$0xff] %v6137_v34  ;;  %1538 = vst.msk [vmem:[#allocation3 + $0x68] sm:$0xff] %vm7780_vm1, %v6137_v34 }
 0x217   :  { %7783 = vst [vmem:[#allocation8_spill] sm:$0xff] %v6142_v26  ;;  %1536 = vst.msk [vmem:[#allocation3 + $0x38] sm:$0xff] %vm7780_vm1, %v6142_v26 }
 0x21b   :  { %v1586_v63 = vld [vmem:[#allocation3 + $0x50] sm:$0xff] }
 0x21c   :  { %v1649_v17 = vld [vmem:[#allocation3 + $0x4f] sm:$0xff]  ;;  %v1602_v41 = vpack.c.bf16 %v1586_v63, %v1586_v63  ;;  %v1647_v32 = vld [vmem:[#allocation3 + $0x1f] sm:$0xff]  ;;  %v6257_v63 = vpop.permute.xlu1 %2110 }
 0x21d   :  { %v6148_v0 = vpack.c.bf16 %v1649_v17, %v1649_v17  ;;  %v1618_v39 = vld [vmem:[#allocation3 + $0x51] sm:$0xff]  ;;  %v6158_v21 = vpack.c.bf16 %v1647_v32, %v1647_v32  ;;  %v1679_v57 = vld [vmem:[#allocation3 + $0x20] sm:$0xff]  ;;  %v1778_v18 = vld [vmem:[#allocation3 + $0x68] sm:$0xff]  ;;  %v6259_v17 = vpop.permute.xlu0 %1904 }
 0x21e   :  { %1862 = vrot.lane.b32.xlu1 %v1602_v41, %s5017_s29  ;;  %v1634_v11 = vpack.c.bf16 %v1618_v39, %v1618_v39  ;;  %v1695_v61 = vpack.c.bf16 %v1679_v57, %v1679_v57  ;;  %v1711_v6 = vld [vmem:[#allocation3 + $0x21] sm:$0xff]  ;;  %v1794_v56 = vpack.c.bf16 %v1778_v18, %v1778_v18  ;;  %v1714_v22 = vld [vmem:[#allocation3 + $0x69] sm:$0xff]  ;;  %v1648_v24 = vld [vmem:[#allocation3 + $0x37] sm:$0xff] }
 0x21f   :  { %1956 = vrot.lane.b32.xlu0 %v6148_v0, %s5021_s12  ;;  %v1727_v60 = vpack.c.bf16 %v1711_v6, %v1711_v6  ;;  %v1746_v23 = vld [vmem:[#allocation3 + $0x67] sm:$0xff]  ;;  %v1730_v13 = vpack.c.bf16 %v1714_v22, %v1714_v22  ;;  %v6179_v25 = vpack.c.bf16 %v1648_v24, %v1648_v24  ;;  %v1680_v36 = vld [vmem:[#allocation3 + $0x38] sm:$0xff] }
 0x220   :  { %v6167_v5 = vpack.c.bf16 %v1746_v23, %v1746_v23  ;;  %v1696_v14 = vpack.c.bf16 %v1680_v36, %v1680_v36  ;;  %v1712_v37 = vld [vmem:[#allocation3 + $0x39] sm:$0xff]  ;;  %v6263_v32 = vpop.permute.xlu1 %2158 }
 0x221   :  { %v1728_v4 = vpack.c.bf16 %v1712_v37, %v1712_v37  ;;  %v6265_v57 = vpop.permute.xlu0 %1872 }
 0x222   :  { %1910 = vrot.lane.b32.xlu1 %v1634_v11, %s5019_s21 }
 0x223   :  { %2004 = vrot.lane.b32.xlu0 %v1602_v41, %s5023_s18 }
 0x225   :  { %v6276_v23 = vpop.permute.xlu0 %1920 }
 0x226   :  { %2098 = vrot.lane.b32.xlu1 %v6148_v0, %s5024_s1 }
 0x227   :  { %2052 = vrot.lane.b32.xlu0 %v1634_v11, %s5027_s2 }
 0x22a   :  { %2146 = vrot.lane.b32.xlu1 %v1602_v41, %s5025_s22 }
 0x22b   :  { %1952 = vrot.lane.b32.xlu0 %v6158_v21, %s5021_s12 }
 0x22e   :  { %2194 = vrot.lane.b32.xlu1 %v1634_v11, %s5026_s23 }
 0x22f   :  { %2000 = vrot.lane.b32.xlu0 %v1695_v61, %s5023_s18 }
 0x232   :  { %1858 = vrot.lane.b32.xlu1 %v1695_v61, %s5017_s29 }
 0x233   :  { %2048 = vrot.lane.b32.xlu0 %v1727_v60, %s5027_s2 }
 0x236   :  { %1906 = vrot.lane.b32.xlu1 %v1727_v60, %s5019_s21  ;;  %v6274_v60 = vpop.permute.xlu1 %2206 }
 0x237   :  { %2100 = vrot.lane.b32.xlu0 %v6167_v5, %s5024_s1 }
 0x23a   :  { %1958 = vrot.lane.b32.xlu1 %v6167_v5, %s5021_s12 }
 0x23b   :  { %2148 = vrot.lane.b32.xlu0 %v1794_v56, %s5025_s22 }
 0x23e   :  { %2006 = vrot.lane.b32.xlu1 %v1794_v56, %s5023_s18 }
 0x23f   :  { %1864 = vrot.lane.b32.xlu0 %v1794_v56, %s5017_s29 }
 0x242   :  { %2054 = vrot.lane.b32.xlu1 %v1730_v13, %s5027_s2 }
 0x243   :  { %2196 = vrot.lane.b32.xlu0 %v1730_v13, %s5026_s23 }
 0x246   :  { %1954 = vrot.lane.b32.xlu1 %v6179_v25, %s5021_s12 }
 0x247   :  { %1912 = vrot.lane.b32.xlu0 %v1730_v13, %s5019_s21 }
 0x24a   :  { %2002 = vrot.lane.b32.xlu1 %v1696_v14, %s5023_s18 }
 0x24b   :  { %1860 = vrot.lane.b32.xlu0 %v1696_v14, %s5017_s29 }
 0x24e   :  { %2050 = vrot.lane.b32.xlu1 %v1728_v4, %s5027_s2 }
 0x24f   :  { %1908 = vrot.lane.b32.xlu0 %v1728_v4, %s5019_s21 }
 0x251   :  { %v4679_v44 = vpop.f32.mrb[4].mxu0 }
 0x252   :  { %v6189_v45 = vadd.f32 %v4679_v44, %v6126_v51  ;;  %v1487_v38 = vpop.f32.mrb[5].mxu0 }
 0x253   :  { %2096 = vrot.lane.b32.xlu0 %v6179_v25, %s5024_s1  ;;  %v6194_v20 = vadd.f32 %v6126_v51, %v1487_v38  ;;  %v4680_v1 = vpop.f32.mrb[6].mxu0 }
 0x254   :  { %7784 = vst [vmem:[#allocation9_spill] sm:$0xff] %v6189_v45  ;;  %1541 = vst.msk [vmem:[#allocation3 + $0xb0] sm:$0xff] %vm7780_vm1, %v6189_v45  ;;  %v6199_v31 = vadd.f32 %v4680_v1, %v6126_v51  ;;  %v1490_v33 = vpop.f32.mrb[7].mxu0 }
 0x255   :  { %7785 = vst [vmem:[#allocation10_spill] sm:$0xff] %v6194_v20  ;;  %1539 = vst.msk [vmem:[#allocation3 + $0x80] sm:$0xff] %vm7780_vm1, %v6194_v20  ;;  %v6204_v49 = vadd.f32 %v6126_v51, %v1490_v33 }
 0x256   :  { %7786 = vst [vmem:[#allocation11_spill] sm:$0xff] %v6199_v31  ;;  %1542 = vst.msk [vmem:[#allocation3 + $0xc8] sm:$0xff] %vm7780_vm1, %v6199_v31 }
 0x257   :  { %7787 = vst [vmem:[#allocation12_spill] sm:$0xff] %v6204_v49  ;;  %2144 = vrot.lane.b32.xlu0 %v1696_v14, %s5025_s22  ;;  %1540 = vst.msk [vmem:[#allocation3 + $0x98] sm:$0xff] %vm7780_vm1, %v6204_v49 }
 0x25b   :  { %2192 = vrot.lane.b32.xlu0 %v1728_v4, %s5026_s23  ;;  %v1590_v52 = vld [vmem:[#allocation3 + $0xb0] sm:$0xff] }
 0x25c   :  { %v1653_v54 = vld [vmem:[#allocation3 + $0xaf] sm:$0xff]  ;;  %v1606_v8 = vpack.c.bf16 %v1590_v52, %v1590_v52  ;;  %v1651_v59 = vld [vmem:[#allocation3 + $0x7f] sm:$0xff] }
 0x25d   :  { %v6212_v9 = vpack.c.bf16 %v1653_v54, %v1653_v54  ;;  %v1622_v30 = vld [vmem:[#allocation3 + $0xb1] sm:$0xff]  ;;  %v6231_v42 = vpack.c.bf16 %v1651_v59, %v1651_v59  ;;  %v1683_v43 = vld [vmem:[#allocation3 + $0x80] sm:$0xff]  ;;  %v1782_v55 = vld [vmem:[#allocation3 + $0xc8] sm:$0xff] }
 0x25e   :  { %1870 = vrot.lane.b32.xlu1 %v1606_v8, %s5017_s29  ;;  %v1638_v28 = vpack.c.bf16 %v1622_v30, %v1622_v30  ;;  %v1699_v16 = vpack.c.bf16 %v1683_v43, %v1683_v43  ;;  %v1715_v47 = vld [vmem:[#allocation3 + $0x81] sm:$0xff]  ;;  %v1798_v35 = vpack.c.bf16 %v1782_v55, %v1782_v55  ;;  %v1814_v27 = vld [vmem:[#allocation3 + $0xc9] sm:$0xff]  ;;  %v1589_v58 = vld [vmem:[#allocation3 + $0x98] sm:$0xff] }
 0x25f   :  { %1964 = vrot.lane.b32.xlu0 %v6212_v9, %s5021_s12  ;;  %v1731_v48 = vpack.c.bf16 %v1715_v47, %v1715_v47  ;;  %v1750_v46 = vld [vmem:[#allocation3 + $0xc7] sm:$0xff]  ;;  %v1830_v62 = vpack.c.bf16 %v1814_v27, %v1814_v27  ;;  %v1605_v41 = vpack.c.bf16 %v1589_v58, %v1589_v58  ;;  %v1621_v39 = vld [vmem:[#allocation3 + $0x99] sm:$0xff] }
 0x260   :  { %v1766_v53 = vpack.c.bf16 %v1750_v46, %v1750_v46  ;;  %v1637_v11 = vpack.c.bf16 %v1621_v39, %v1621_v39  ;;  %v1748_v61 = vld [vmem:[#allocation3 + $0x97] sm:$0xff] }
 0x261   :  { %v6269_v6 = vpack.c.bf16 %v1748_v61, %v1748_v61 }
 0x262   :  { %1918 = vrot.lane.b32.xlu1 %v1638_v28, %s5019_s21 }
 0x263   :  { %2012 = vrot.lane.b32.xlu0 %v1606_v8, %s5023_s18 }
 0x266   :  { %2106 = vrot.lane.b32.xlu1 %v6212_v9, %s5024_s1 }
 0x267   :  { %2060 = vrot.lane.b32.xlu0 %v1638_v28, %s5027_s2 }
 0x26a   :  { %2154 = vrot.lane.b32.xlu1 %v1606_v8, %s5025_s22 }
 0x26b   :  { %1960 = vrot.lane.b32.xlu0 %v6231_v42, %s5021_s12 }
 0x26e   :  { %2202 = vrot.lane.b32.xlu1 %v1638_v28, %s5026_s23 }
 0x26f   :  { %2008 = vrot.lane.b32.xlu0 %v1699_v16, %s5023_s18 }
 0x272   :  { %2102 = vrot.lane.b32.xlu1 %v6231_v42, %s5024_s1 }
 0x273   :  { %2056 = vrot.lane.b32.xlu0 %v1731_v48, %s5027_s2 }
 0x276   :  { %2150 = vrot.lane.b32.xlu1 %v1699_v16, %s5025_s22 }
 0x277   :  { %2108 = vrot.lane.b32.xlu0 %v1766_v53, %s5024_s1 }
 0x27a   :  { %1866 = vrot.lane.b32.xlu1 %v1699_v16, %s5017_s29 }
 0x27b   :  { %2156 = vrot.lane.b32.xlu0 %v1798_v35, %s5025_s22 }
 0x27e   :  { %2198 = vrot.lane.b32.xlu1 %v1731_v48, %s5026_s23 }
 0x27f   :  { %2204 = vrot.lane.b32.xlu0 %v1830_v62, %s5026_s23 }
 0x282   :  { %1914 = vrot.lane.b32.xlu1 %v1731_v48, %s5019_s21 }
 0x283   :  { %1868 = vrot.lane.b32.xlu0 %v1605_v41, %s5017_s29 }
 0x286   :  { %1966 = vrot.lane.b32.xlu1 %v1766_v53, %s5021_s12 }
 0x287   :  { %1916 = vrot.lane.b32.xlu0 %v1637_v11, %s5019_s21 }
 0x28a   :  { %2014 = vrot.lane.b32.xlu1 %v1798_v35, %s5023_s18 }
 0x28b   :  { %2104 = vrot.lane.b32.xlu0 %v6269_v6, %s5024_s1 }
 0x28e   :  { %2062 = vrot.lane.b32.xlu1 %v1830_v62, %s5027_s2 }
 0x28f   :  { %2152 = vrot.lane.b32.xlu0 %v1605_v41, %s5025_s22 }
 0x290   :  { %v6280_v18 = vpop.permute.xlu1 %1862 }
 0x291   :  { %v6282_v56 = vpop.permute.xlu0 %1956  ;;  %v4683_v22 = vpop.f32.mrb[8].mxu0 }
 0x292   :  { %v6285_v13 = vadd.f32 %v4683_v22, %v6126_v51  ;;  %1962 = vrot.lane.b32.xlu1 %v6269_v6, %s5021_s12  ;;  %v1503_v24 = vpop.f32.mrb[9].mxu0 }
 0x293   :  { %2200 = vrot.lane.b32.xlu0 %v1637_v11, %s5026_s23  ;;  %v6291_v36 = vadd.f32 %v6126_v51, %v1503_v24  ;;  %v4684_v14 = vpop.f32.mrb[10].mxu0 }
 0x294   :  { %7788 = vst [vmem:[#allocation13_spill] sm:$0xff] %v6285_v13  ;;  %1545 = vst.msk [vmem:[#allocation3 + $0x140] sm:$0xff] %vm7780_vm1, %v6285_v13  ;;  %v6296_v37 = vadd.f32 %v4684_v14, %v6126_v51  ;;  %v6298_v4 = vpop.permute.xlu1 %1910  ;;  %v1506_v44 = vpop.f32.mrb[11].mxu0 }
 0x295   :  { %7789 = vst [vmem:[#allocation14_spill] sm:$0xff] %v6291_v36  ;;  %1543 = vst.msk [vmem:[#allocation3 + $0x110] sm:$0xff] %vm7780_vm1, %v6291_v36  ;;  %v6303_v38 = vadd.f32 %v6126_v51, %v1506_v44  ;;  %v6305_v1 = vpop.permute.xlu0 %2004 }
 0x296   :  { %7790 = vst [vmem:[#allocation15_spill] sm:$0xff] %v6296_v37  ;;  %1546 = vst.msk [vmem:[#allocation3 + $0x158] sm:$0xff] %vm7780_vm1, %v6296_v37  ;;  %2010 = vrot.lane.b32.xlu1 %v1605_v41, %s5023_s18 }
 0x297   :  { %7791 = vst [vmem:[#allocation16_spill] sm:$0xff] %v6303_v38  ;;  %1544 = vst.msk [vmem:[#allocation3 + $0x128] sm:$0xff] %vm7780_vm1, %v6303_v38 }
 0x298   :  { %v6312_v33 = vpop.permute.xlu1 %2098 }
 0x299   :  { %v6314_v52 = vpop.permute.xlu0 %2052 }
 0x29a   :  { %2058 = vrot.lane.b32.xlu1 %v1637_v11, %s5027_s2 }
 0x29b   :  { %v1594_v54 = vld [vmem:[#allocation3 + $0x140] sm:$0xff] }
 0x29c   :  { %v1657_v8 = vld [vmem:[#allocation3 + $0x13f] sm:$0xff]  ;;  %v6317_v30 = vpop.permute.xlu1 %2146  ;;  %v1610_v29 = vpack.c.bf16 %v1594_v54, %v1594_v54  ;;  %v1655_v10 = vld [vmem:[#allocation3 + $0x10f] sm:$0xff] }
 0x29d   :  { %v6319_v28 = vpack.c.bf16 %v1657_v8, %v1657_v8  ;;  %v6321_v3 = vpop.permute.xlu0 %1952  ;;  %v1626_v59 = vld [vmem:[#allocation3 + $0x141] sm:$0xff]  ;;  %v6341_v46 = vpack.c.bf16 %v1655_v10, %v1655_v10  ;;  %v1592_v53 = vld [vmem:[#allocation3 + $0x110] sm:$0xff]  ;;  %v1690_v14 = vld [vmem:[#allocation3 + $0x158] sm:$0xff] }
 0x29e   :  { %1878 = vrot.lane.b32.xlu1 %v1610_v29, %s5017_s29  ;;  %v6328_v43 = vpack.c.bf16 %v1626_v59, %v1626_v59  ;;  %v1608_v35 = vpack.c.bf16 %v1592_v53, %v1592_v53  ;;  %v1624_v62 = vld [vmem:[#allocation3 + $0x111] sm:$0xff]  ;;  %v6370_v54 = vpack.c.bf16 %v1690_v14, %v1690_v14  ;;  %v1593_v59 = vld [vmem:[#allocation3 + $0x128] sm:$0xff] }
 0x29f   :  { %1972 = vrot.lane.b32.xlu0 %v6319_v28, %s5021_s12  ;;  %v1640_v41 = vpack.c.bf16 %v1624_v62, %v1624_v62  ;;  %v1658_v11 = vld [vmem:[#allocation3 + $0x157] sm:$0xff]  ;;  %v1551_v10 = vld [vmem:[#allocation3 + $0x7] sm:$0xff]  ;;  %v1609_v62 = vpack.c.bf16 %v1593_v59, %v1593_v59 }
 0x2a0   :  { %v6326_v19 = vpop.permute.xlu1 %2194  ;;  %v6362_v22 = vpack.c.bf16 %v1658_v11, %v1658_v11  ;;  %v1656_v11 = vld [vmem:[#allocation3 + $0x127] sm:$0xff]  ;;  %v1567_v2 = vpack.c.bf16 %v1551_v10, %v1551_v10 }
 0x2a1   :  { %v6330_v12 = vpop.permute.xlu0 %2000  ;;  %v1625_v14 = vld [vmem:[#allocation3 + $0x129] sm:$0xff]  ;;  %v6385_v37 = vpack.c.bf16 %v1656_v11, %v1656_v11 }
 0x2a2   :  { %1926 = vrot.lane.b32.xlu1 %v6328_v43, %s5019_s21  ;;  %v1641_v13 = vpack.c.bf16 %v1625_v14, %v1625_v14  ;;  %v2226_v31 = vsel %vm7780_vm1, %v1567_v2, %v6251_v7 }
 0x2a3   :  { %2020 = vrot.lane.b32.xlu0 %v1610_v29, %s5023_s18 }
 0x2a4   :  { %v1859_v16 = vpop.permute.xlu1 %1858 }
 0x2a5   :  { %v6335_v47 = vpop.permute.xlu0 %2048  ;;  %v2229_v38 = vsel %vm7780_vm1, %v6158_v21, %v1859_v16 }
 0x2a6   :  { %2114 = vrot.lane.b32.xlu1 %v6319_v28, %s5024_s1 }
 0x2a7   :  { %2068 = vrot.lane.b32.xlu0 %v6328_v43, %s5027_s2 }
 0x2a8   :  { %v1907_v48 = vpop.permute.xlu1 %1906 }
 0x2a9   :  { %v6343_v40 = vpop.permute.xlu0 %2100 }
 0x2aa   :  { %2162 = vrot.lane.b32.xlu1 %v1610_v29, %s5025_s22  ;;  %v1722_v29 = vld [vmem:[#allocation3 + $0x159] sm:$0xff] }
 0x2ab   :  { %1968 = vrot.lane.b32.xlu0 %v6341_v46, %s5021_s12 }
 0x2ac   :  { %v6348_v55 = vpop.permute.xlu1 %1958 }
 0x2ad   :  { %v6350_v27 = vpop.permute.xlu0 %2148 }
 0x2ae   :  { %1874 = vrot.lane.b32.xlu1 %v1608_v35, %s5017_s29 }
 0x2af   :  { %2016 = vrot.lane.b32.xlu0 %v1608_v35, %s5023_s18  ;;  %v6378_v35 = vpack.c.bf16 %v1722_v29, %v1722_v29  ;;  %v2275_v29 = vsel %vm1176_vm4, %v2229_v38, %v1907_v48  ;;  %v2273_v38 = vsel %vm1176_vm4, %v2226_v31, %v6259_v17 }
 0x2b0   :  { %v6354_v58 = vpop.permute.xlu1 %2006  ;;  %v2305_v7 = vsel %vm1242_vm6, %v2273_v38, %v6321_v3 }
 0x2b1   :  { %v6356_v39 = vpop.permute.xlu0 %1864 }
 0x2b2   :  { %1922 = vrot.lane.b32.xlu1 %v1640_v41, %s5019_s21 }
 0x2b3   :  { %2064 = vrot.lane.b32.xlu0 %v1640_v41, %s5027_s2 }
 0x2b4   :  { %v6360_v61 = vpop.permute.xlu1 %2054 }
 0x2b5   :  { %v6364_v24 = vpop.permute.xlu0 %2196 }
 0x2b6   :  { %1974 = vrot.lane.b32.xlu1 %v6362_v22, %s5021_s12 }
 0x2b7   :  { %2116 = vrot.lane.b32.xlu0 %v6362_v22, %s5024_s1 }
 0x2b8   :  { %v1955_v44 = vpop.permute.xlu1 %1954 }
 0x2b9   :  { %v6372_v8 = vpop.permute.xlu0 %1912  ;;  %v2307_v10 = vsel %vm1242_vm6, %v2275_v29, %v1955_v44  ;;  %v2337_v44 = vsel %vm1308_vm8, %v2305_v7, %v6330_v12 }
 0x2ba   :  { %2022 = vrot.lane.b32.xlu1 %v6370_v54, %s5023_s18  ;;  %v2370_v31 = vsel %vm2368_vm11, %v2337_v44, %v6335_v47 }
 0x2bb   :  { %2164 = vrot.lane.b32.xlu0 %v6370_v54, %s5025_s22 }
 0x2bc   :  { %v2003_v53 = vpop.permute.xlu1 %2002 }
 0x2bd   :  { %v6380_v41 = vpop.permute.xlu0 %1860  ;;  %v2339_v11 = vsel %vm1308_vm8, %v2307_v10, %v2003_v53 }
 0x2be   :  { %2070 = vrot.lane.b32.xlu1 %v6378_v35, %s5027_s2 }
 0x2bf   :  { %1876 = vrot.lane.b32.xlu0 %v1609_v62, %s5017_s29 }
 0x2c0   :  { %v2051_v59 = vpop.permute.xlu1 %2050 }
 0x2c1   :  { %v6389_v36 = vpop.permute.xlu0 %1908  ;;  %v2372_v21 = vsel %vm2368_vm11, %v2339_v11, %v2051_v59 }
 0x2c2   :  { %1970 = vrot.lane.b32.xlu1 %v6385_v37, %s5021_s12  ;;  %v2405_v2 = vsel %vm2401_vm12, %v2372_v21, %v6312_v33 }
 0x2c3   :  { %1924 = vrot.lane.b32.xlu0 %v1641_v13, %s5019_s21  ;;  %v2438_v17 = vsel %vm2434_vm13, %v2405_v2, %v6317_v30 }
 0x2c4   :  { %v2471_v30 = vsel %vm2467_vm14, %v2438_v17, %v6326_v19 }
 0x2c5   :  { %v2097_v16 = vpop.permute.xlu0 %2096 }
 0x2c6   :  { %2018 = vrot.lane.b32.xlu1 %v1609_v62, %s5023_s18  ;;  %v2403_v33 = vsel %vm2401_vm12, %v2370_v31, %v2097_v16 }
 0x2c7   :  { %2112 = vrot.lane.b32.xlu0 %v6385_v37, %s5024_s1 }
 0x2c9   :  { %v2145_v48 = vpop.permute.xlu0 %2144 }
 0x2ca   :  { %2066 = vrot.lane.b32.xlu1 %v1641_v13, %s5027_s2  ;;  %v2436_v53 = vsel %vm2434_vm13, %v2403_v33, %v2145_v48 }
 0x2cb   :  { %2160 = vrot.lane.b32.xlu0 %v1609_v62, %s5025_s22 }
 0x2cd   :  { %v2193_v3 = vpop.permute.xlu0 %2192  ;;  %v4687_v14 = vpop.f32.mrb[12].mxu0 }
 0x2ce   :  { %v2469_v29 = vsel %vm2467_vm14, %v2436_v53, %v2193_v3  ;;  %v6421_v12 = vadd.f32 %v4687_v14, %v6126_v51  ;;  %2210 = vrot.lane.b32.xlu1 %v6328_v43, %s5026_s23  ;;  %v1519_v47 = vpop.f32.mrb[13].mxu0  ;;  %v2232_v3 = vsel %vm7780_vm1, %v6179_v25, %v6380_v41 }
 0x2cf   :  { %2208 = vrot.lane.b32.xlu0 %v1641_v13, %s5026_s23  ;;  %v6429_v62 = vadd.f32 %v6126_v51, %v1519_v47  ;;  %v4688_v59 = vpop.f32.mrb[14].mxu0  ;;  %v4516_v10 = vcombine.low %v2469_v29, %v2471_v30  ;;  %v2277_v14 = vsel %vm1176_vm4, %v2232_v3, %v6389_v36 }
 0x2d0   :  { %7792 = vst [vmem:[#allocation17_spill] sm:$0xff] %v6421_v12  ;;  %1549 = vst.msk [vmem:[#allocation3 + $0x1a0] sm:$0xff] %vm7780_vm1, %v6421_v12  ;;  %v6434_v11 = vadd.f32 %v4688_v59, %v6126_v51  ;;  %v6436_v21 = vpop.permute.xlu1 %1870  ;;  %v1522_v43 = vpop.f32.mrb[15].mxu0  ;;  %v2309_v59 = vsel %vm1242_vm6, %v2277_v14, %v6282_v56  ;;  %v2235_v14 = vsel %vm7780_vm1, %v6148_v0, %v6280_v18 }
 0x2d1   :  { %7793 = vst [vmem:[#allocation18_spill] sm:$0xff] %v6429_v62  ;;  %1547 = vst.msk [vmem:[#allocation3 + $0x170] sm:$0xff] %vm7780_vm1, %v6429_v62  ;;  %v6441_v13 = vadd.f32 %v6126_v51, %v1522_v43  ;;  %4699 = vmatprep.mubr.msk.bf16.mxu1 %vm7766_vm15, %v4516_v10  ;;  %v6444_v19 = vpop.permute.xlu0 %1964  ;;  %v2341_v36 = vsel %vm1308_vm8, %v2309_v59, %v6305_v1 }
 0x2d2   :  { %7794 = vst [vmem:[#allocation19_spill] sm:$0xff] %v6434_v11  ;;  %1550 = vst.msk [vmem:[#allocation3 + $0x1b8] sm:$0xff] %vm7780_vm1, %v6434_v11  ;;  %v2374_v56 = vsel %vm2368_vm11, %v2341_v36, %v6314_v52 }
 0x2d3   :  { %7795 = vst [vmem:[#allocation20_spill] sm:$0xff] %v6441_v13  ;;  %1880 = vrot.lane.b32.xlu0 %v6370_v54, %s5017_s29  ;;  %1548 = vst.msk [vmem:[#allocation3 + $0x188] sm:$0xff] %vm7780_vm1, %v6441_v13  ;;  %v2407_v59 = vsel %vm2401_vm12, %v2374_v56, %v6343_v40 }
 0x2d4   :  { %v6452_v16 = vpop.permute.xlu1 %1918  ;;  %v2440_v18 = vsel %vm2434_vm13, %v2407_v59, %v6350_v27 }
 0x2d5   :  { %v6454_v38 = vpop.permute.xlu0 %2012 }
 0x2d7   :  { %2212 = vrot.lane.b32.xlu0 %v6378_v35, %s5026_s23 }
 0x2d8   :  { %v6458_v51 = vpop.permute.xlu1 %2106  ;;  %v1755_v2 = vld [vmem:[#allocation3 + $0x16f] sm:$0xff] }
 0x2d9   :  { %v6460_v7 = vpop.permute.xlu0 %2060  ;;  %v6462_v48 = vpack.c.bf16 %v1755_v2, %v1755_v2  ;;  %v1787_v31 = vld [vmem:[#allocation3 + $0x170] sm:$0xff] }
 0x2da   :  { %v1597_v44 = vld [vmem:[#allocation3 + $0x188] sm:$0xff]  ;;  %v1803_v53 = vpack.c.bf16 %v1787_v31, %v1787_v31  ;;  %v1819_v10 = vld [vmem:[#allocation3 + $0x171] sm:$0xff]  ;;  %v1661_v31 = vld [vmem:[#allocation3 + $0x19f] sm:$0xff] }
 0x2db   :  { %2118 = vrot.lane.b32.xlu1 %v6462_v48, %s5024_s1  ;;  %v6466_v54 = vpack.c.bf16 %v1597_v44, %v1597_v44  ;;  %v1629_v47 = vld [vmem:[#allocation3 + $0x189] sm:$0xff]  ;;  %v1835_v2 = vpack.c.bf16 %v1819_v10, %v1819_v10  ;;  %v1598_v44 = vld [vmem:[#allocation3 + $0x1a0] sm:$0xff]  ;;  %v6513_v52 = vpack.c.bf16 %v1661_v31, %v1661_v31  ;;  %v1662_v59 = vld [vmem:[#allocation3 + $0x1b7] sm:$0xff] }
 0x2dc   :  { %v6468_v17 = vpop.permute.xlu1 %2154  ;;  %v6489_v25 = vpack.c.bf16 %v1629_v47, %v1629_v47  ;;  %v6504_v1 = vpack.c.bf16 %v1598_v44, %v1598_v44  ;;  %v2279_v47 = vsel %vm1176_vm4, %v2235_v14, %v6298_v4  ;;  %v1630_v4 = vld [vmem:[#allocation3 + $0x1a1] sm:$0xff] }
 0x2dd   :  { %v6470_v33 = vpop.permute.xlu0 %1960  ;;  %1884 = vrot.lane.b32.xlu0 %v6466_v54, %s5017_s29  ;;  %v2311_v10 = vsel %vm1242_vm6, %v2279_v47, %v6348_v55  ;;  %v1660_v47 = vld [vmem:[#allocation3 + $0x187] sm:$0xff] }
 0x2de   :  { %v2343_v44 = vsel %vm1308_vm8, %v2311_v10, %v6354_v58  ;;  %v2473_v58 = vsel %vm2467_vm14, %v2440_v18, %v6364_v24  ;;  %v6545_v24 = vpack.c.bf16 %v1660_v47, %v1660_v47  ;;  %v1678_v10 = vpack.c.bf16 %v1662_v59, %v1662_v59 }
 0x2df   :  { %2166 = vrot.lane.b32.xlu1 %v1803_v53, %s5025_s22  ;;  %v2376_v0 = vsel %vm2368_vm11, %v2343_v44, %v6360_v61  ;;  %v6538_v61 = vpack.c.bf16 %v1630_v4, %v1630_v4  ;;  %v1694_v4 = vld [vmem:[#allocation3 + $0x1b8] sm:$0xff] }
 0x2e0   :  { %v6480_v29 = vpop.permute.xlu1 %2202 }
 0x2e1   :  { %v6482_v30 = vpop.permute.xlu0 %2008  ;;  %1928 = vrot.lane.b32.xlu0 %v6378_v35, %s5019_s21 }
 0x2e3   :  { %1882 = vrot.lane.b32.xlu1 %v1803_v53, %s5017_s29 }
 0x2e4   :  { %v2103_v41 = vpop.permute.xlu1 %2102 }
 0x2e5   :  { %v6493_v43 = vpop.permute.xlu0 %2056  ;;  %1932 = vrot.lane.b32.xlu0 %v6489_v25, %s5019_s21  ;;  %v2409_v40 = vsel %vm2401_vm12, %v2376_v0, %v2103_v41 }
 0x2e7   :  { %2214 = vrot.lane.b32.xlu1 %v1835_v2, %s5026_s23 }
 0x2e8   :  { %v2151_v35 = vpop.permute.xlu1 %2150 }
 0x2e9   :  { %v6500_v3 = vpop.permute.xlu0 %2108  ;;  %1976 = vrot.lane.b32.xlu0 %v6462_v48, %s5021_s12  ;;  %v2442_v55 = vsel %vm2434_vm13, %v2409_v40, %v2151_v35 }
 0x2eb   :  { %1886 = vrot.lane.b32.xlu1 %v6504_v1, %s5017_s29 }
 0x2ec   :  { %v1867_v36 = vpop.permute.xlu1 %1866 }
 0x2ed   :  { %v6521_v11 = vpop.permute.xlu0 %2156  ;;  %1980 = vrot.lane.b32.xlu0 %v6513_v52, %s5021_s12 }
 0x2ef   :  { %1930 = vrot.lane.b32.xlu1 %v1835_v2, %s5019_s21 }
 0x2f0   :  { %v2199_v56 = vpop.permute.xlu1 %2198 }
 0x2f1   :  { %v2475_v31 = vsel %vm2467_vm14, %v2442_v55, %v2199_v56  ;;  %v6535_v14 = vpop.permute.xlu0 %2204  ;;  %2024 = vrot.lane.b32.xlu0 %v1803_v53, %s5023_s18 }
 0x2f2   :  { %v4517_v27 = vcombine.low %v2473_v58, %v2475_v31  ;;  %v2247_v58 = vsel %vm7780_vm1, %v6212_v9, %v6436_v21 }
 0x2f3   :  { %1934 = vrot.lane.b32.xlu1 %v6538_v61, %s5019_s21 }
 0x2f4   :  { %v1915_v41 = vpop.permute.xlu1 %1914  ;;  %4700 = vmatmul.mubr.msk.bf16.vlgmr.msra.gmra.mrb[0].mxu1 %vm7766_vm15, %v4517_v27 }
 0x2f5   :  { %v1869_v35 = vpop.permute.xlu0 %1868  ;;  %2028 = vrot.lane.b32.xlu0 %v6504_v1, %s5023_s18 }
 0x2f6   :  { %v2244_v18 = vsel %vm7780_vm1, %v6269_v6, %v1869_v35  ;;  %v2287_v6 = vsel %vm1176_vm4, %v2247_v58, %v6452_v16 }
 0x2f7   :  { %1978 = vrot.lane.b32.xlu1 %v6545_v24, %s5021_s12 }
 0x2f8   :  { %v1967_v53 = vpop.permute.xlu1 %1966 }
 0x2f9   :  { %2072 = vrot.lane.b32.xlu0 %v1835_v2, %s5027_s2  ;;  %v1917_v44 = vpop.permute.xlu0 %1916  ;;  %v1710_v2 = vpack.c.bf16 %v1694_v4, %v1694_v4  ;;  %v2319_v27 = vsel %vm1242_vm6, %v2287_v6, %v1967_v53  ;;  %v2238_v53 = vsel %vm7780_vm1, %v6167_v5, %v6356_v39 }
 0x2fa   :  { %v2285_v40 = vsel %vm1176_vm4, %v2244_v18, %v1917_v44  ;;  %v1726_v44 = vld [vmem:[#allocation3 + $0x1b9] sm:$0xff]  ;;  %v2281_v18 = vsel %vm1176_vm4, %v2238_v53, %v6372_v8 }
 0x2fb   :  { %1982 = vrot.lane.b32.xlu1 %v1678_v10, %s5021_s12  ;;  %v2317_v31 = vsel %vm1242_vm6, %v2285_v40, %v6444_v19  ;;  %v2313_v4 = vsel %vm1242_vm6, %v2281_v18, %v6470_v33 }
 0x2fc   :  { %v2015_v0 = vpop.permute.xlu1 %2014  ;;  %v2349_v35 = vsel %vm1308_vm8, %v2317_v31, %v6454_v38  ;;  %v2241_v38 = vsel %vm7780_vm1, %v6231_v42, %v1867_v36 }
 0x2fd   :  { %2076 = vrot.lane.b32.xlu0 %v6538_v61, %s5027_s2  ;;  %v2105_v55 = vpop.permute.xlu0 %2104  ;;  %v2351_v59 = vsel %vm1308_vm8, %v2319_v27, %v2015_v0  ;;  %v2382_v19 = vsel %vm2368_vm11, %v2349_v35, %v6460_v7  ;;  %v1742_v0 = vpack.c.bf16 %v1726_v44, %v1726_v44  ;;  %v2283_v7 = vsel %vm1176_vm4, %v2241_v38, %v1915_v41  ;;  %v1759_v41 = vld [vmem:[#allocation3 + $0x1cf] sm:$0xff] }
 0x2fe   :  { %v2415_v5 = vsel %vm2401_vm12, %v2382_v19, %v6500_v3 }
 0x2ff   :  { %2026 = vrot.lane.b32.xlu1 %v6466_v54, %s5023_s18 }
 0x300   :  { %v2063_v56 = vpop.permute.xlu1 %2062 }
 0x301   :  { %2120 = vrot.lane.b32.xlu0 %v6545_v24, %s5024_s1  ;;  %v2384_v9 = vsel %vm2368_vm11, %v2351_v59, %v2063_v56  ;;  %v2153_v21 = vpop.permute.xlu0 %2152 }
 0x303   :  { %2030 = vrot.lane.b32.xlu1 %v1710_v2, %s5023_s18 }
 0x304   :  { %v1963_v47 = vpop.permute.xlu1 %1962 }
 0x305   :  { %2124 = vrot.lane.b32.xlu0 %v1678_v10, %s5024_s1  ;;  %v2417_v10 = vsel %vm2401_vm12, %v2384_v9, %v6257_v63  ;;  %v2315_v42 = vsel %vm1242_vm6, %v2283_v7, %v1963_v47  ;;  %v2345_v63 = vsel %vm1308_vm8, %v2313_v4, %v6482_v30 }
 0x306   :  { %v2450_v39 = vsel %vm2434_vm13, %v2417_v10, %v6263_v32  ;;  %v2378_v33 = vsel %vm2368_vm11, %v2345_v63, %v6493_v43  ;;  %v2448_v32 = vsel %vm2434_vm13, %v2415_v5, %v6521_v11  ;;  %v6615_v43 = vpack.c.bf16 %v1759_v41, %v1759_v41  ;;  %v1559_v5 = vld [vmem:[#allocation3 + $0xf7] sm:$0xff] }
 0x307   :  { %2074 = vrot.lane.b32.xlu1 %v6489_v25, %s5027_s2  ;;  %v2411_v40 = vsel %vm2401_vm12, %v2378_v33, %v2105_v55  ;;  %v2481_v6 = vsel %vm2467_vm14, %v2448_v32, %v6535_v14 }
 0x308   :  { %v2011_v16 = vpop.permute.xlu1 %2010  ;;  %v2444_v56 = vsel %vm2434_vm13, %v2411_v40, %v2153_v21  ;;  %v1823_v21 = vld [vmem:[#allocation3 + $0x1d1] sm:$0xff] }
 0x309   :  { %2168 = vrot.lane.b32.xlu0 %v6466_v54, %s5025_s22  ;;  %v2201_v54 = vpop.permute.xlu0 %2200  ;;  %v2347_v8 = vsel %vm1308_vm8, %v2315_v42, %v2011_v16  ;;  %v1839_v44 = vpack.c.bf16 %v1823_v21, %v1823_v21  ;;  %v1575_v42 = vpack.c.bf16 %v1559_v5, %v1559_v5 }
 0x30a   :  { %v2477_v55 = vsel %vm2467_vm14, %v2444_v56, %v2201_v54 }
 0x30b   :  { %2078 = vrot.lane.b32.xlu1 %v1742_v0, %s5027_s2 }
 0x30c   :  { %v2059_v36 = vpop.permute.xlu1 %2058 }
 0x30d   :  { %v2380_v3 = vsel %vm2368_vm11, %v2347_v8, %v2059_v36  ;;  %2172 = vrot.lane.b32.xlu0 %v1710_v2, %s5025_s22  ;;  %v2483_v2 = vsel %vm2467_vm14, %v2450_v39, %v6274_v60 }
 0x30e   :  { %v2413_v30 = vsel %vm2401_vm12, %v2380_v3, %v6458_v51  ;;  %v4519_v27 = vcombine.low %v2481_v6, %v2483_v2 }
 0x30f   :  { %v2446_v58 = vsel %vm2434_vm13, %v2413_v30, %v6468_v17  ;;  %2122 = vrot.lane.b32.xlu1 %v6513_v52, %s5024_s1 }
 0x310   :  { %v6620_v31 = vpop.permute.xlu1 %1878  ;;  %v2479_v11 = vsel %vm2467_vm14, %v2446_v58, %v6480_v29  ;;  %v1791_v29 = vld [vmem:[#allocation3 + $0x1d0] sm:$0xff] }
 0x311   :  { %v6622_v51 = vpop.permute.xlu0 %1972  ;;  %2216 = vrot.lane.b32.xlu0 %v6489_v25, %s5026_s23  ;;  %v4518_v17 = vcombine.low %v2477_v55, %v2479_v11  ;;  %v6641_v25 = vpack.c.bf16 %v1791_v29, %v1791_v29 }
 0x313   :  { %2126 = vrot.lane.b32.xlu1 %v6615_v43, %s5024_s1  ;;  %4703 = vmatprep.mubr.msk.bf16.mxu1 %vm7766_vm15, %v4518_v17 }
 0x314   :  { %v6633_v60 = vpop.permute.xlu1 %1926  ;;  %4704 = vmatmul.mubr.msk.bf16.gmra.mrb[4].mxu1 %vm7766_vm15, %v4519_v27 }
 0x315   :  { %v6636_v47 = vpop.permute.xlu0 %2020  ;;  %2220 = vrot.lane.b32.xlu0 %v1742_v0, %s5026_s23 }
 0x317   :  { %2170 = vrot.lane.b32.xlu1 %v6504_v1, %s5025_s22 }
 0x318   :  { %v2115_v14 = vpop.permute.xlu1 %2114 }
 0x319   :  { %v2069_v35 = vpop.permute.xlu0 %2068 }
 0x31b   :  { %2174 = vrot.lane.b32.xlu1 %v6641_v25, %s5025_s22 }
 0x31c   :  { %v2163_v59 = vpop.permute.xlu1 %2162 }
 0x31d   :  { %v1969_v9 = vpop.permute.xlu0 %1968 }
 0x31f   :  { %2218 = vrot.lane.b32.xlu1 %v6538_v61, %s5026_s23  ;;  %v2250_v61 = vsel %vm7780_vm1, %v1575_v42, %v6265_v57 }
 0x320   :  { %v1875_v19 = vpop.permute.xlu1 %1874  ;;  %v2289_v33 = vsel %vm1176_vm4, %v2250_v61, %v6276_v23 }
 0x321   :  { %v2017_v16 = vpop.permute.xlu0 %2016  ;;  %v2253_v36 = vsel %vm7780_vm1, %v6341_v46, %v1875_v19  ;;  %v2321_v40 = vsel %vm1242_vm6, %v2289_v33, %v1969_v9 }
 0x322   :  { %v2353_v57 = vsel %vm1308_vm8, %v2321_v40, %v2017_v16 }
 0x323   :  { %2222 = vrot.lane.b32.xlu1 %v1839_v44, %s5026_s23 }
 0x324   :  { %v1923_v53 = vpop.permute.xlu1 %1922 }
 0x325   :  { %v2065_v1 = vpop.permute.xlu0 %2064  ;;  %v2291_v41 = vsel %vm1176_vm4, %v2253_v36, %v1923_v53  ;;  %v7769_v53 = vmov 0.0|0.0  }
 0x326   :  { %v2386_v2 = vsel %vm2368_vm11, %v2353_v57, %v2065_v1  ;;  %4881 = vmatprep.subr.bf16.mxu0 %v7769_v53  ;;  %4905 = vmatprep.subr.bf16.mxu1 %v7769_v53 }
 0x328   :  { %v1975_v38 = vpop.permute.xlu1 %1974 }
 0x329   :  { %v2117_v10 = vpop.permute.xlu0 %2116 }
 0x32c   :  { %v2023_v0 = vpop.permute.xlu1 %2022 }
 0x32d   :  { %v2165_v18 = vpop.permute.xlu0 %2164 }
 0x330   :  { %v2071_v7 = vpop.permute.xlu1 %2070 }
 0x331   :  { %v1877_v4 = vpop.permute.xlu0 %1876 }
 0x332   :  { %v2256_v44 = vsel %vm7780_vm1, %v6385_v37, %v1877_v4  ;;  %v2259_v37 = vsel %vm7780_vm1, %v6319_v28, %v6620_v31 }
 0x334   :  { %v1971_v63 = vpop.permute.xlu1 %1970 }
 0x335   :  { %v1925_v39 = vpop.permute.xlu0 %1924  ;;  %v2323_v3 = vsel %vm1242_vm6, %v2291_v41, %v1971_v63 }
 0x338   :  { %v2019_v54 = vpop.permute.xlu1 %2018 }
 0x339   :  { %v2113_v8 = vpop.permute.xlu0 %2112  ;;  %v2355_v30 = vsel %vm1308_vm8, %v2323_v3, %v2019_v54 }
 0x33a   :  { %v2419_v55 = vsel %vm2401_vm12, %v2386_v2, %v2113_v8 }
 0x33c   :  { %v2067_v32 = vpop.permute.xlu1 %2066 }
 0x33d   :  { %v2161_v56 = vpop.permute.xlu0 %2160  ;;  %v2388_v58 = vsel %vm2368_vm11, %v2355_v30, %v2067_v32 }
 0x33e   :  { %v2421_v46 = vsel %vm2401_vm12, %v2388_v58, %v2115_v14  ;;  %v2452_v11 = vsel %vm2434_vm13, %v2419_v55, %v2161_v56  ;;  %v2293_v14 = vsel %vm1176_vm4, %v2256_v44, %v1925_v39 }
 0x33f   :  { %v2454_v23 = vsel %vm2434_vm13, %v2421_v46, %v2163_v59  ;;  %v2325_v59 = vsel %vm1242_vm6, %v2293_v14, %v6622_v51  ;;  %v2295_v51 = vsel %vm1176_vm4, %v2259_v37, %v6633_v60 }
 0x340   :  { %v2211_v17 = vpop.permute.xlu1 %2210  ;;  %v2357_v5 = vsel %vm1308_vm8, %v2325_v59, %v6636_v47  ;;  %v2327_v39 = vsel %vm1242_vm6, %v2295_v51, %v1975_v38 }
 0x341   :  { %v2209_v6 = vpop.permute.xlu0 %2208  ;;  %v2487_v27 = vsel %vm2467_vm14, %v2454_v23, %v2211_v17  ;;  %v2390_v4 = vsel %vm2368_vm11, %v2357_v5, %v2069_v35  ;;  %v2359_v54 = vsel %vm1308_vm8, %v2327_v39, %v2023_v0 }
 0x342   :  { %v2485_v29 = vsel %vm2467_vm14, %v2452_v11, %v2209_v6  ;;  %v2423_v8 = vsel %vm2401_vm12, %v2390_v4, %v2117_v10  ;;  %v2392_v47 = vsel %vm2368_vm11, %v2359_v54, %v2071_v7 }
 0x343   :  { %v4520_v9 = vcombine.low %v2485_v29, %v2487_v27  ;;  %v2456_v28 = vsel %vm2434_vm13, %v2423_v8, %v2165_v18 }
 0x345   :  { %4707 = vmatprep.mubr.msk.bf16.mxu1 %vm7766_vm15, %v4520_v9  ;;  %v1881_v21 = vpop.permute.xlu0 %1880 }
 0x346   :  { %v2262_v14 = vsel %vm7780_vm1, %v6362_v22, %v1881_v21 }
 0x349   :  { %v2213_v19 = vpop.permute.xlu0 %2212 }
 0x34a   :  { %v2489_v33 = vsel %vm2467_vm14, %v2456_v28, %v2213_v19 }
 0x34d   :  { %v2119_v16 = vpop.permute.xlu1 %2118 }
 0x34e   :  { %v2425_v41 = vsel %vm2401_vm12, %v2392_v47, %v2119_v16 }
 0x34f   :  { %v1885_v1 = vpop.permute.xlu0 %1884 }
 0x350   :  { %v2268_v22 = vsel %vm7780_vm1, %v6545_v24, %v1885_v1 }
 0x351   :  { %v2167_v42 = vpop.permute.xlu1 %2166 }
 0x352   :  { %v2458_v31 = vsel %vm2434_vm13, %v2425_v41, %v2167_v42 }
 0x353   :  { %v1929_v63 = vpop.permute.xlu0 %1928 }
 0x354   :  { %v2297_v59 = vsel %vm1176_vm4, %v2262_v14, %v1929_v63 }
 0x355   :  { %v1883_v61 = vpop.permute.xlu1 %1882 }
 0x356   :  { %v2265_v19 = vsel %vm7780_vm1, %v6462_v48, %v1883_v61 }
 0x357   :  { %v1933_v36 = vpop.permute.xlu0 %1932 }
 0x358   :  { %v2301_v61 = vsel %vm1176_vm4, %v2268_v22, %v1933_v36 }
 0x359   :  { %v2215_v35 = vpop.permute.xlu1 %2214 }
 0x35a   :  { %v2491_v60 = vsel %vm2467_vm14, %v2458_v31, %v2215_v35 }
 0x35b   :  { %v4521_v38 = vcombine.low %v2489_v33, %v2491_v60  ;;  %v1977_v3 = vpop.permute.xlu0 %1976 }
 0x35c   :  { %v2329_v5 = vsel %vm1242_vm6, %v2297_v59, %v1977_v3 }
 0x35d   :  { %v1887_v40 = vpop.permute.xlu1 %1886  ;;  %4708 = vmatmul.mubr.msk.bf16.gmra.mrb[8].mxu1 %vm7766_vm15, %v4521_v38 }
 0x35e   :  { %v2271_v48 = vsel %vm7780_vm1, %v6513_v52, %v1887_v40 }
 0x35f   :  { %v1981_v10 = vpop.permute.xlu0 %1980 }
 0x360   :  { %v2333_v41 = vsel %vm1242_vm6, %v2301_v61, %v1981_v10 }
 0x361   :  { %v1931_v0 = vpop.permute.xlu1 %1930 }
 0x362   :  { %v2299_v16 = vsel %vm1176_vm4, %v2265_v19, %v1931_v0 }
 0x363   :  { %v2025_v7 = vpop.permute.xlu0 %2024 }
 0x364   :  { %v2361_v51 = vsel %vm1308_vm8, %v2329_v5, %v2025_v7 }
 0x365   :  { %v1935_v30 = vpop.permute.xlu1 %1934 }
 0x366   :  { %v2303_v54 = vsel %vm1176_vm4, %v2271_v48, %v1935_v30 }
 0x367   :  { %v2029_v32 = vpop.permute.xlu0 %2028 }
 0x368   :  { %v2365_v31 = vsel %vm1308_vm8, %v2333_v41, %v2029_v32 }
 0x369   :  { %v1979_v56 = vpop.permute.xlu1 %1978 }
 0x36a   :  { %v2331_v42 = vsel %vm1242_vm6, %v2299_v16, %v1979_v56 }
 0x36b   :  { %v2073_v57 = vpop.permute.xlu0 %2072 }
 0x36c   :  { %v2394_v21 = vsel %vm2368_vm11, %v2361_v51, %v2073_v57 }
 0x36d   :  { %v1983_v18 = vpop.permute.xlu1 %1982 }
 0x36e   :  { %v2335_v28 = vsel %vm1242_vm6, %v2303_v54, %v1983_v18 }
 0x36f   :  { %v2077_v58 = vpop.permute.xlu0 %2076 }
 0x370   :  { %v2398_v60 = vsel %vm2368_vm11, %v2365_v31, %v2077_v58 }
 0x371   :  { %v2027_v2 = vpop.permute.xlu1 %2026 }
 0x372   :  { %v2363_v39 = vsel %vm1308_vm8, %v2331_v42, %v2027_v2 }
 0x373   :  { %v2121_v46 = vpop.permute.xlu0 %2120 }
 0x374   :  { %v2427_v8 = vsel %vm2401_vm12, %v2394_v21, %v2121_v46  ;;  %v7796_v21 = vmov 0.0  }
 0x375   :  { %v2031_v55 = vpop.permute.xlu1 %2030  ;;  %4747 = vmatprep.mubr.msk.f32.mxu0 %vm7765_vm0, %v7796_v21 }
 0x376   :  { %v2367_v35 = vsel %vm1308_vm8, %v2335_v28, %v2031_v55 }
 0x377   :  { %v2125_v11 = vpop.permute.xlu0 %2124 }
 0x378   :  { %v2431_v10 = vsel %vm2401_vm12, %v2398_v60, %v2125_v11 }
 0x379   :  { %v2075_v23 = vpop.permute.xlu1 %2074 }
 0x37a   :  { %v2396_v63 = vsel %vm2368_vm11, %v2363_v39, %v2075_v23 }
 0x37b   :  { %v2169_v6 = vpop.permute.xlu0 %2168 }
 0x37c   :  { %v2460_v24 = vsel %vm2434_vm13, %v2427_v8, %v2169_v6 }
 0x37d   :  { %v2079_v17 = vpop.permute.xlu1 %2078 }
 0x37e   :  { %v2400_v38 = vsel %vm2368_vm11, %v2367_v35, %v2079_v17 }
 0x37f   :  { %v2173_v9 = vpop.permute.xlu0 %2172 }
 0x380   :  { %v2464_v7 = vsel %vm2434_vm13, %v2431_v10, %v2173_v9 }
 0x381   :  { %v2123_v27 = vpop.permute.xlu1 %2122 }
 0x382   :  { %v2429_v47 = vsel %vm2401_vm12, %v2396_v63, %v2123_v27 }
 0x383   :  { %v2217_v37 = vpop.permute.xlu0 %2216 }
 0x384   :  { %v2493_v36 = vsel %vm2467_vm14, %v2460_v24, %v2217_v37 }
 0x385   :  { %v2127_v29 = vpop.permute.xlu1 %2126 }
 0x386   :  { %v2433_v0 = vsel %vm2401_vm12, %v2400_v38, %v2127_v29 }
 0x387   :  { %v2221_v3 = vpop.permute.xlu0 %2220 }
 0x388   :  { %v2497_v56 = vsel %vm2467_vm14, %v2464_v7, %v2221_v3 }
 0x389   :  { %v2171_v44 = vpop.permute.xlu1 %2170 }
 0x38a   :  { %v2462_v52 = vsel %vm2434_vm13, %v2429_v47, %v2171_v44 }
 0x38d   :  { %v2175_v4 = vpop.permute.xlu1 %2174 }
 0x38e   :  { %v2466_v30 = vsel %vm2434_vm13, %v2433_v0, %v2175_v4 }
 0x391   :  { %v2219_v1 = vpop.permute.xlu1 %2218 }
 0x392   :  { %v2495_v33 = vsel %vm2467_vm14, %v2462_v52, %v2219_v1 }
 0x393   :  { %v4522_v40 = vcombine.low %v2493_v36, %v2495_v33 }
 0x395   :  { %v2223_v32 = vpop.permute.xlu1 %2222  ;;  %4711 = vmatprep.mubr.msk.bf16.mxu1 %vm7766_vm15, %v4522_v40 }
 0x396   :  { %v2499_v57 = vsel %vm2467_vm14, %v2466_v30, %v2223_v32 }
 0x397   :  { %v4523_v18 = vcombine.low %v2497_v56, %v2499_v57  ;;  %v7767_v57 = vmov 1.0  }
 0x399   :  { %4712 = vmatmul.mubr.msk.bf16.gmra.mrb[12].mxu1 %vm7766_vm15, %v4523_v18  ;;  %v3216_v18 = vld [vmem:[#allocation3 + $0xdf] sm:$0xff] }
 0x39a   :  { %4782 = vmatprep.mubr.msk.f32.mxu1 %vm7765_vm0, %v7796_v21 }
 0x3c7   :  { %v6731_v58 = vpop.f32.mrb[0].mxu1 }
 0x3c8   :  { %v6733_v2 = vpop.f32.mrb[1].mxu1  ;;  %v2774_v55 = vmul.f32 %v6731_v58, %v6731_v58 }
 0x3c9   :  { %v6735_v46 = vpop.f32.mrb[2].mxu1  ;;  %v2772_v6 = vmul.f32 %v6733_v2, %v6733_v2 }
 0x3ca   :  { %v4885_v23 = vpack.c.bf16 %v6735_v46, %v6731_v58  ;;  %v2775_v11 = vmul.f32 %v6735_v46, %v6735_v46  ;;  %v6743_v17 = vpop.f32.mrb[3].mxu1 }
 0x3cb   :  { %v4882_v27 = vpack.c.bf16 %v6743_v17, %v6733_v2  ;;  %v2773_v29 = vmul.f32 %v6743_v17, %v6743_v17 }
 0x3cc   :  { %v4909_v9 = vpack.c.bf16 %v2775_v11, %v2774_v55  ;;  %v3232_v55 = vpack.c.bf16 %v3216_v18, %v3216_v18  ;;  %v3248_v11 = vld [vmem:[#allocation3 + $0xe0] sm:$0xff] }
 0x3cd   :  { %v4906_v44 = vpack.c.bf16 %v2773_v29, %v2772_v6  ;;  %4883 = vmatpush3.bf16.msra.mxu0 %v4882_v27  ;;  %v3081_v6 = vld [vmem:[#allocation3 + $0x9] sm:$0xff]  ;;  %v3264_v29 = vpack.c.bf16 %v3248_v11, %v3248_v11  ;;  %v6888_v11 = vld [vmem:[%s7749_s5] ss:$0 sm:$0xff] }
 0x3ce   :  { %4884 = vmatprep.subr.bf16.mxu0 %v7769_v53  ;;  %3575 = vrot.lane.b32.xlu1 %v3232_v55, %s5024_s1 }
 0x3cf   :  { %4907 = vmatpush3.bf16.msra.mxu1 %v4906_v44  ;;  %v3280_v44 = vld [vmem:[#allocation3 + $0xe1] sm:$0xff] }
 0x3d0   :  { %4908 = vmatprep.subr.bf16.mxu1 %v7769_v53 }
 0x3d1   :  { %4886 = vmatpush3.bf16.msra.mxu0 %v4885_v23  ;;  %v3049_v23 = vld [vmem:[#allocation3 + $0x8] sm:$0xff] }
 0x3d2   :  { %4887 = vmatprep.subr.bf16.mxu0 %v7769_v53  ;;  %v3065_v27 = vpack.c.bf16 %v3049_v23, %v3049_v23  ;;  %3623 = vrot.lane.b32.xlu1 %v3264_v29, %s5025_s22 }
 0x3d3   :  { %4910 = vmatpush3.bf16.msra.mxu1 %v4909_v9  ;;  %v3097_v9 = vpack.c.bf16 %v3081_v6, %v3081_v6  ;;  %v6893_v6 = vstv %s7750_s9 }
 0x3d4   :  { %4911 = vmatprep.subr.bf16.mxu1 %v7769_v53  ;;  %3321 = vrot.lane.b32.xlu0 %v3065_v27, %s5017_s29 }
 0x3d8   :  { %3369 = vrot.lane.b32.xlu0 %v3097_v9, %s5019_s21 }
 0x3e7   :  { %v6755_v14 = vpop.f32.mrb[4].mxu1 }
 0x3e8   :  { %v6757_v19 = vpop.f32.mrb[5].mxu1  ;;  %v2778_v16 = vmul.f32 %v6755_v14, %v6755_v14 }
 0x3e9   :  { %v6759_v59 = vpop.f32.mrb[6].mxu1  ;;  %v2776_v4 = vmul.f32 %v6757_v19, %v6757_v19 }
 0x3ea   :  { %v4891_v5 = vpack.c.bf16 %v6759_v59, %v6755_v14  ;;  %v2779_v42 = vmul.f32 %v6759_v59, %v6759_v59  ;;  %v6767_v37 = vpop.f32.mrb[7].mxu1 }
 0x3eb   :  { %v4888_v51 = vpack.c.bf16 %v6767_v37, %v6757_v19  ;;  %v2777_v39 = vmul.f32 %v6767_v37, %v6767_v37 }
 0x3ec   :  { %v4915_v22 = vpack.c.bf16 %v2779_v42, %v2778_v16  ;;  %v3057_v16 = vld [vmem:[#allocation3 + $0xf8] sm:$0xff] }
 0x3ed   :  { %v4912_v48 = vpack.c.bf16 %v2777_v39, %v2776_v4  ;;  %4889 = vmatpush3.bf16.msra.mxu0 %v4888_v51  ;;  %v3073_v42 = vpack.c.bf16 %v3057_v16, %v3057_v16  ;;  %v3089_v4 = vld [vmem:[#allocation3 + $0xf9] sm:$0xff]  ;;  %v2863_v39 = vlaneseq }
 0x3ee   :  { %4890 = vmatprep.subr.bf16.mxu0 %v7769_v53  ;;  %v3105_v51 = vpack.c.bf16 %v3089_v4, %v3089_v4  ;;  %v6902_v16 = vld [vmem:[%s7751_s6] ss:$0 sm:$0xff] }
 0x3ef   :  { %4913 = vmatpush3.bf16.msra.mxu1 %v4912_v48  ;;  %3337 = vrot.lane.b32.xlu0 %v3073_v42, %s5017_s29 }
 0x3f0   :  { %4914 = vmatprep.subr.bf16.mxu1 %v7769_v53 }
 0x3f1   :  { %4892 = vmatpush3.bf16.msra.mxu0 %v4891_v5  ;;  %v3296_v5 = vpack.c.bf16 %v3280_v44, %v3280_v44 }
 0x3f2   :  { %4893 = vmatprep.subr.bf16.mxu0 %v7769_v53 }
 0x3f3   :  { %4916 = vmatpush3.bf16.msra.mxu1 %v4915_v22  ;;  %3671 = vrot.lane.b32.xlu1 %v3296_v5, %s5026_s23  ;;  %v2864_v22 = vshrl.u32 %v2863_v39, 7 }
 0x3f4   :  { %4917 = vmatprep.subr.bf16.mxu1 %v7769_v53  ;;  %3385 = vrot.lane.b32.xlu0 %v3105_v51, %s5019_s21 }
 0x3f5   :  { %v6845_v48 = vsub.s32 0, %v2864_v22 }
 0x3f7   :  { %3591 = vrot.lane.b32.xlu1 %v6615_v43, %s5024_s1 }
 0x3fb   :  { %3639 = vrot.lane.b32.xlu1 %v6641_v25, %s5025_s22 }
 0x430   :  { %v6783_v63 = vpop.f32.mrb[8].mxu1 }
 0x431   :  { %v6785_v61 = vpop.f32.mrb[9].mxu1  ;;  %v2782_v8 = vmul.f32 %v6783_v63, %v6783_v63 }
 0x432   :  { %v6787_v54 = vpop.f32.mrb[10].mxu1  ;;  %v2780_v24 = vmul.f32 %v6785_v61, %v6785_v61 }
 0x433   :  { %v4897_v47 = vpack.c.bf16 %v6787_v54, %v6783_v63  ;;  %v2783_v41 = vmul.f32 %v6787_v54, %v6787_v54  ;;  %v6795_v28 = vpop.f32.mrb[11].mxu1 }
 0x434   :  { %v4894_v52 = vpack.c.bf16 %v6795_v28, %v6785_v61  ;;  %v2781_v1 = vmul.f32 %v6795_v28, %v6795_v28 }
 0x435   :  { %v4921_v31 = vpack.c.bf16 %v2783_v41, %v2782_v8 }
 0x436   :  { %v4918_v35 = vpack.c.bf16 %v2781_v1, %v2780_v24  ;;  %4895 = vmatpush3.bf16.msra.mxu0 %v4894_v52 }
 0x437   :  { %4896 = vmatprep.subr.bf16.mxu0 %v7769_v53 }
 0x438   :  { %4919 = vmatpush3.bf16.msra.mxu1 %v4918_v35 }
 0x439   :  { %4920 = vmatprep.subr.bf16.mxu1 %v7769_v53 }
 0x43a   :  { %4898 = vmatpush3.bf16.msra.mxu0 %v4897_v47 }
 0x43b   :  { %4899 = vmatprep.subr.bf16.mxu0 %v7769_v53 }
 0x43c   :  { %4922 = vmatpush3.bf16.msra.mxu1 %v4921_v31 }
 0x43d   :  { %4923 = vmatprep.subr.bf16.mxu1 %v7769_v53 }
 0x46c   :  { %v6807_v36 = vpop.f32.mrb[12].mxu1 }
 0x46d   :  { %v6809_v33 = vpop.f32.mrb[13].mxu1  ;;  %v2786_v38 = vmul.f32 %v6807_v36, %v6807_v36 }
 0x46e   :  { %v6811_v60 = vpop.f32.mrb[14].mxu1  ;;  %v2784_v0 = vmul.f32 %v6809_v33, %v6809_v33 }
 0x46f   :  { %v4903_v3 = vpack.c.bf16 %v6811_v60, %v6807_v36  ;;  %v2787_v40 = vmul.f32 %v6811_v60, %v6811_v60  ;;  %v6819_v10 = vpop.f32.mrb[15].mxu1 }
 0x470   :  { %v4900_v7 = vpack.c.bf16 %v6819_v10, %v6809_v33  ;;  %v2785_v30 = vmul.f32 %v6819_v10, %v6819_v10 }
 0x471   :  { %v4927_v32 = vpack.c.bf16 %v2787_v40, %v2786_v38 }
 0x472   :  { %v4924_v56 = vpack.c.bf16 %v2785_v30, %v2784_v0  ;;  %4901 = vmatpush3.bf16.msra.mxu0 %v4900_v7 }
 0x473   :  { %4902 = vmatprep.subr.bf16.mxu0 %v7769_v53 }
 0x474   :  { %4925 = vmatpush3.bf16.msra.mxu1 %v4924_v56 }
 0x475   :  { %4926 = vmatprep.subr.bf16.mxu1 %v7769_v53 }
 0x476   :  { %4904 = vmatpush3.bf16.msra.mxu0 %v4903_v3 }
 0x478   :  { %4928 = vmatpush3.bf16.msra.mxu1 %v4927_v32 }
 0x479   :  { %4748 = vmatmul.mubr.f32.vlgmr.msra.gmra.mrb[16].mxu0 %v7767_v57  ;;  %4929 = vmatprep.subr.bf16.mxu1 %v7769_v53 }
 0x47b   :  { %4783 = vmatmul.mubr.f32.vlgmr.msra.gmra.mrb[16].mxu1 %v7767_v57 }
 0x47c   :  { %4843 = vmatprep.mubr.msk.f32.mxu1 %vm7765_vm0, %v7796_v21 }
 0x54c   :  { %v2768_v8 = vpop.f32.mrb[16].mxu0 }
 0x54d   :  { %v2858_v47 = vmul.f32 0.0078125, %v2768_v8  ;;  %v4749_v41 = vpop.f32.mrb[17].mxu0 }
 0x54e   :  { %v2854_v24 = vpop.f32.mrb[16].mxu1 }
 0x54f   :  { %v2860_v52 = vmul.f32 %v2858_v47, %v2858_v47  ;;  %v6848_v1 = vrot.slane %v2858_v47, %v6845_v48  ;;  %v2859_v31 = vmul.f32 0.0078125, %v2854_v24  ;;  %v4784_v35 = vpop.f32.mrb[17].mxu1 }
 0x551   :  { %v2861_v43 = vsub.f32 %v2859_v31, %v2860_v52  ;;  %v2868_v38 = vsub.f32 %v6743_v17, %v6848_v1  ;;  %v2867_v25 = vsub.f32 %v6733_v2, %v6848_v1  ;;  %v2869_v3 = vsub.f32 %v6731_v58, %v6848_v1 }
 0x552   :  { %v2870_v40 = vsub.f32 %v6735_v46, %v6848_v1  ;;  %v2871_v0 = vsub.f32 %v6757_v19, %v6848_v1  ;;  %v2872_v7 = vsub.f32 %v6767_v37, %v6848_v1  ;;  %v2873_v30 = vsub.f32 %v6755_v14, %v6848_v1 }
 0x553   :  { %v2862_v32 = vmax.f32 %v2861_v43, 0.0  ;;  %v2874_v17 = vsub.f32 %v6759_v59, %v6848_v1  ;;  %v2875_v2 = vsub.f32 %v6785_v61, %v6848_v1  ;;  %v2876_v58 = vsub.f32 %v6795_v28, %v6848_v1 }
 0x554   :  { %v2877_v46 = vsub.f32 %v6783_v63, %v6848_v1  ;;  %v2878_v19 = vsub.f32 %v6787_v54, %v6848_v1  ;;  %v2879_v37 = vsub.f32 %v6809_v33, %v6848_v1  ;;  %v2880_v56 = vsub.f32 %v6819_v10, %v6848_v1 }
 0x555   :  { %v2883_v14 = vadd.f32 1e-05, %v2862_v32  ;;  %v2881_v59 = vsub.f32 %v6807_v36, %v6848_v1  ;;  %v2882_v18 = vsub.f32 %v6811_v60, %v6848_v1 }
 0x557   :  { %5010 = vrsqrt.f32 %v2883_v14 }
 0x561   :  { %v5011_v55 = vpop.eup %5010 }
 0x562   :  { %v6883_v23 = vrot.slane %v5011_v55, %v6845_v48 }
 0x564   :  { %v2890_v27 = vmul.f32 %v6883_v23, %v2868_v38  ;;  %v2889_v29 = vmul.f32 %v6883_v23, %v2867_v25  ;;  %v2891_v9 = vmul.f32 %v6883_v23, %v2869_v3  ;;  %v2892_v44 = vmul.f32 %v6883_v23, %v2870_v40 }
 0x565   :  { %v2893_v5 = vmul.f32 %v6883_v23, %v2871_v0  ;;  %v2894_v42 = vmul.f32 %v6883_v23, %v2872_v7  ;;  %v2895_v4 = vmul.f32 %v6883_v23, %v2873_v30  ;;  %v2896_v51 = vmul.f32 %v6883_v23, %v2874_v17 }
 0x566   :  { %v2913_v39 = vmul.f32 %v6888_v11, %v2890_v27  ;;  %v2912_v22 = vmul.f32 %v6888_v11, %v2889_v29  ;;  %v2914_v8 = vmul.f32 %v6888_v11, %v2891_v9  ;;  %v2915_v47 = vmul.f32 %v6888_v11, %v2892_v44 }
 0x567   :  { %v2916_v41 = vmul.f32 %v6888_v11, %v2893_v5  ;;  %v2917_v24 = vmul.f32 %v6888_v11, %v2894_v42  ;;  %v2918_v52 = vmul.f32 %v6888_v11, %v2895_v4  ;;  %v2919_v31 = vmul.f32 %v6888_v11, %v2896_v51 }
 0x568   :  { %v2936_v35 = vadd.f32 %v6902_v16, %v2913_v39  ;;  %v2935_v43 = vadd.f32 %v6902_v16, %v2912_v22  ;;  %v2937_v38 = vadd.f32 %v6902_v16, %v2914_v8  ;;  %v2938_v25 = vadd.f32 %v6902_v16, %v2915_v47 }
 0x569   :  { %v2939_v3 = vadd.f32 %v6902_v16, %v2916_v41  ;;  %v2940_v40 = vadd.f32 %v6902_v16, %v2917_v24  ;;  %v2941_v0 = vadd.f32 %v6902_v16, %v2918_v52  ;;  %v2942_v7 = vadd.f32 %v6902_v16, %v2919_v31 }
 0x56a   :  { %vm2953_vm2 = vcmp.gt.f32.partialorder %v2936_v35, 0.0  ;;  %v2970_v30 = vmul.f32 %v6893_v6, %v2936_v35  ;;  %vm2952_vm3 = vcmp.gt.f32.partialorder %v2935_v43, 0.0  ;;  %v2969_v32 = vmul.f32 %v6893_v6, %v2935_v43 }
 0x56b   :  { %vm2954_vm5 = vcmp.gt.f32.partialorder %v2937_v38, 0.0  ;;  %v2971_v17 = vmul.f32 %v6893_v6, %v2937_v38  ;;  %vm2955_vm7 = vcmp.gt.f32.partialorder %v2938_v25, 0.0  ;;  %v2972_v14 = vmul.f32 %v6893_v6, %v2938_v25 }
 0x56c   :  { %v2986_v55 = vsel %vm2953_vm2, %v2936_v35, %v2970_v30  ;;  %v2985_v27 = vsel %vm2952_vm3, %v2935_v43, %v2969_v32  ;;  %vm2956_vm9 = vcmp.gt.f32.partialorder %v2939_v3, 0.0  ;;  %v2973_v29 = vmul.f32 %v6893_v6, %v2939_v3 }
 0x56d   :  { %3002 = vst.msk [vmem:[#allocation3 + $0x38] sm:$0xff] %vm7780_vm1, %v2986_v55  ;;  %3001 = vst.msk [vmem:[#allocation3 + $0x20] sm:$0xff] %vm7780_vm1, %v2985_v27  ;;  %v2987_v9 = vsel %vm2954_vm5, %v2937_v38, %v2971_v17  ;;  %v2988_v44 = vsel %vm2955_vm7, %v2938_v25, %v2972_v14  ;;  %vm2957_vm0 = vcmp.gt.f32.partialorder %v2940_v40, 0.0  ;;  %v2974_v5 = vmul.f32 %v6893_v6, %v2940_v40 }
 0x56e   :  { %3003 = vst.msk [vmem:[#allocation3 + $0x50] sm:$0xff] %vm7780_vm1, %v2987_v9  ;;  %3004 = vst.msk [vmem:[#allocation3 + $0x68] sm:$0xff] %vm7780_vm1, %v2988_v44  ;;  %v2989_v42 = vsel %vm2956_vm9, %v2939_v3, %v2973_v29  ;;  %vm2958_vm15 = vcmp.gt.f32.partialorder %v2941_v0, 0.0  ;;  %v2975_v4 = vmul.f32 %v6893_v6, %v2941_v0  ;;  %vm2959_vm2 = vcmp.gt.f32.partialorder %v2942_v7, 0.0 }
 0x56f   :  { %3005 = vst.msk [vmem:[#allocation3 + $0x80] sm:$0xff] %vm7780_vm1, %v2989_v42  ;;  %v2990_v51 = vsel %vm2957_vm0, %v2940_v40, %v2974_v5  ;;  %v2976_v39 = vmul.f32 %v6893_v6, %v2942_v7  ;;  %v2897_v22 = vmul.f32 %v6883_v23, %v2875_v2  ;;  %v2898_v47 = vmul.f32 %v6883_v23, %v2876_v58 }
 0x570   :  { %3006 = vst.msk [vmem:[#allocation3 + $0x98] sm:$0xff] %vm7780_vm1, %v2990_v51  ;;  %v2991_v8 = vsel %vm2958_vm15, %v2941_v0, %v2975_v4  ;;  %v2899_v41 = vmul.f32 %v6883_v23, %v2877_v46  ;;  %v2900_v61 = vmul.f32 %v6883_v23, %v2878_v19  ;;  %v2901_v28 = vmul.f32 %v6883_v23, %v2879_v37 }
 0x571   :  { %3007 = vst.msk [vmem:[#allocation3 + $0xb0] sm:$0xff] %vm7780_vm1, %v2991_v8  ;;  %v2992_v2 = vsel %vm2959_vm2, %v2942_v7, %v2976_v39  ;;  %v2920_v24 = vmul.f32 %v6888_v11, %v2897_v22  ;;  %v2902_v63 = vmul.f32 %v6883_v23, %v2880_v56  ;;  %v2921_v54 = vmul.f32 %v6888_v11, %v2898_v47 }
 0x572   :  { %3008 = vst.msk [vmem:[#allocation3 + $0xc8] sm:$0xff] %vm7780_vm1, %v2992_v2  ;;  %v2903_v58 = vmul.f32 %v6883_v23, %v2881_v59  ;;  %v2904_v33 = vmul.f32 %v6883_v23, %v2882_v18  ;;  %v2922_v37 = vmul.f32 %v6888_v11, %v2899_v41  ;;  %v2923_v56 = vmul.f32 %v6888_v11, %v2900_v61 }
 0x573   :  { %v2943_v46 = vadd.f32 %v6902_v16, %v2920_v24  ;;  %v2944_v36 = vadd.f32 %v6902_v16, %v2921_v54  ;;  %v2924_v60 = vmul.f32 %v6888_v11, %v2901_v28  ;;  %v2925_v25 = vmul.f32 %v6888_v11, %v2902_v63 }
 0x574   :  { %v3051_v19 = vld [vmem:[#allocation3 + $0x38] sm:$0xff]  ;;  %v3050_v10 = vld [vmem:[#allocation3 + $0x20] sm:$0xff]  ;;  %v2945_v23 = vadd.f32 %v6902_v16, %v2922_v37  ;;  %v2946_v38 = vadd.f32 %v6902_v16, %v2923_v56  ;;  %v2926_v30 = vmul.f32 %v6888_v11, %v2903_v58  ;;  %v2927_v4 = vmul.f32 %v6888_v11, %v2904_v33 }
 0x575   :  { %v6977_v52 = vpack.c.bf16 %v3051_v19, %v3051_v19  ;;  %v6979_v31 = vpack.c.bf16 %v3050_v10, %v3050_v10  ;;  %vm2960_vm15 = vcmp.gt.f32.partialorder %v2943_v46, 0.0  ;;  %v3083_v59 = vld [vmem:[#allocation3 + $0x39] sm:$0xff]  ;;  %v3052_v35 = vld [vmem:[#allocation3 + $0x50] sm:$0xff]  ;;  %v2977_v43 = vmul.f32 %v6893_v6, %v2943_v46  ;;  %v3082_v0 = vld [vmem:[#allocation3 + $0x21] sm:$0xff] }
 0x576   :  { %v3113_v1 = vld [vmem:[#allocation3 + $0x1f] sm:$0xff]  ;;  %v6991_v3 = vpack.c.bf16 %v3083_v59, %v3083_v59  ;;  %v6993_v40 = vpack.c.bf16 %v3052_v35, %v3052_v35  ;;  %vm2961_vm0 = vcmp.gt.f32.partialorder %v2944_v36, 0.0  ;;  %v2978_v7 = vmul.f32 %v6893_v6, %v2944_v36  ;;  %v3115_v44 = vld [vmem:[#allocation3 + $0x4f] sm:$0xff]  ;;  %v3114_v2 = vld [vmem:[#allocation3 + $0x37] sm:$0xff] }
 0x577   :  { %3325 = vrot.lane.b32.xlu0 %v6977_v52, %s5017_s29  ;;  %3323 = vrot.lane.b32.xlu1 %v6979_v31, %s5017_s29  ;;  %v2993_v18 = vsel %vm2960_vm15, %v2943_v46, %v2977_v43  ;;  %v7002_v32 = vpack.c.bf16 %v3113_v1, %v3113_v1  ;;  %v3098_v17 = vpack.c.bf16 %v3082_v0, %v3082_v0  ;;  %vm2962_vm3 = vcmp.gt.f32.partialorder %v2945_v23, 0.0  ;;  %v3084_v5 = vld [vmem:[#allocation3 + $0x51] sm:$0xff]  ;;  %v3116_v46 = vld [vmem:[#allocation3 + $0x67] sm:$0xff] }
 0x578   :  { %3009 = vst.msk [vmem:[#allocation3 + $0x110] sm:$0xff] %vm7780_vm1, %v2993_v18  ;;  %v2994_v14 = vsel %vm2961_vm0, %v2944_v36, %v2978_v7  ;;  %vm2963_vm5 = vcmp.gt.f32.partialorder %v2946_v38, 0.0  ;;  %v2979_v55 = vmul.f32 %v6893_v6, %v2945_v23  ;;  %v2980_v27 = vmul.f32 %v6893_v6, %v2946_v38  ;;  %v3180_v10 = vld [vmem:[#allocation3 + $0x69] sm:$0xff]  ;;  %v5005_v37 = vld [vmem:[%s7752_s4] sm:$0xff]  }
 0x579   :  { %3010 = vst.msk [vmem:[#allocation3 + $0x128] sm:$0xff] %vm7780_vm1, %v2994_v14  ;;  %v2947_v29 = vadd.f32 %v6902_v16, %v2924_v60  ;;  %v2948_v9 = vadd.f32 %v6902_v16, %v2925_v25  ;;  %v2949_v42 = vadd.f32 %v6902_v16, %v2926_v30  ;;  %v7019_v47 = vpack.c.bf16 %v3115_v44, %v3115_v44  ;;  %v3212_v36 = vld [vmem:[#allocation3 + $0x7f] sm:$0xff]  ;;  %v5007_v59 = vld [vmem:[%s7752_s4 + $0x10] sm:$0xff]   ;;  %v3120_v44 = vld [vmem:[#allocation3 + $0xc7] sm:$0xff] }
 0x57a   :  { %v2995_v51 = vsel %vm2962_vm3, %v2945_v23, %v2979_v55  ;;  %v2996_v39 = vsel %vm2963_vm5, %v2946_v38, %v2980_v27  ;;  %v7021_v41 = vpack.c.bf16 %v3084_v5, %v3084_v5  ;;  %v2950_v63 = vadd.f32 %v6902_v16, %v2927_v4  ;;  %4785 = vmatprep.subr.bf16.mxu0 %v5005_v37  ;;  %v3244_v43 = vld [vmem:[#allocation3 + $0x80] sm:$0xff]  ;;  %v3055_v23 = vld [vmem:[#allocation3 + $0x98] sm:$0xff]  ;;  %v3056_v0 = vld [vmem:[#allocation3 + $0xb0] sm:$0xff] }
 0x57b   :  { %3373 = vrot.lane.b32.xlu0 %v6991_v3, %s5019_s21  ;;  %3327 = vrot.lane.b32.xlu1 %v6993_v40, %s5017_s29  ;;  %vm2964_vm7 = vcmp.gt.f32.partialorder %v2947_v29, 0.0  ;;  %v2981_v22 = vmul.f32 %v6893_v6, %v2947_v29  ;;  %3011 = vst.msk [vmem:[#allocation3 + $0x140] sm:$0xff] %vm7780_vm1, %v2995_v51  ;;  %3012 = vst.msk [vmem:[#allocation3 + $0x158] sm:$0xff] %vm7780_vm1, %v2996_v39  ;;  %vm2965_vm9 = vcmp.gt.f32.partialorder %v2948_v9, 0.0  ;;  %vm2966_vm2 = vcmp.gt.f32.partialorder %v2949_v42, 0.0  ;;  %v3276_v25 = vld [vmem:[#allocation3 + $0x81] sm:$0xff] }
 0x57c   :  { %v2982_v8 = vmul.f32 %v6893_v6, %v2948_v9  ;;  %v2983_v11 = vmul.f32 %v6893_v6, %v2949_v42  ;;  %vm2967_vm15 = vcmp.gt.f32.partialorder %v2950_v63, 0.0  ;;  %v2984_v54 = vmul.f32 %v6893_v6, %v2950_v63  ;;  %v3148_v6 = vld [vmem:[#allocation3 + $0x68] sm:$0xff]  ;;  %4786 = vmatpush3.bf16.msra.mxu0 %v5005_v37  ;;  %v5009_v60 = vld [vmem:[%s7752_s4 + $0x20] ss:$0 sps:$4 sm:$0xff]   ;;  %v3088_v14 = vld [vmem:[#allocation3 + $0xb1] sm:$0xff] }
 0x57d   :  { %v2997_v61 = vsel %vm2964_vm7, %v2947_v29, %v2981_v22  ;;  %v7032_v58 = vpack.c.bf16 %v3114_v2, %v3114_v2  ;;  %v7039_v16 = vpack.c.bf16 %v3116_v46, %v3116_v46  ;;  %v3164_v19 = vpack.c.bf16 %v3148_v6, %v3148_v6  ;;  %v3118_v29 = vld [vmem:[#allocation3 + $0x97] sm:$0xff]  ;;  %v3152_v4 = vld [vmem:[#allocation3 + $0xc8] sm:$0xff]  ;;  %v7123_v22 = vpop.permute.xlu0 %3321 }
 0x57e   :  { %3013 = vst.msk [vmem:[#allocation3 + $0x170] sm:$0xff] %vm7780_vm1, %v2997_v61  ;;  %v2998_v24 = vsel %vm2965_vm9, %v2948_v9, %v2982_v8  ;;  %v2999_v28 = vsel %vm2966_vm2, %v2949_v42, %v2983_v11  ;;  %v3000_v33 = vsel %vm2967_vm15, %v2950_v63, %v2984_v54  ;;  %v3196_v56 = vpack.c.bf16 %v3180_v10, %v3180_v10  ;;  %v7115_v42 = vpop.permute.xlu1 %3575  ;;  %v3184_v8 = vld [vmem:[#allocation3 + $0xc9] sm:$0xff] }
 0x57f   :  { %3417 = vrot.lane.b32.xlu0 %v7002_v32, %s5021_s12  ;;  %3371 = vrot.lane.b32.xlu1 %v3098_v17, %s5019_s21  ;;  %3014 = vst.msk [vmem:[#allocation3 + $0x188] sm:$0xff] %vm7780_vm1, %v2998_v24  ;;  %3015 = vst.msk [vmem:[#allocation3 + $0x1a0] sm:$0xff] %vm7780_vm1, %v2999_v28  ;;  %v7071_v35 = vpack.c.bf16 %v3212_v36, %v3212_v36  ;;  %v3260_v1 = vpack.c.bf16 %v3244_v43, %v3244_v43  ;;  %v4062_v18 = vsel %vm2601_vm10, %v5009_v60, 0  ;;  %v3058_v54 = vld [vmem:[#allocation3 + $0x110] sm:$0xff] }
 0x580   :  { %3016 = vst.msk [vmem:[#allocation3 + $0x1b8] sm:$0xff] %vm7780_vm1, %v3000_v33  ;;  %v3071_v38 = vpack.c.bf16 %v3055_v23, %v3055_v23  ;;  %v3072_v30 = vpack.c.bf16 %v3056_v0, %v3056_v0  ;;  %v3104_v27 = vpack.c.bf16 %v3088_v14, %v3088_v14  ;;  %v7108_v9 = vpack.c.bf16 %v3118_v29, %v3118_v29  ;;  %v3121_v23 = vld [vmem:[#allocation3 + $0x10f] sm:$0xff] }
 0x581   :  { %v3136_v5 = vpack.c.bf16 %v3120_v44, %v3120_v44  ;;  %v3168_v51 = vpack.c.bf16 %v3152_v4, %v3152_v4  ;;  %v3200_v61 = vpack.c.bf16 %v3184_v8, %v3184_v8  ;;  %v3074_v6 = vpack.c.bf16 %v3058_v54, %v3058_v54 }
 0x582   :  { %v7119_v39 = vpop.permute.xlu1 %3623  ;;  %v3060_v10 = vld [vmem:[#allocation3 + $0x140] sm:$0xff]  ;;  %v3124_v44 = vld [vmem:[#allocation3 + $0x157] sm:$0xff] }
 0x583   :  { %3421 = vrot.lane.b32.xlu0 %v7019_v47, %s5021_s12  ;;  %3375 = vrot.lane.b32.xlu1 %v7021_v41, %s5019_s21  ;;  %v7161_v36 = vpack.c.bf16 %v3060_v10, %v3060_v10  ;;  %v3156_v54 = vld [vmem:[#allocation3 + $0x158] sm:$0xff] }
 0x585   :  { %v3220_v57 = vld [vmem:[#allocation3 + $0x16f] sm:$0xff] }
 0x586   :  { %v7128_v11 = vpop.permute.xlu1 %3671  ;;  %v7233_v13 = vpack.c.bf16 %v3220_v57, %v3220_v57  ;;  %v3252_v20 = vld [vmem:[#allocation3 + $0x170] sm:$0xff] }
 0x587   :  { %3465 = vrot.lane.b32.xlu0 %v6979_v31, %s5023_s18  ;;  %3419 = vrot.lane.b32.xlu1 %v7032_v58, %s5021_s12  ;;  %v5006_v31 = vld [vmem:[%s7752_s4 + $0x8] sm:$0xff]  }
 0x588   :  { %4787 = vmatprep.subr.bf16.mxu0 %v5006_v31 }
 0x589   :  { %4788 = vmatpush3.bf16.msra.mxu0 %v5006_v31 }
 0x58a   :  { %4789 = vmatprep.subr.bf16.mxu0 %v5007_v59  ;;  %v7134_v2 = vpop.permute.xlu1 %3591 }
 0x58b   :  { %3469 = vrot.lane.b32.xlu0 %v6993_v40, %s5023_s18  ;;  %3423 = vrot.lane.b32.xlu1 %v7039_v16, %s5021_s12 }
 0x58d   :  { %4790 = vmatpush3.bf16.msra.mxu0 %v5007_v59  ;;  %v3091_v59 = vld [vmem:[#allocation3 + $0x129] sm:$0xff] }
 0x58e   :  { %v7143_v28 = vpop.permute.xlu1 %3639 }
 0x58f   :  { %3513 = vrot.lane.b32.xlu0 %v3098_v17, %s5027_s2  ;;  %3467 = vrot.lane.b32.xlu1 %v6977_v52, %s5023_s18  ;;  %v3119_v17 = vld [vmem:[#allocation3 + $0xaf] sm:$0xff] }
 0x590   :  { %v7103_v55 = vpack.c.bf16 %v3119_v17, %v3119_v17 }
 0x593   :  { %3517 = vrot.lane.b32.xlu0 %v7021_v41, %s5027_s2  ;;  %3471 = vrot.lane.b32.xlu1 %v3164_v19, %s5023_s18 }
 0x597   :  { %3561 = vrot.lane.b32.xlu0 %v7032_v58, %s5024_s1  ;;  %3515 = vrot.lane.b32.xlu1 %v6991_v3, %s5027_s2 }
 0x59b   :  { %3565 = vrot.lane.b32.xlu0 %v7039_v16, %s5024_s1  ;;  %3519 = vrot.lane.b32.xlu1 %v3196_v56, %s5027_s2 }
 0x59f   :  { %3609 = vrot.lane.b32.xlu0 %v6977_v52, %s5025_s22  ;;  %3563 = vrot.lane.b32.xlu1 %v7019_v47, %s5024_s1  ;;  %v5008_v52 = vld [vmem:[%s7752_s4 + $0x18] sm:$0xff]  }
 0x5a0   :  { %4791 = vmatprep.subr.bf16.mxu0 %v5008_v52 }
 0x5a1   :  { %4792 = vmatpush3.bf16.msra.mxu0 %v5008_v52  ;;  %v3090_v52 = vld [vmem:[#allocation3 + $0x111] sm:$0xff] }
 0x5a2   :  { %4979 = vmatprep.subr.msk.bf16.mxu0 %vm2601_vm10, %v5009_v60  ;;  %vm7797_vm10 = vcmask 588800  }
 0x5a3   :  { %3613 = vrot.lane.b32.xlu0 %v3164_v19, %s5025_s22  ;;  %3567 = vrot.lane.b32.xlu1 %v7071_v35, %s5024_s1  ;;  %vm7798_vm0 = vmmov %vm7797_vm10 }
 0x5a4   :  { %vm7799_vm3 = vmmov %vm7798_vm0 }
 0x5a5   :  { %4794 = vmatpush3.bf16.msra.mxu0 %v4062_v18  ;;  %v3106_v18 = vpack.c.bf16 %v3090_v52, %v3090_v52  ;;  %vm7800_vm5 = vmmov %vm7798_vm0 }
 0x5a6   :  { %4953 = vmatprep.subr.bf16.mxu0 %v7769_v53  ;;  %vm7801_vm7 = vmmov %vm7798_vm0 }
 0x5a7   :  { %3657 = vrot.lane.b32.xlu0 %v6991_v3, %s5026_s23  ;;  %3611 = vrot.lane.b32.xlu1 %v6993_v40, %s5025_s22  ;;  %v3292_v3 = vpack.c.bf16 %v3276_v25, %v3276_v25  ;;  %v3087_v40 = vld [vmem:[#allocation3 + $0x99] sm:$0xff]  ;;  %vm7802_vm9 = vmmov %vm7798_vm0 }
 0x5a8   :  { %v3103_v7 = vpack.c.bf16 %v3087_v40, %v3087_v40  ;;  %v7180_v40 = vpack.c.bf16 %v3121_v23, %v3121_v23  ;;  %v3188_v23 = vld [vmem:[#allocation3 + $0x159] sm:$0xff] }
 0x5ab   :  { %3329 = vrot.lane.b32.xlu0 %v3164_v19, %s5017_s29  ;;  %3615 = vrot.lane.b32.xlu1 %v3260_v1, %s5025_s22  ;;  %v3059_v19 = vld [vmem:[#allocation3 + $0x128] sm:$0xff] }
 0x5ac   :  { %v7159_v31 = vpack.c.bf16 %v3059_v19, %v3059_v19 }
 0x5af   :  { %3661 = vrot.lane.b32.xlu0 %v3196_v56, %s5026_s23  ;;  %3659 = vrot.lane.b32.xlu1 %v7021_v41, %s5026_s23  ;;  %v7130_v41 = vpop.permute.xlu0 %3369 }
 0x5b3   :  { %3333 = vrot.lane.b32.xlu0 %v3071_v38, %s5017_s29  ;;  %3331 = vrot.lane.b32.xlu1 %v3260_v1, %s5017_s29  ;;  %v7136_v24 = vpop.permute.xlu0 %3337 }
 0x5b7   :  { %3377 = vrot.lane.b32.xlu0 %v3196_v56, %s5019_s21  ;;  %3663 = vrot.lane.b32.xlu1 %v3292_v3, %s5026_s23  ;;  %v7145_v63 = vpop.permute.xlu0 %3385 }
 0x5bb   :  { %3381 = vrot.lane.b32.xlu0 %v3103_v7, %s5019_s21  ;;  %3335 = vrot.lane.b32.xlu1 %v3072_v30, %s5017_s29 }
 0x5bf   :  { %3425 = vrot.lane.b32.xlu0 %v7071_v35, %s5021_s12  ;;  %3379 = vrot.lane.b32.xlu1 %v3292_v3, %s5019_s21 }
 0x5c3   :  { %3429 = vrot.lane.b32.xlu0 %v7103_v55, %s5021_s12  ;;  %3383 = vrot.lane.b32.xlu1 %v3104_v27, %s5019_s21 }
 0x5c7   :  { %3473 = vrot.lane.b32.xlu0 %v3260_v1, %s5023_s18  ;;  %3427 = vrot.lane.b32.xlu1 %v7108_v9, %s5021_s12  ;;  %v7171_v1 = vpack.c.bf16 %v3091_v59, %v3091_v59  ;;  %v3172_v59 = vpack.c.bf16 %v3156_v54, %v3156_v54  ;;  %v3017_v54 = vld [vmem:[#allocation3 + $0x7] sm:$0xff] }
 0x5c8   :  { %v3033_v53 = vpack.c.bf16 %v3017_v54, %v3017_v54 }
 0x5ca   :  { %v3691_v62 = vsel %vm7780_vm1, %v3033_v53, %v7123_v22 }
 0x5cb   :  { %3477 = vrot.lane.b32.xlu0 %v3072_v30, %s5023_s18  ;;  %3431 = vrot.lane.b32.xlu1 %v3136_v5, %s5021_s12  ;;  %v3738_v57 = vsel %vm1176_vm4, %v3691_v62, %v7130_v41 }
 0x5cf   :  { %3521 = vrot.lane.b32.xlu0 %v3292_v3, %s5027_s2  ;;  %3475 = vrot.lane.b32.xlu1 %v3071_v38, %s5023_s18 }
 0x5d3   :  { %3525 = vrot.lane.b32.xlu0 %v3104_v27, %s5027_s2  ;;  %3479 = vrot.lane.b32.xlu1 %v3168_v51, %s5023_s18 }
 0x5d7   :  { %3569 = vrot.lane.b32.xlu0 %v7108_v9, %s5024_s1  ;;  %3523 = vrot.lane.b32.xlu1 %v3103_v7, %s5027_s2 }
 0x5db   :  { %3573 = vrot.lane.b32.xlu0 %v3136_v5, %s5024_s1  ;;  %3527 = vrot.lane.b32.xlu1 %v3200_v61, %s5027_s2 }
 0x5df   :  { %3617 = vrot.lane.b32.xlu0 %v3071_v38, %s5025_s22  ;;  %3571 = vrot.lane.b32.xlu1 %v7103_v55, %s5024_s1  ;;  %v3092_v38 = vld [vmem:[#allocation3 + $0x141] sm:$0xff] }
 0x5e0   :  { %v7182_v0 = vpack.c.bf16 %v3092_v38, %v3092_v38 }
 0x5e3   :  { %3621 = vrot.lane.b32.xlu0 %v3168_v51, %s5025_s22  ;;  %3619 = vrot.lane.b32.xlu1 %v3072_v30, %s5025_s22  ;;  %v3122_v30 = vld [vmem:[#allocation3 + $0x127] sm:$0xff]  ;;  %v7200_v51 = vpack.c.bf16 %v3124_v44, %v3124_v44 }
 0x5e4   :  { %v7190_v29 = vpack.c.bf16 %v3122_v30, %v3122_v30  ;;  %v7223_v30 = vpack.c.bf16 %v3188_v23, %v3188_v23 }
 0x5e7   :  { %3665 = vrot.lane.b32.xlu0 %v3103_v7, %s5026_s23  ;;  %3667 = vrot.lane.b32.xlu1 %v3104_v27, %s5026_s23  ;;  %v3123_v7 = vld [vmem:[#allocation3 + $0x13f] sm:$0xff] }
 0x5e8   :  { %v7188_v27 = vpack.c.bf16 %v3123_v7, %v3123_v7 }
 0x5e9   :  { %v7149_v46 = vpop.permute.xlu1 %3323  ;;  %v7151_v33 = vpop.permute.xlu0 %3325 }
 0x5ea   :  { %v3694_v54 = vsel %vm7780_vm1, %v7002_v32, %v7149_v46  ;;  %v7256_v32 = vpack.c.bf16 %v3252_v20, %v3252_v20 }
 0x5eb   :  { %3669 = vrot.lane.b32.xlu0 %v3200_v61, %s5026_s23  ;;  %3339 = vrot.lane.b32.xlu1 %v3074_v6, %s5017_s29 }
 0x5ed   :  { %v7155_v37 = vpop.permute.xlu1 %3327  ;;  %v7157_v56 = vpop.permute.xlu0 %3373 }
 0x5ef   :  { %3341 = vrot.lane.b32.xlu0 %v7159_v31, %s5017_s29  ;;  %3343 = vrot.lane.b32.xlu1 %v7161_v36, %s5017_s29 }
 0x5f1   :  { %v7167_v43 = vpop.permute.xlu1 %3371  ;;  %v7169_v60 = vpop.permute.xlu0 %3417 }
 0x5f2   :  { %v3770_v53 = vsel %vm1242_vm6, %v3738_v57, %v7169_v60 }
 0x5f3   :  { %3389 = vrot.lane.b32.xlu0 %v7171_v1, %s5019_s21  ;;  %3387 = vrot.lane.b32.xlu1 %v3106_v18, %s5019_s21 }
 0x5f5   :  { %v7176_v25 = vpop.permute.xlu1 %3375  ;;  %v7178_v3 = vpop.permute.xlu0 %3421 }
 0x5f7   :  { %3433 = vrot.lane.b32.xlu0 %v7180_v40, %s5021_s12  ;;  %3391 = vrot.lane.b32.xlu1 %v7182_v0, %s5019_s21 }
 0x5f9   :  { %v3420_v17 = vpop.permute.xlu1 %3419  ;;  %v3466_v14 = vpop.permute.xlu0 %3465 }
 0x5fa   :  { %v3802_v46 = vsel %vm1308_vm8, %v3770_v53, %v3466_v14  ;;  %v3064_v53 = vld [vmem:[#allocation3 + $0x1a0] sm:$0xff] }
 0x5fb   :  { %3437 = vrot.lane.b32.xlu0 %v7188_v27, %s5021_s12  ;;  %3435 = vrot.lane.b32.xlu1 %v7190_v29, %s5021_s12 }
 0x5fd   :  { %v7196_v5 = vpop.permute.xlu1 %3423  ;;  %v7198_v4 = vpop.permute.xlu0 %3469 }
 0x5ff   :  { %3481 = vrot.lane.b32.xlu0 %v3074_v6, %s5023_s18  ;;  %3439 = vrot.lane.b32.xlu1 %v7200_v51, %s5021_s12 }
 0x601   :  { %v3468_v8 = vpop.permute.xlu1 %3467  ;;  %v3514_v61 = vpop.permute.xlu0 %3513 }
 0x602   :  { %v3834_v26 = vsel %vm2368_vm11, %v3802_v46, %v3514_v61 }
 0x603   :  { %3485 = vrot.lane.b32.xlu0 %v7161_v36, %s5023_s18  ;;  %3483 = vrot.lane.b32.xlu1 %v7159_v31, %s5023_s18 }
 0x605   :  { %v7209_v19 = vpop.permute.xlu1 %3471  ;;  %v7211_v10 = vpop.permute.xlu0 %3517 }
 0x607   :  { %3529 = vrot.lane.b32.xlu0 %v3106_v18, %s5027_s2  ;;  %3487 = vrot.lane.b32.xlu1 %v3172_v59, %s5023_s18 }
 0x609   :  { %v3516_v6 = vpop.permute.xlu1 %3515  ;;  %v3562_v52 = vpop.permute.xlu0 %3561 }
 0x60a   :  { %v3866_v41 = vsel %vm2401_vm12, %v3834_v26, %v3562_v52  ;;  %v3700_v26 = vsel %vm7780_vm1, %v7019_v47, %v7155_v37 }
 0x60b   :  { %3533 = vrot.lane.b32.xlu0 %v7182_v0, %s5027_s2  ;;  %3531 = vrot.lane.b32.xlu1 %v7171_v1, %s5027_s2 }
 0x60d   :  { %v7219_v38 = vpop.permute.xlu1 %3519  ;;  %v7221_v7 = vpop.permute.xlu0 %3565 }
 0x60f   :  { %3577 = vrot.lane.b32.xlu0 %v7190_v29, %s5024_s1  ;;  %3535 = vrot.lane.b32.xlu1 %v7223_v30, %s5027_s2 }
 0x611   :  { %v3564_v18 = vpop.permute.xlu1 %3563  ;;  %v3610_v44 = vpop.permute.xlu0 %3609 }
 0x612   :  { %v3898_v20 = vsel %vm2434_vm13, %v3866_v41, %v3610_v44  ;;  %v3096_v41 = vld [vmem:[#allocation3 + $0x1a1] sm:$0xff] }
 0x613   :  { %3581 = vrot.lane.b32.xlu0 %v7200_v51, %s5024_s1  ;;  %3579 = vrot.lane.b32.xlu1 %v7188_v27, %s5024_s1 }
 0x615   :  { %v3568_v12 = vpop.permute.xlu1 %3567  ;;  %v3614_v23 = vpop.permute.xlu0 %3613 }
 0x617   :  { %3625 = vrot.lane.b32.xlu0 %v7159_v31, %s5025_s22  ;;  %3583 = vrot.lane.b32.xlu1 %v7233_v13, %s5024_s1  ;;  %v3740_v31 = vsel %vm1176_vm4, %v3694_v54, %v7167_v43 }
 0x618   :  { %v3772_v22 = vsel %vm1242_vm6, %v3740_v31, %v3420_v17 }
 0x619   :  { %v3612_v45 = vpop.permute.xlu1 %3611  ;;  %v3658_v49 = vpop.permute.xlu0 %3657 }
 0x61b   :  { %3629 = vrot.lane.b32.xlu0 %v3172_v59, %s5025_s22  ;;  %3627 = vrot.lane.b32.xlu1 %v7161_v36, %s5025_s22  ;;  %v3804_v36 = vsel %vm1308_vm8, %v3772_v22, %v3468_v8  ;;  %v3930_v8 = vsel %vm2467_vm14, %v3898_v20, %v3658_v49  ;;  %v3744_v49 = vsel %vm1176_vm4, %v3700_v26, %v7176_v25  ;;  %v3063_v25 = vld [vmem:[#allocation3 + $0x188] sm:$0xff]  ;;  %v3128_v26 = vld [vmem:[#allocation3 + $0x1b7] sm:$0xff] }
 0x61c   :  { %v3836_v62 = vsel %vm2368_vm11, %v3804_v36, %v3516_v6 }
 0x61d   :  { %v3616_v34 = vpop.permute.xlu1 %3615  ;;  %v7254_v15 = vpop.permute.xlu0 %3329  ;;  %v3868_v43 = vsel %vm2401_vm12, %v3836_v62, %v3564_v18 }
 0x61e   :  { %v3900_v60 = vsel %vm2434_vm13, %v3868_v43, %v3612_v45 }
 0x61f   :  { %3673 = vrot.lane.b32.xlu0 %v7171_v1, %s5026_s23  ;;  %3631 = vrot.lane.b32.xlu1 %v7256_v32, %s5025_s22  ;;  %v3697_v1 = vsel %vm7780_vm1, %v7032_v58, %v7151_v33  ;;  %v3776_v58 = vsel %vm1242_vm6, %v3744_v49, %v7196_v5  ;;  %v3144_v49 = vpack.c.bf16 %v3128_v26, %v3128_v26 }
 0x620   :  { %v3742_v45 = vsel %vm1176_vm4, %v3697_v1, %v7157_v56  ;;  %v3808_v56 = vsel %vm1308_vm8, %v3776_v58, %v7209_v19 }
 0x621   :  { %v3660_v17 = vpop.permute.xlu1 %3659  ;;  %v3662_v14 = vpop.permute.xlu0 %3661  ;;  %v3774_v52 = vsel %vm1242_vm6, %v3742_v45, %v7178_v3  ;;  %v3840_v5 = vsel %vm2368_vm11, %v3808_v56, %v7219_v38  ;;  %v7313_v38 = vpack.c.bf16 %v3063_v25, %v3063_v25 }
 0x622   :  { %v3932_v61 = vsel %vm2467_vm14, %v3900_v60, %v3660_v17  ;;  %v3806_v37 = vsel %vm1308_vm8, %v3774_v52, %v7198_v4  ;;  %v7336_v60 = vpack.c.bf16 %v3096_v41, %v3096_v41  ;;  %v3126_v17 = vld [vmem:[#allocation3 + $0x187] sm:$0xff] }
 0x623   :  { %v4539_v6 = vcombine.low %v3930_v8, %v3932_v61  ;;  %3345 = vrot.lane.b32.xlu0 %v3172_v59, %s5017_s29  ;;  %3675 = vrot.lane.b32.xlu1 %v7182_v0, %s5026_s23  ;;  %v3284_v0 = vld [vmem:[#allocation3 + $0x171] sm:$0xff]  ;;  %v3838_v3 = vsel %vm2368_vm11, %v3806_v37, %v7211_v10  ;;  %v3872_v59 = vsel %vm2401_vm12, %v3840_v5, %v3568_v12 }
 0x624   :  { %v3870_v4 = vsel %vm2401_vm12, %v3838_v3, %v7221_v7  ;;  %v3904_v18 = vsel %vm2434_vm13, %v3872_v59, %v3616_v34  ;;  %v3300_v54 = vpack.c.bf16 %v3284_v0, %v3284_v0  ;;  %v7323_v7 = vpack.c.bf16 %v3064_v53, %v3064_v53  ;;  %v3160_v37 = vld [vmem:[#allocation3 + $0x1b8] sm:$0xff] }
 0x625   :  { %v7289_v33 = vpop.permute.xlu1 %3331  ;;  %4795 = vmatprep.mubr.msk.bf16.mxu0 %vm7797_vm10, %v4539_v6  ;;  %v7292_v47 = vpop.permute.xlu0 %3333  ;;  %v3902_v19 = vsel %vm2434_vm13, %v3870_v4, %v3614_v23  ;;  %v3095_v23 = vld [vmem:[#allocation3 + $0x189] sm:$0xff]  ;;  %v7342_v61 = vpack.c.bf16 %v3126_v17, %v3126_v17  ;;  %v3176_v25 = vpack.c.bf16 %v3160_v37, %v3160_v37  ;;  %v3192_v4 = vld [vmem:[#allocation3 + $0x1b9] sm:$0xff] }
 0x626   :  { %v3934_v57 = vsel %vm2467_vm14, %v3902_v19, %v3662_v14  ;;  %v7329_v62 = vpack.c.bf16 %v3095_v23, %v3095_v23  ;;  %v3127_v14 = vld [vmem:[#allocation3 + $0x19f] sm:$0xff]  ;;  %v3208_v19 = vpack.c.bf16 %v3192_v4, %v3192_v4  ;;  %v3706_v53 = vsel %vm7780_vm1, %v7071_v35, %v7289_v33 }
 0x627   :  { %3677 = vrot.lane.b32.xlu0 %v7223_v30, %s5026_s23  ;;  %3347 = vrot.lane.b32.xlu1 %v7256_v32, %s5017_s29  ;;  %v7344_v1 = vpack.c.bf16 %v3127_v14, %v3127_v14 }
 0x629   :  { %v3664_v44 = vpop.permute.xlu1 %3663  ;;  %v7311_v10 = vpop.permute.xlu0 %3377 }
 0x62a   :  { %v3936_v31 = vsel %vm2467_vm14, %v3904_v18, %v3664_v44 }
 0x62b   :  { %v4540_v22 = vcombine.low %v3934_v57, %v3936_v31  ;;  %3679 = vrot.lane.b32.xlu1 %v3300_v54, %s5026_s23  ;;  %3349 = vrot.lane.b32.xlu0 %v7313_v38, %s5017_s29  ;;  %v3703_v31 = vsel %vm7780_vm1, %v7039_v16, %v7254_v15 }
 0x62d   :  { %v3336_v12 = vpop.permute.xlu1 %3335  ;;  %4796 = vmatmul.mubr.msk.bf16.vlgmr.msra.gmra.mrb[20].mxu0 %vm7798_vm0, %v4540_v22  ;;  %v7321_v34 = vpop.permute.xlu0 %3381 }
 0x62e   :  { %v3712_v18 = vsel %vm7780_vm1, %v7103_v55, %v3336_v12  ;;  %v3746_v55 = vsel %vm1176_vm4, %v3703_v31, %v7311_v10  ;;  %v3709_v10 = vsel %vm7780_vm1, %v7108_v9, %v7292_v47 }
 0x62f   :  { %3351 = vrot.lane.b32.xlu1 %v7323_v7, %s5017_s29  ;;  %3393 = vrot.lane.b32.xlu0 %v7223_v30, %s5019_s21 }
 0x631   :  { %v3380_v46 = vpop.permute.xlu1 %3379  ;;  %v3426_v36 = vpop.permute.xlu0 %3425 }
 0x632   :  { %v3748_v12 = vsel %vm1176_vm4, %v3706_v53, %v3380_v46  ;;  %v3778_v15 = vsel %vm1242_vm6, %v3746_v55, %v3426_v36  ;;  %v3288_v36 = vld [vmem:[#allocation3 + $0x1d1] sm:$0xff] }
 0x633   :  { %3395 = vrot.lane.b32.xlu1 %v3300_v54, %s5019_s21  ;;  %3397 = vrot.lane.b32.xlu0 %v7329_v62, %s5019_s21  ;;  %v3304_v37 = vpack.c.bf16 %v3288_v36, %v3288_v36 }
 0x635   :  { %v3384_v43 = vpop.permute.xlu1 %3383  ;;  %v7334_v20 = vpop.permute.xlu0 %3429 }
 0x636   :  { %v3752_v57 = vsel %vm1176_vm4, %v3712_v18, %v3384_v43 }
 0x637   :  { %3399 = vrot.lane.b32.xlu1 %v7336_v60, %s5019_s21  ;;  %3441 = vrot.lane.b32.xlu0 %v7233_v13, %s5021_s12 }
 0x639   :  { %v3428_v30 = vpop.permute.xlu1 %3427  ;;  %v3474_v8 = vpop.permute.xlu0 %3473 }
 0x63a   :  { %v3780_v16 = vsel %vm1242_vm6, %v3748_v12, %v3428_v30  ;;  %v3810_v43 = vsel %vm1308_vm8, %v3778_v15, %v3474_v8  ;;  %v3750_v30 = vsel %vm1176_vm4, %v3709_v10, %v7321_v34 }
 0x63b   :  { %3443 = vrot.lane.b32.xlu1 %v7342_v61, %s5021_s12  ;;  %3445 = vrot.lane.b32.xlu0 %v7344_v1, %s5021_s12  ;;  %v3782_v47 = vsel %vm1242_vm6, %v3750_v30, %v7334_v20 }
 0x63d   :  { %v3432_v6 = vpop.permute.xlu1 %3431  ;;  %v3478_v45 = vpop.permute.xlu0 %3477 }
 0x63e   :  { %v3784_v22 = vsel %vm1242_vm6, %v3752_v57, %v3432_v6 }
 0x63f   :  { %3447 = vrot.lane.b32.xlu1 %v3144_v49, %s5021_s12  ;;  %3489 = vrot.lane.b32.xlu0 %v7256_v32, %s5023_s18 }
 0x641   :  { %v3476_v52 = vpop.permute.xlu1 %3475  ;;  %v3522_v58 = vpop.permute.xlu0 %3521 }
 0x642   :  { %v3812_v17 = vsel %vm1308_vm8, %v3780_v16, %v3476_v52  ;;  %v3842_v46 = vsel %vm2368_vm11, %v3810_v43, %v3522_v58  ;;  %v3814_v52 = vsel %vm1308_vm8, %v3782_v47, %v3478_v45  ;;  %v3025_v43 = vld [vmem:[#allocation3 + $0xf7] sm:$0xff] }
 0x643   :  { %3491 = vrot.lane.b32.xlu1 %v7313_v38, %s5023_s18  ;;  %3493 = vrot.lane.b32.xlu0 %v7323_v7, %s5023_s18 }
 0x645   :  { %v3480_v56 = vpop.permute.xlu1 %3479  ;;  %v3526_v0 = vpop.permute.xlu0 %3525 }
 0x646   :  { %v3816_v23 = vsel %vm1308_vm8, %v3784_v22, %v3480_v56 }
 0x647   :  { %3495 = vrot.lane.b32.xlu1 %v3176_v25, %s5023_s18  ;;  %3537 = vrot.lane.b32.xlu0 %v3300_v54, %s5027_s2 }
 0x649   :  { %v3524_v3 = vpop.permute.xlu1 %3523  ;;  %v3570_v5 = vpop.permute.xlu0 %3569 }
 0x64a   :  { %v3844_v14 = vsel %vm2368_vm11, %v3812_v17, %v3524_v3  ;;  %v3874_v8 = vsel %vm2401_vm12, %v3842_v46, %v3570_v5 }
 0x64b   :  { %3539 = vrot.lane.b32.xlu1 %v7329_v62, %s5027_s2  ;;  %3541 = vrot.lane.b32.xlu0 %v7336_v60, %s5027_s2 }
 0x64d   :  { %v3528_v32 = vpop.permute.xlu1 %3527  ;;  %v3574_v59 = vpop.permute.xlu0 %3573 }
 0x64e   :  { %v3848_v35 = vsel %vm2368_vm11, %v3816_v23, %v3528_v32 }
 0x64f   :  { %3543 = vrot.lane.b32.xlu1 %v3208_v19, %s5027_s2  ;;  %3585 = vrot.lane.b32.xlu0 %v7342_v61, %s5024_s1  ;;  %v3880_v26 = vsel %vm2401_vm12, %v3848_v35, %v7115_v42  ;;  %v3846_v42 = vsel %vm2368_vm11, %v3814_v52, %v3526_v0 }
 0x650   :  { %v3912_v20 = vsel %vm2434_vm13, %v3880_v26, %v7119_v39  ;;  %v3878_v3 = vsel %vm2401_vm12, %v3846_v42, %v3574_v59 }
 0x651   :  { %v3572_v44 = vpop.permute.xlu1 %3571  ;;  %v3618_v54 = vpop.permute.xlu0 %3617  ;;  %v3944_v0 = vsel %vm2467_vm14, %v3912_v20, %v7128_v11 }
 0x652   :  { %v3876_v9 = vsel %vm2401_vm12, %v3844_v14, %v3572_v44  ;;  %v3906_v6 = vsel %vm2434_vm13, %v3874_v8, %v3618_v54 }
 0x653   :  { %3587 = vrot.lane.b32.xlu1 %v7344_v1, %s5024_s1  ;;  %3589 = vrot.lane.b32.xlu0 %v3144_v49, %s5024_s1 }
 0x655   :  { %v3620_v33 = vpop.permute.xlu1 %3619  ;;  %v3622_v41 = vpop.permute.xlu0 %3621 }
 0x656   :  { %v3910_v45 = vsel %vm2434_vm13, %v3878_v3, %v3622_v41 }
 0x657   :  { %3635 = vrot.lane.b32.xlu1 %v7323_v7, %s5025_s22  ;;  %3633 = vrot.lane.b32.xlu0 %v7313_v38, %s5025_s22  ;;  %v3908_v7 = vsel %vm2434_vm13, %v3876_v9, %v3620_v33 }
 0x659   :  { %v3668_v49 = vpop.permute.xlu1 %3667  ;;  %v3666_v38 = vpop.permute.xlu0 %3665 }
 0x65a   :  { %v3940_v34 = vsel %vm2467_vm14, %v3908_v7, %v3668_v49  ;;  %v3938_v58 = vsel %vm2467_vm14, %v3906_v6, %v3666_v38 }
 0x65b   :  { %v4541_v56 = vcombine.low %v3938_v58, %v3940_v34  ;;  %3683 = vrot.lane.b32.xlu1 %v7336_v60, %s5026_s23  ;;  %3637 = vrot.lane.b32.xlu0 %v3176_v25, %s5025_s22 }
 0x65d   :  { %v3340_v5 = vpop.permute.xlu1 %3339  ;;  %4799 = vmatprep.mubr.msk.bf16.mxu0 %vm7799_vm3, %v4541_v56  ;;  %v3670_v4 = vpop.permute.xlu0 %3669 }
 0x65e   :  { %v3942_v32 = vsel %vm2467_vm14, %v3910_v45, %v3670_v4  ;;  %v3718_v30 = vsel %vm7780_vm1, %v7180_v40, %v3340_v5 }
 0x65f   :  { %v4542_v18 = vcombine.low %v3942_v32, %v3944_v0  ;;  %3687 = vrot.lane.b32.xlu1 %v3304_v37, %s5026_s23  ;;  %3681 = vrot.lane.b32.xlu0 %v7329_v62, %s5026_s23 }
 0x661   :  { %v3344_v39 = vpop.permute.xlu1 %3343  ;;  %4800 = vmatmul.mubr.msk.bf16.gmra.mrb[24].mxu0 %vm7800_vm5, %v4542_v18  ;;  %v3342_v60 = vpop.permute.xlu0 %3341 }
 0x662   :  { %v3724_v3 = vsel %vm7780_vm1, %v7188_v27, %v3344_v39  ;;  %v3721_v45 = vsel %vm7780_vm1, %v7190_v29, %v3342_v60 }
 0x663   :  { %3685 = vrot.lane.b32.xlu0 %v3208_v19, %s5026_s23  ;;  %v3041_v19 = vpack.c.bf16 %v3025_v43, %v3025_v43 }
 0x665   :  { %v3388_v25 = vpop.permute.xlu1 %3387  ;;  %v3390_v59 = vpop.permute.xlu0 %3389  ;;  %v3715_v46 = vsel %vm7780_vm1, %v3041_v19, %v7136_v24 }
 0x666   :  { %v3754_v8 = vsel %vm1176_vm4, %v3715_v46, %v7145_v63  ;;  %v3756_v26 = vsel %vm1176_vm4, %v3718_v30, %v3388_v25  ;;  %v3758_v4 = vsel %vm1176_vm4, %v3721_v45, %v3390_v59 }
 0x669   :  { %v3392_v44 = vpop.permute.xlu1 %3391  ;;  %v3434_v54 = vpop.permute.xlu0 %3433 }
 0x66a   :  { %v3786_v9 = vsel %vm1242_vm6, %v3754_v8, %v3434_v54  ;;  %v3760_v0 = vsel %vm1176_vm4, %v3724_v3, %v3392_v44 }
 0x66d   :  { %v3436_v57 = vpop.permute.xlu1 %3435  ;;  %v3438_v11 = vpop.permute.xlu0 %3437 }
 0x66e   :  { %v3788_v47 = vsel %vm1242_vm6, %v3756_v26, %v3436_v57  ;;  %v3790_v32 = vsel %vm1242_vm6, %v3758_v4, %v3438_v11 }
 0x671   :  { %v3440_v31 = vpop.permute.xlu1 %3439  ;;  %v3482_v53 = vpop.permute.xlu0 %3481 }
 0x672   :  { %v3818_v49 = vsel %vm1308_vm8, %v3786_v9, %v3482_v53  ;;  %v3792_v18 = vsel %vm1242_vm6, %v3760_v0, %v3440_v31 }
 0x675   :  { %v3484_v22 = vpop.permute.xlu1 %3483  ;;  %v3486_v55 = vpop.permute.xlu0 %3485 }
 0x676   :  { %v3820_v24 = vsel %vm1308_vm8, %v3788_v47, %v3484_v22  ;;  %v3822_v57 = vsel %vm1308_vm8, %v3790_v32, %v3486_v55 }
 0x679   :  { %v3488_v12 = vpop.permute.xlu1 %3487  ;;  %v3530_v23 = vpop.permute.xlu0 %3529 }
 0x67a   :  { %v3850_v38 = vsel %vm2368_vm11, %v3818_v49, %v3530_v23  ;;  %v3824_v27 = vsel %vm1308_vm8, %v3792_v18, %v3488_v12 }
 0x67d   :  { %v3532_v15 = vpop.permute.xlu1 %3531  ;;  %v3534_v62 = vpop.permute.xlu0 %3533 }
 0x67e   :  { %v3852_v52 = vsel %vm2368_vm11, %v3820_v24, %v3532_v15  ;;  %v3854_v39 = vsel %vm2368_vm11, %v3822_v57, %v3534_v62 }
 0x681   :  { %v3536_v16 = vpop.permute.xlu1 %3535  ;;  %v3578_v35 = vpop.permute.xlu0 %3577 }
 0x682   :  { %v3882_v40 = vsel %vm2401_vm12, %v3850_v38, %v3578_v35  ;;  %v3856_v29 = vsel %vm2368_vm11, %v3824_v27, %v3536_v16 }
 0x685   :  { %v3580_v33 = vpop.permute.xlu1 %3579  ;;  %v3582_v41 = vpop.permute.xlu0 %3581 }
 0x686   :  { %v3884_v63 = vsel %vm2401_vm12, %v3852_v52, %v3580_v33  ;;  %v3886_v60 = vsel %vm2401_vm12, %v3854_v39, %v3582_v41 }
 0x689   :  { %v3584_v17 = vpop.permute.xlu1 %3583  ;;  %v3626_v10 = vpop.permute.xlu0 %3625 }
 0x68a   :  { %v3914_v34 = vsel %vm2434_vm13, %v3882_v40, %v3626_v10  ;;  %v3888_v59 = vsel %vm2401_vm12, %v3856_v29, %v3584_v17 }
 0x68d   :  { %v3628_v14 = vpop.permute.xlu1 %3627  ;;  %v3630_v36 = vpop.permute.xlu0 %3629 }
 0x68e   :  { %v3916_v58 = vsel %vm2434_vm13, %v3884_v63, %v3628_v14  ;;  %v3918_v44 = vsel %vm2434_vm13, %v3886_v60, %v3630_v36 }
 0x691   :  { %v3632_v6 = vpop.permute.xlu1 %3631  ;;  %v3674_v7 = vpop.permute.xlu0 %3673 }
 0x692   :  { %v3946_v56 = vsel %vm2467_vm14, %v3914_v34, %v3674_v7  ;;  %v3920_v11 = vsel %vm2434_vm13, %v3888_v59, %v3632_v6 }
 0x695   :  { %v3676_v37 = vpop.permute.xlu1 %3675  ;;  %v3346_v42 = vpop.permute.xlu0 %3345 }
 0x696   :  { %v3948_v20 = vsel %vm2467_vm14, %v3916_v58, %v3676_v37  ;;  %v3727_v24 = vsel %vm7780_vm1, %v7200_v51, %v3346_v42 }
 0x697   :  { %v4543_v5 = vcombine.low %v3946_v56, %v3948_v20 }
 0x699   :  { %v3348_v25 = vpop.permute.xlu1 %3347  ;;  %4803 = vmatprep.mubr.msk.bf16.mxu0 %vm7801_vm7, %v4543_v5  ;;  %v3678_v54 = vpop.permute.xlu0 %3677 }
 0x69a   :  { %v3950_v22 = vsel %vm2467_vm14, %v3918_v44, %v3678_v54  ;;  %v3730_v38 = vsel %vm7780_vm1, %v7233_v13, %v3348_v25 }
 0x69d   :  { %v3680_v31 = vpop.permute.xlu1 %3679  ;;  %v3350_v53 = vpop.permute.xlu0 %3349 }
 0x69e   :  { %v3952_v55 = vsel %vm2467_vm14, %v3920_v11, %v3680_v31  ;;  %v3733_v3 = vsel %vm7780_vm1, %v7342_v61, %v3350_v53 }
 0x69f   :  { %v4544_v23 = vcombine.low %v3950_v22, %v3952_v55 }
 0x6a1   :  { %v3352_v12 = vpop.permute.xlu1 %3351  ;;  %4804 = vmatmul.mubr.msk.bf16.gmra.mrb[28].mxu0 %vm7802_vm9, %v4544_v23  ;;  %v3394_v15 = vpop.permute.xlu0 %3393 }
 0x6a2   :  { %v3736_v52 = vsel %vm7780_vm1, %v7344_v1, %v3352_v12  ;;  %v3762_v40 = vsel %vm1176_vm4, %v3727_v24, %v3394_v15  ;;  %vm7823_vm1 = vcmask 64512  }
 0x6a5   :  { %v3396_v62 = vpop.permute.xlu1 %3395  ;;  %v3398_v16 = vpop.permute.xlu0 %3397 }
 0x6a6   :  { %v3764_v63 = vsel %vm1176_vm4, %v3730_v38, %v3396_v62  ;;  %v3766_v0 = vsel %vm1176_vm4, %v3733_v3, %v3398_v16 }
 0x6a9   :  { %v3400_v35 = vpop.permute.xlu1 %3399  ;;  %v3442_v33 = vpop.permute.xlu0 %3441 }
 0x6aa   :  { %v3768_v34 = vsel %vm1176_vm4, %v3736_v52, %v3400_v35  ;;  %v3794_v58 = vsel %vm1242_vm6, %v3762_v40, %v3442_v33  ;;  %vm7803_vm4 = vmmov %vm7798_vm0 }
 0x6ad   :  { %v3444_v41 = vpop.permute.xlu1 %3443  ;;  %v3446_v43 = vpop.permute.xlu0 %3445 }
 0x6ae   :  { %v3796_v37 = vsel %vm1242_vm6, %v3764_v63, %v3444_v41  ;;  %v3798_v25 = vsel %vm1242_vm6, %v3766_v0, %v3446_v43 }
 0x6b1   :  { %v3448_v19 = vpop.permute.xlu1 %3447  ;;  %v3490_v17 = vpop.permute.xlu0 %3489 }
 0x6b2   :  { %v3800_v56 = vsel %vm1242_vm6, %v3768_v34, %v3448_v19  ;;  %v3826_v42 = vsel %vm1308_vm8, %v3794_v58, %v3490_v17  ;;  %vm7804_vm6 = vmmov %vm7798_vm0 }
 0x6b5   :  { %v3492_v10 = vpop.permute.xlu1 %3491  ;;  %v3494_v46 = vpop.permute.xlu0 %3493 }
 0x6b6   :  { %v3828_v13 = vsel %vm1308_vm8, %v3796_v37, %v3492_v10  ;;  %v3830_v61 = vsel %vm1308_vm8, %v3798_v25, %v3494_v46  ;;  %v7806_v46 = vmov 0.0|0.0  }
 0x6b9   :  { %v3496_v14 = vpop.permute.xlu1 %3495  ;;  %v3538_v36 = vpop.permute.xlu0 %3537 }
 0x6ba   :  { %v3832_v1 = vsel %vm1308_vm8, %v3800_v56, %v3496_v14  ;;  %v3858_v45 = vsel %vm2368_vm11, %v3826_v42, %v3538_v36  ;;  %vm7805_vm8 = vmmov 0  }
 0x6bd   :  { %v3540_v30 = vpop.permute.xlu1 %3539  ;;  %v3542_v8 = vpop.permute.xlu0 %3541 }
 0x6be   :  { %v3860_v5 = vsel %vm2368_vm11, %v3828_v13, %v3540_v30  ;;  %v3862_v59 = vsel %vm2368_vm11, %v3830_v61, %v3542_v8 }
 0x6c1   :  { %v3544_v26 = vpop.permute.xlu1 %3543  ;;  %v3586_v9 = vpop.permute.xlu0 %3585 }
 0x6c2   :  { %v3864_v4 = vsel %vm2368_vm11, %v3832_v1, %v3544_v26  ;;  %v3890_v32 = vsel %vm2401_vm12, %v3858_v45, %v3586_v9 }
 0x6c3   :  { %v3896_v39 = vsel %vm2401_vm12, %v3864_v4, %v7134_v2 }
 0x6c4   :  { %v3928_v22 = vsel %vm2434_vm13, %v3896_v39, %v7143_v28  ;;  %v7807_v39 = vmov 1.0  }
 0x6c5   :  { %v3588_v47 = vpop.permute.xlu1 %3587  ;;  %v3590_v6 = vpop.permute.xlu0 %3589 }
 0x6c6   :  { %v3892_v18 = vsel %vm2401_vm12, %v3860_v5, %v3588_v47  ;;  %v3894_v31 = vsel %vm2401_vm12, %v3862_v59, %v3590_v6 }
 0x6c9   :  { %v3636_v7 = vpop.permute.xlu1 %3635  ;;  %v3634_v49 = vpop.permute.xlu0 %3633 }
 0x6ca   :  { %v3924_v54 = vsel %vm2434_vm13, %v3892_v18, %v3636_v7  ;;  %v3922_v57 = vsel %vm2434_vm13, %v3890_v32, %v3634_v49 }
 0x6cd   :  { %v3684_v20 = vpop.permute.xlu1 %3683  ;;  %v3638_v51 = vpop.permute.xlu0 %3637 }
 0x6ce   :  { %v3956_v29 = vsel %vm2467_vm14, %v3924_v54, %v3684_v20  ;;  %v3926_v53 = vsel %vm2434_vm13, %v3894_v31, %v3638_v51 }
 0x6d1   :  { %v3682_v27 = vpop.permute.xlu0 %3681  ;;  %v3688_v44 = vpop.permute.xlu1 %3687 }
 0x6d2   :  { %v3954_v60 = vsel %vm2467_vm14, %v3922_v57, %v3682_v27  ;;  %v3960_v2 = vsel %vm2467_vm14, %v3928_v22, %v3688_v44 }
 0x6d3   :  { %v4545_v11 = vcombine.low %v3954_v60, %v3956_v29 }
 0x6d5   :  { %4807 = vmatprep.mubr.msk.bf16.mxu0 %vm7803_vm4, %v4545_v11  ;;  %v3686_v55 = vpop.permute.xlu0 %3685 }
 0x6d6   :  { %v3958_v23 = vsel %vm2467_vm14, %v3926_v53, %v3686_v55 }
 0x6d7   :  { %v4546_v12 = vcombine.low %v3958_v23, %v3960_v2 }
 0x6d9   :  { %4808 = vmatmul.mubr.msk.bf16.gmra.mrb[32].mxu0 %vm7804_vm6, %v4546_v12 }
 0x6da   :  { %4878 = vmatprep.mubr.msk.f32.mxu0 %vm7805_vm8, %v7796_v21 }
 0x700   :  { %v7508_v15 = vpop.f32.mrb[20].mxu0 }
 0x701   :  { %v7510_v62 = vpop.f32.mrb[21].mxu0  ;;  %v4233_v28 = vmul.f32 %v7508_v15, %v7508_v15 }
 0x702   :  { %v7512_v16 = vpop.f32.mrb[22].mxu0  ;;  %v4231_v21 = vmul.f32 %v7510_v62, %v7510_v62 }
 0x703   :  { %v4933_v35 = vpack.c.bf16 %v7512_v16, %v7508_v15  ;;  %v4234_v33 = vmul.f32 %v7512_v16, %v7512_v16  ;;  %v7520_v41 = vpop.f32.mrb[23].mxu0 }
 0x704   :  { %v4930_v43 = vpack.c.bf16 %v7520_v41, %v7510_v62  ;;  %v4232_v19 = vmul.f32 %v7520_v41, %v7520_v41 }
 0x705   :  { %v4957_v17 = vpack.c.bf16 %v4234_v33, %v4233_v28 }
 0x706   :  { %v4954_v10 = vpack.c.bf16 %v4232_v19, %v4231_v21  ;;  %4931 = vmatpush3.bf16.msra.mxu1 %v4930_v43 }
 0x707   :  { %4932 = vmatprep.subr.bf16.mxu1 %v7806_v46 }
 0x708   :  { %4955 = vmatpush3.bf16.msra.mxu0 %v4954_v10 }
 0x709   :  { %4956 = vmatprep.subr.bf16.mxu0 %v7806_v46 }
 0x70a   :  { %4934 = vmatpush3.bf16.msra.mxu1 %v4933_v35 }
 0x70b   :  { %4935 = vmatprep.subr.bf16.mxu1 %v7806_v46 }
 0x70c   :  { %4958 = vmatpush3.bf16.msra.mxu0 %v4957_v17 }
 0x70d   :  { %4959 = vmatprep.subr.bf16.mxu0 %v7806_v46 }
 0x734   :  { %v7532_v14 = vpop.f32.mrb[24].mxu0 }
 0x735   :  { %v7534_v36 = vpop.f32.mrb[25].mxu0  ;;  %v4237_v8 = vmul.f32 %v7532_v14, %v7532_v14 }
 0x736   :  { %v7536_v30 = vpop.f32.mrb[26].mxu0  ;;  %v4235_v6 = vmul.f32 %v7534_v36, %v7534_v36 }
 0x737   :  { %v4939_v26 = vpack.c.bf16 %v7536_v30, %v7532_v14  ;;  %v4238_v9 = vmul.f32 %v7536_v30, %v7536_v30  ;;  %v7544_v47 = vpop.f32.mrb[27].mxu0 }
 0x738   :  { %v4936_v7 = vpack.c.bf16 %v7544_v47, %v7534_v36  ;;  %v4236_v49 = vmul.f32 %v7544_v47, %v7544_v47 }
 0x739   :  { %v4963_v24 = vpack.c.bf16 %v4238_v9, %v4237_v8 }
 0x73a   :  { %v4960_v38 = vpack.c.bf16 %v4236_v49, %v4235_v6  ;;  %4937 = vmatpush3.bf16.msra.mxu1 %v4936_v7 }
 0x73b   :  { %4938 = vmatprep.subr.bf16.mxu1 %v7806_v46 }
 0x73c   :  { %4961 = vmatpush3.bf16.msra.mxu0 %v4960_v38 }
 0x73d   :  { %4962 = vmatprep.subr.bf16.mxu0 %v7806_v46 }
 0x73e   :  { %4940 = vmatpush3.bf16.msra.mxu1 %v4939_v26  ;;  %v7625_v26 = vstv %s7753_s10 }
 0x73f   :  { %4941 = vmatprep.subr.bf16.mxu1 %v7806_v46 }
 0x740   :  { %4964 = vmatpush3.bf16.msra.mxu0 %v4963_v24 }
 0x741   :  { %4965 = vmatprep.subr.bf16.mxu0 %v7806_v46 }
 0x774   :  { %v7556_v52 = vpop.f32.mrb[28].mxu0 }
 0x775   :  { %v7558_v40 = vpop.f32.mrb[29].mxu0  ;;  %v4241_v34 = vmul.f32 %v7556_v52, %v7556_v52 }
 0x776   :  { %v7560_v63 = vpop.f32.mrb[30].mxu0  ;;  %v4239_v20 = vmul.f32 %v7558_v40, %v7558_v40 }
 0x777   :  { %v4945_v58 = vpack.c.bf16 %v7560_v63, %v7556_v52  ;;  %v4242_v37 = vmul.f32 %v7560_v63, %v7560_v63  ;;  %v7568_v56 = vpop.f32.mrb[31].mxu0 }
 0x778   :  { %v4942_v51 = vpack.c.bf16 %v7568_v56, %v7558_v40  ;;  %v4240_v42 = vmul.f32 %v7568_v56, %v7568_v56 }
 0x779   :  { %v4969_v13 = vpack.c.bf16 %v4242_v37, %v4241_v34 }
 0x77a   :  { %v4966_v1 = vpack.c.bf16 %v4240_v42, %v4239_v20  ;;  %4943 = vmatpush3.bf16.msra.mxu1 %v4942_v51 }
 0x77b   :  { %4944 = vmatprep.subr.bf16.mxu1 %v7806_v46 }
 0x77c   :  { %4967 = vmatpush3.bf16.msra.mxu0 %v4966_v1 }
 0x77d   :  { %4968 = vmatprep.subr.bf16.mxu0 %v7806_v46 }
 0x77e   :  { %4946 = vmatpush3.bf16.msra.mxu1 %v4945_v58 }
 0x77f   :  { %4947 = vmatprep.subr.bf16.mxu1 %v7806_v46 }
 0x780   :  { %4970 = vmatpush3.bf16.msra.mxu0 %v4969_v13 }
 0x781   :  { %4971 = vmatprep.subr.bf16.mxu0 %v7806_v46 }
 0x7ac   :  { %v7580_v3 = vpop.f32.mrb[32].mxu0 }
 0x7ad   :  { %v7582_v45 = vpop.f32.mrb[33].mxu0  ;;  %v4245_v4 = vmul.f32 %v7580_v3, %v7580_v3 }
 0x7ae   :  { %v7584_v5 = vpop.f32.mrb[34].mxu0  ;;  %v4243_v25 = vmul.f32 %v7582_v45, %v7582_v45 }
 0x7af   :  { %v4951_v0 = vpack.c.bf16 %v7584_v5, %v7580_v3  ;;  %v4246_v32 = vmul.f32 %v7584_v5, %v7584_v5  ;;  %v7592_v18 = vpop.f32.mrb[35].mxu0 }
 0x7b0   :  { %v4948_v54 = vpack.c.bf16 %v7592_v18, %v7582_v45  ;;  %v4244_v57 = vmul.f32 %v7592_v18, %v7592_v18 }
 0x7b1   :  { %v4975_v27 = vpack.c.bf16 %v4246_v32, %v4245_v4  ;;  %v4561_v32 = vld [vmem:[%s7755_s8] ss:$0 sm:$0xff] }
 0x7b2   :  { %v4972_v61 = vpack.c.bf16 %v4244_v57, %v4243_v25  ;;  %4949 = vmatpush3.bf16.msra.mxu1 %v4948_v54 }
 0x7b3   :  { %4950 = vmatprep.subr.bf16.mxu1 %v7806_v46 }
 0x7b4   :  { %4973 = vmatpush3.bf16.msra.mxu0 %v4972_v61 }
 0x7b5   :  { %4974 = vmatprep.subr.bf16.mxu0 %v7806_v46 }
 0x7b6   :  { %4952 = vmatpush3.bf16.msra.mxu1 %v4951_v0 }
 0x7b8   :  { %4976 = vmatpush3.bf16.msra.mxu0 %v4975_v27 }
 0x7b9   :  { %4844 = vmatmul.mubr.f32.vlgmr.msra.gmra.mrb[18].mxu1 %v7807_v39 }
 0x7bb   :  { %4879 = vmatmul.mubr.f32.vlgmr.msra.gmra.mrb[18].mxu0 %v7807_v39 }
 0x88c   :  { %v4227_v29 = vpop.f32.mrb[18].mxu1 }
 0x88d   :  { %v4317_v60 = vmul.f32 0.0078125, %v4227_v29  ;;  %v4845_v59 = vpop.f32.mrb[19].mxu1 }
 0x88e   :  { %v4313_v44 = vpop.f32.mrb[18].mxu0 }
 0x88f   :  { %v4325_v11 = vrot.slane %v4317_v60, %v6845_v48  ;;  %v4880_v31 = vpop.f32.mrb[19].mxu0  ;;  %v4319_v53 = vmul.f32 %v4317_v60, %v4317_v60  ;;  %v4318_v22 = vmul.f32 0.0078125, %v4313_v44 }
 0x891   :  { %v4326_v55 = vsub.f32 %v7510_v62, %v4325_v11  ;;  %v4327_v2 = vsub.f32 %v7520_v41, %v4325_v11  ;;  %v4328_v23 = vsub.f32 %v7508_v15, %v4325_v11  ;;  %v4329_v12 = vsub.f32 %v7512_v16, %v4325_v11 }
 0x892   :  { %v4330_v28 = vsub.f32 %v7534_v36, %v4325_v11  ;;  %v4331_v35 = vsub.f32 %v7544_v47, %v4325_v11  ;;  %v4332_v33 = vsub.f32 %v7532_v14, %v4325_v11  ;;  %v4333_v21 = vsub.f32 %v7536_v30, %v4325_v11 }
 0x893   :  { %v4334_v43 = vsub.f32 %v7558_v40, %v4325_v11  ;;  %v4335_v19 = vsub.f32 %v7568_v56, %v4325_v11  ;;  %v4336_v62 = vsub.f32 %v7556_v52, %v4325_v11  ;;  %v4337_v41 = vsub.f32 %v7560_v63, %v4325_v11  ;;  %v4560_v40 = vld [vmem:[%s7754_s7] ss:$0 sm:$0xff] }
 0x894   :  { %v4338_v15 = vsub.f32 %v7582_v45, %v4325_v11  ;;  %v4339_v16 = vsub.f32 %v7592_v18, %v4325_v11  ;;  %v4340_v17 = vsub.f32 %v7580_v3, %v4325_v11  ;;  %v4341_v10 = vsub.f32 %v7584_v5, %v4325_v11 }
 0x895   :  { %v4320_v46 = vsub.f32 %v4318_v22, %v4319_v53 }
 0x897   :  { %v4321_v14 = vmax.f32 %v4320_v46, 0.0  ;;  %v7811_v46 = vld [vmem:[#allocation10_spill] sm:$0xff] }
 0x899   :  { %v4342_v36 = vadd.f32 1e-05, %v4321_v14 }
 0x89b   :  { %5012 = vrsqrt.f32 %v4342_v36  ;;  %v7812_v36 = vld [vmem:[#allocation12_spill] sm:$0xff] }
 0x8a5   :  { %v5013_v30 = vpop.eup %5012 }
 0x8a6   :  { %v4347_v8 = vrot.slane %v5013_v30, %v6845_v48 }
 0x8a8   :  { %v4348_v9 = vmul.f32 %v4347_v8, %v4326_v55  ;;  %v4349_v47 = vmul.f32 %v4347_v8, %v4327_v2  ;;  %v4350_v6 = vmul.f32 %v4347_v8, %v4328_v23  ;;  %v4351_v7 = vmul.f32 %v4347_v8, %v4329_v12 }
 0x8a9   :  { %v4352_v49 = vmul.f32 %v4347_v8, %v4330_v28  ;;  %v4353_v24 = vmul.f32 %v4347_v8, %v4331_v35  ;;  %v4354_v38 = vmul.f32 %v4347_v8, %v4332_v33  ;;  %v4355_v52 = vmul.f32 %v4347_v8, %v4333_v21 }
 0x8aa   :  { %v4356_v63 = vmul.f32 %v4347_v8, %v4334_v43  ;;  %v4357_v34 = vmul.f32 %v4347_v8, %v4335_v19  ;;  %v4358_v48 = vmul.f32 %v4347_v8, %v4336_v62  ;;  %v4359_v58 = vmul.f32 %v4347_v8, %v4337_v41  ;;  %v7808_v62 = vld [vmem:[#allocation8_spill] sm:$0xff] }
 0x8ab   :  { %v4360_v37 = vmul.f32 %v4347_v8, %v4338_v15  ;;  %v4361_v56 = vmul.f32 %v4347_v8, %v4339_v16  ;;  %v4362_v20 = vmul.f32 %v4347_v8, %v4340_v17  ;;  %v4363_v51 = vmul.f32 %v4347_v8, %v4341_v10  ;;  %v7809_v15 = vld [vmem:[#allocation6_spill] sm:$0xff]  ;;  %v7810_v17 = vld [vmem:[#allocation7_spill] sm:$0xff]  ;;  %v7813_v8 = vld [vmem:[#allocation9_spill] sm:$0xff] }
 0x8ac   :  { %v4371_v42 = vmul.f32 %v4560_v40, %v4348_v9  ;;  %v4372_v13 = vmul.f32 %v4560_v40, %v4349_v47  ;;  %v4373_v1 = vmul.f32 %v4560_v40, %v4350_v6  ;;  %v4374_v3 = vmul.f32 %v4560_v40, %v4351_v7  ;;  %v7814_v47 = vld [vmem:[#allocation11_spill] sm:$0xff]  ;;  %v7815_v7 = vld [vmem:[#allocation14_spill] sm:$0xff] }
 0x8ad   :  { %v4375_v45 = vmul.f32 %v4560_v40, %v4352_v49  ;;  %v4376_v5 = vmul.f32 %v4560_v40, %v4353_v24  ;;  %v4377_v4 = vmul.f32 %v4560_v40, %v4354_v38  ;;  %v4378_v0 = vmul.f32 %v4560_v40, %v4355_v52  ;;  %v7816_v24 = vld [vmem:[#allocation16_spill] sm:$0xff]  ;;  %v7817_v52 = vld [vmem:[#allocation13_spill] sm:$0xff] }
 0x8ae   :  { %v4379_v18 = vmul.f32 %v4560_v40, %v4356_v63  ;;  %v4380_v25 = vmul.f32 %v4560_v40, %v4357_v34  ;;  %v4381_v54 = vmul.f32 %v4560_v40, %v4358_v48  ;;  %v4382_v57 = vmul.f32 %v4560_v40, %v4359_v58  ;;  %v7819_v34 = vld [vmem:[#allocation18_spill] sm:$0xff]  ;;  %v7820_v58 = vld [vmem:[#allocation20_spill] sm:$0xff] }
 0x8af   :  { %v4383_v27 = vmul.f32 %v4560_v40, %v4360_v37  ;;  %v4384_v61 = vmul.f32 %v4560_v40, %v4361_v56  ;;  %v4385_v39 = vmul.f32 %v4560_v40, %v4362_v20  ;;  %v4386_v29 = vmul.f32 %v4560_v40, %v4363_v51  ;;  %v7818_v40 = vld [vmem:[#allocation15_spill] sm:$0xff]  ;;  %v7821_v56 = vld [vmem:[#allocation17_spill] sm:$0xff] }
 0x8b0   :  { %v4394_v60 = vadd.f32 %v4561_v32, %v4371_v42  ;;  %v4395_v59 = vadd.f32 %v4561_v32, %v4372_v13  ;;  %v4396_v44 = vadd.f32 %v4561_v32, %v4373_v1  ;;  %v4397_v11 = vadd.f32 %v4561_v32, %v4374_v3  ;;  %v7822_v51 = vld [vmem:[#allocation19_spill] sm:$0xff] }
 0x8b1   :  { %v4398_v31 = vadd.f32 %v4561_v32, %v4375_v45  ;;  %v4399_v53 = vadd.f32 %v4561_v32, %v4376_v5  ;;  %v4400_v22 = vadd.f32 %v4561_v32, %v4377_v4  ;;  %v4401_v55 = vadd.f32 %v4561_v32, %v4378_v0 }
 0x8b2   :  { %v4402_v2 = vadd.f32 %v4561_v32, %v4379_v18  ;;  %v4403_v23 = vadd.f32 %v4561_v32, %v4380_v25  ;;  %v4404_v12 = vadd.f32 %v4561_v32, %v4381_v54  ;;  %v4405_v28 = vadd.f32 %v4561_v32, %v4382_v57 }
 0x8b3   :  { %v4406_v35 = vadd.f32 %v4561_v32, %v4383_v27  ;;  %v4407_v33 = vadd.f32 %v4561_v32, %v4384_v61  ;;  %v4408_v21 = vadd.f32 %v4561_v32, %v4385_v39  ;;  %v4409_v43 = vadd.f32 %v4561_v32, %v4386_v29 }
 0x8b4   :  { %v4410_v19 = vadd.f32 %v4394_v60, %v6132_v50  ;;  %v4411_v41 = vadd.f32 %v4395_v59, %v7808_v62  ;;  %v4412_v16 = vadd.f32 %v4396_v44, %v7809_v15  ;;  %v4413_v10 = vadd.f32 %v4397_v11, %v7810_v17 }
 0x8b5   :  { %v4414_v14 = vadd.f32 %v4398_v31, %v7811_v46  ;;  %v4415_v30 = vadd.f32 %v4399_v53, %v7812_v36  ;;  %v4416_v9 = vadd.f32 %v4400_v22, %v7813_v8  ;;  %v4417_v6 = vadd.f32 %v4401_v55, %v7814_v47 }
 0x8b6   :  { %v4418_v49 = vadd.f32 %v4402_v2, %v7815_v7  ;;  %v4419_v38 = vadd.f32 %v4403_v23, %v7816_v24  ;;  %v4420_v50 = vadd.f32 %v4404_v12, %v7817_v52  ;;  %v4421_v63 = vadd.f32 %v4405_v28, %v7818_v40 }
 0x8b7   :  { %v4422_v48 = vadd.f32 %v4406_v35, %v7819_v34  ;;  %v4423_v37 = vadd.f32 %v4407_v33, %v7820_v58  ;;  %v4424_v20 = vadd.f32 %v4408_v21, %v7821_v56  ;;  %v4425_v42 = vadd.f32 %v4409_v43, %v7822_v51 }
 0x8b8   :  { %vm4427_vm11 = vcmp.gt.f32.partialorder %v4410_v19, 0.0  ;;  %vm4428_vm12 = vcmp.gt.f32.partialorder %v4411_v41, 0.0  ;;  %vm4429_vm13 = vcmp.gt.f32.partialorder %v4412_v16, 0.0  ;;  %vm4430_vm14 = vcmp.gt.f32.partialorder %v4413_v10, 0.0 }
 0x8b9   :  { %vm4431_vm2 = vcmp.gt.f32.partialorder %v4414_v14, 0.0  ;;  %vm4432_vm15 = vcmp.gt.f32.partialorder %v4415_v30, 0.0  ;;  %vm4433_vm10 = vcmp.gt.f32.partialorder %v4416_v9, 0.0  ;;  %vm4434_vm0 = vcmp.gt.f32.partialorder %v4417_v6, 0.0 }
 0x8ba   :  { %vm4435_vm3 = vcmp.gt.f32.partialorder %v4418_v49, 0.0  ;;  %vm4436_vm5 = vcmp.gt.f32.partialorder %v4419_v38, 0.0  ;;  %vm4437_vm7 = vcmp.gt.f32.partialorder %v4420_v50, 0.0  ;;  %vm4438_vm9 = vcmp.gt.f32.partialorder %v4421_v63, 0.0 }
 0x8bb   :  { %vm4439_vm4 = vcmp.gt.f32.partialorder %v4422_v48, 0.0  ;;  %vm4440_vm6 = vcmp.gt.f32.partialorder %v4423_v37, 0.0  ;;  %vm4441_vm8 = vcmp.gt.f32.partialorder %v4424_v20, 0.0  ;;  %v4444_v13 = vmul.f32 %v7625_v26, %v4410_v19 }
 0x8bc   :  { %v4445_v1 = vmul.f32 %v7625_v26, %v4411_v41  ;;  %v4446_v3 = vmul.f32 %v7625_v26, %v4412_v16  ;;  %v4447_v45 = vmul.f32 %v7625_v26, %v4413_v10  ;;  %v4448_v5 = vmul.f32 %v7625_v26, %v4414_v14 }
 0x8bd   :  { %v4449_v4 = vmul.f32 %v7625_v26, %v4415_v30  ;;  %v4450_v0 = vmul.f32 %v7625_v26, %v4416_v9  ;;  %v4451_v32 = vmul.f32 %v7625_v26, %v4417_v6  ;;  %v4452_v18 = vmul.f32 %v7625_v26, %v4418_v49 }
 0x8be   :  { %v4453_v25 = vmul.f32 %v7625_v26, %v4419_v38  ;;  %v4454_v54 = vmul.f32 %v7625_v26, %v4420_v50  ;;  %v4455_v57 = vmul.f32 %v7625_v26, %v4421_v63  ;;  %v4456_v27 = vmul.f32 %v7625_v26, %v4422_v48 }
 0x8bf   :  { %v4457_v61 = vmul.f32 %v7625_v26, %v4423_v37  ;;  %v4458_v39 = vmul.f32 %v7625_v26, %v4424_v20  ;;  %v4459_v29 = vmul.f32 %v7625_v26, %v4425_v42  ;;  %v4460_v60 = vsel %vm4427_vm11, %v4410_v19, %v4444_v13  ;;  %vm7824_vm11 = vmmov %vm7823_vm1 }
 0x8c0   :  { %v4461_v59 = vsel %vm4428_vm12, %v4411_v41, %v4445_v1  ;;  %v4462_v44 = vsel %vm4429_vm13, %v4412_v16, %v4446_v3  ;;  %v4463_v11 = vsel %vm4430_vm14, %v4413_v10, %v4447_v45  ;;  %v4464_v31 = vsel %vm4431_vm2, %v4414_v14, %v4448_v5  ;;  %4476 = vst.msk [vmem:[%s7756_s11] sm:$0xff] %vm7823_vm1, %v4460_v60  ;;  %vm7825_vm12 = vmmov %vm7823_vm1 }
 0x8c1   :  { %v4465_v53 = vsel %vm4432_vm15, %v4415_v30, %v4449_v4  ;;  %v4466_v22 = vsel %vm4433_vm10, %v4416_v9, %v4450_v0  ;;  %v4467_v55 = vsel %vm4434_vm0, %v4417_v6, %v4451_v32  ;;  %4477 = vst.msk [vmem:[%s7756_s11 + $0x8] sm:$0xff] %vm7824_vm11, %v4461_v59  ;;  %vm7826_vm13 = vmmov %vm7823_vm1  ;;  %v4468_v26 = vsel %vm4435_vm3, %v4418_v49, %v4452_v18 }
 0x8c2   :  { %4478 = vst.msk [vmem:[%s7756_s11 + $0x10] sm:$0xff] %vm7825_vm12, %v4462_v44  ;;  %v4469_v2 = vsel %vm4436_vm5, %v4419_v38, %v4453_v25  ;;  %v4470_v23 = vsel %vm4437_vm7, %v4420_v50, %v4454_v54  ;;  %v4471_v12 = vsel %vm4438_vm9, %v4421_v63, %v4455_v57  ;;  %vm7827_vm14 = vmmov %vm7823_vm1  ;;  %v4472_v28 = vsel %vm4439_vm4, %v4422_v48, %v4456_v27 }
 0x8c3   :  { %4479 = vst.msk [vmem:[%s7756_s11 + $0x18] sm:$0xff] %vm7826_vm13, %v4463_v11  ;;  %vm7828_vm2 = vmmov %vm7823_vm1  ;;  %v4473_v35 = vsel %vm4440_vm6, %v4423_v37, %v4457_v61  ;;  %v4474_v33 = vsel %vm4441_vm8, %v4424_v20, %v4458_v39  ;;  %vm7830_vm10 = vcmp.gt.f32.partialorder %v4425_v42, 0.0 }
 0x8c4   :  { %4480 = vst.msk [vmem:[%s7756_s11 + $0x20] sm:$0xff] %vm7823_vm1, %v4464_v31  ;;  %vm7829_vm15 = vmmov %vm7823_vm1  ;;  %v4475_v21 = vsel %vm7830_vm10, %v4425_v42, %v4459_v29 }
 0x8c5   :  { %4481 = vst.msk [vmem:[%s7756_s11 + $0x28] sm:$0xff] %vm7827_vm14, %v4465_v53  ;;  %vm7831_vm0 = vmmov %vm7823_vm1 }
 0x8c6   :  { %4482 = vst.msk [vmem:[%s7756_s11 + $0x30] sm:$0xff] %vm7828_vm2, %v4466_v22  ;;  %vm7832_vm3 = vmmov %vm7831_vm0 }
 0x8c7   :  { %4483 = vst.msk [vmem:[%s7756_s11 + $0x38] sm:$0xff] %vm7829_vm15, %v4467_v55  ;;  %vm7833_vm5 = vmmov %vm7831_vm0 }
 0x8c8   :  { %4484 = vst.msk [vmem:[%s7756_s11 + $0x40] sm:$0xff] %vm7831_vm0, %v4468_v26  ;;  %vm7834_vm7 = vmmov %vm7831_vm0 }
 0x8c9   :  { %4485 = vst.msk [vmem:[%s7756_s11 + $0x48] sm:$0xff] %vm7832_vm3, %v4469_v2  ;;  %vm7835_vm9 = vmmov %vm7831_vm0 }
 0x8ca   :  { %4486 = vst.msk [vmem:[%s7756_s11 + $0x50] sm:$0xff] %vm7833_vm5, %v4470_v23  ;;  %vm7836_vm4 = vmmov %vm7831_vm0 }
 0x8cb   :  { %4487 = vst.msk [vmem:[%s7756_s11 + $0x58] sm:$0xff] %vm7834_vm7, %v4471_v12  ;;  %vm7837_vm6 = vmmov %vm7831_vm0 }
 0x8cc   :  { %4488 = vst.msk [vmem:[%s7756_s11 + $0x60] sm:$0xff] %vm7835_vm9, %v4472_v28  ;;  %vm7838_vm8 = vmmov %vm7831_vm0 }
 0x8cd   :  { %4489 = vst.msk [vmem:[%s7756_s11 + $0x68] sm:$0xff] %vm7836_vm4, %v4473_v35 }
 0x8ce   :  { %4490 = vst.msk [vmem:[%s7756_s11 + $0x70] sm:$0xff] %vm7837_vm6, %v4474_v33 }
 0x8cf   :  { %4491 = vst.msk [vmem:[%s7756_s11 + $0x78] sm:$0xff] %vm7838_vm8, %v4475_v21 }

</bundles_post_ra>
